<compile_context>
chip_gen: v7x
topology: tpu7x:2x2x1
jax: 0.10.0
libtpu: 0.0.40
codegen_flags: <defaults>
</compile_context>

<pallas_src>
import functools
import math

import jax
import jax.numpy as jnp
from jax import lax
from jax.experimental import pallas as pl
from jax.experimental.pallas import tpu as pltpu

PAD = 3  # halo: 1 (3x3 pool) + 2 (5x5 pool)


def _roll_lane(x, d):
    """Shift columns by d (|d| <= 2) along the 128-aligned lane axis via the XLU.

    Wrapped-around lanes only ever carry zeros (halo / lane padding), and the pooling max is
    symmetric in d, so the roll sign convention cannot affect the result.
    """
    if d == 0:
        return x
    n = x.shape[-1]
    return pltpu.roll(x, (-d) % n, 1)


def _pool3_minus_center(x, mask_b):
    """x: (He, Wp) plane, >= 0, zero outside the interior.

    Returns the 3x3 'boundary' map (windowed max minus center) evaluated at rows 1..He-2
    (interior + a 2-px ring needed by the following 5x5 pool), masked to the true interior.
    Shape: (He-2, Wp).
    """
    he = x.shape[0]
    rmax = jnp.maximum(jnp.maximum(x[0:he - 2, :], x[1:he - 1, :]), x[2:he, :])
    p = jnp.maximum(jnp.maximum(_roll_lane(rmax, -1), rmax), _roll_lane(rmax, 1))
    return (p - x[1:he - 1, :]) * mask_b


def _pool5_interior(x, H):
    """x: (He-2, Wp) boundary map (zero outside interior). 5x5 centered max at the H interior
    rows -> (H, Wp)."""
    rmax = x[0:H, :]
    for k in range(1, 5):
        rmax = jnp.maximum(rmax, x[k:k + H, :])
    out = rmax
    for d in (-2, -1, 1, 2):
        out = jnp.maximum(out, _roll_lane(rmax, d))
    return out


def _loss_kernel(x_ref, lab_ref, out_ref, *, C, H, W, prior_factors):
    """Per-sample partial sums.

    x_ref:   (1, C, He, Wp) float32 halo/lane padded logits of one sample
    lab_ref: (1, He, Wp)    int32 class ids (halo / lane pad = -1)
    out_ref: (1, 8, 128)    float32 partials:
        lanes [0,C)   : dice intersect per class
        lanes [C,2C)  : y_vol per class
        lanes [2C,3C) : p_vol per class
        lane  3C      : CE partial (logD2 & logit terms; -tau*lp*y_vol added in wrapper)
        lane  3C+1    : sum_c (1 - BF1_c) for this sample
    """
    He = H + 2 * PAD
    Wp = x_ref.shape[-1]

    labels = lab_ref[0]                                          # (He, Wp) int32

    # interior mask (1 inside the original HxW image, 0 on halo / lane padding)
    row = lax.broadcasted_iota(jnp.int32, (He, Wp), 0)
    col = lax.broadcasted_iota(jnp.int32, (He, Wp), 1)
    mask = ((row >= PAD) & (row < PAD + H) &
            (col >= PAD) & (col < PAD + W)).astype(jnp.float32)
    mask_b = mask[1:He - 1, :]                                   # (He-2, Wp)

    # ---- pass 1: per-pixel max over classes (softmax stabilizer) ----
    m = x_ref[0, 0]
    for c in range(1, C):
        m = jnp.maximum(m, x_ref[0, c])

    # ---- pass 2: shared exponentials + both softmax denominators ----
    # exp(x_c + tau*lp_c) = exp(x_c - m) * prior_factors[c]  (compile-time constant factor)
    exps = []
    den = None
    den2 = None
    for c in range(C):
        e = jnp.exp(x_ref[0, c] - m)
        exps.append(e)
        den = e if den is None else den + e
        fe = e * float(prior_factors[c])
        den2 = fe if den2 is None else den2 + fe
    inv_den = 1.0 / den
    log_den2 = jnp.log(den2)

    # ---- pass 3: fused per-class Dice / CE / Boundary ----
    inters, yvols, pvols = [], [], []
    ce_cross = jnp.float32(0.0)
    bd_part = jnp.float32(0.0)
    ysum = None
    for c in range(C):
        y = (labels == c).astype(jnp.float32)                    # zero on halo / lane pad
        p = exps[c] * inv_den
        p_m = p * mask

        inters.append(jnp.sum(y * p))
        yvols.append(jnp.sum(y))
        pvols.append(jnp.sum(p_m))
        ce_cross = ce_cross + jnp.sum(y * (x_ref[0, c] - m))
        ysum = y if ysum is None else ysum + y

        # boundary terms (zero outside interior -> zero pad == -inf pad for >=0 data)
        A = mask - y                                             # (1 - y) on interior
        B = mask - p_m                                           # (1 - p) on interior
        gt_b = _pool3_minus_center(A, mask_b)                    # (He-2, Wp)
        pr_b = _pool3_minus_center(B, mask_b)
        gt_ext = _pool5_interior(gt_b, H)                        # (H, Wp)
        pr_ext = _pool5_interior(pr_b, H)
        gt_i = gt_b[2:2 + H, :]                                  # interior boundary maps
        pr_i = pr_b[2:2 + H, :]

        P = jnp.sum(pr_i * gt_ext) / (jnp.sum(pr_i) + 1e-07)
        R = jnp.sum(pr_ext * gt_i) / (jnp.sum(gt_i) + 1e-07)
        BF1 = 2.0 * P * R / (P + R + 1e-07)
        bd_part = bd_part + (1.0 - BF1)

    ce_part = jnp.sum(ysum * log_den2) - ce_cross

    # ---- pack partials into a lane-dense (8,128) output plane ----
    lane = lax.broadcasted_iota(jnp.int32, (8, 128), 1)
    scalars = inters + yvols + pvols + [ce_part, bd_part]
    outp = jnp.zeros((8, 128), jnp.float32)
    for i, s in enumerate(scalars):
        outp = outp + jnp.where(lane == i, s, 0.0)
    out_ref[...] = outp[None]


def bd_lace_wdice_loss(predict, soft_y, *, cls_num, priors, dice_cls_weights, tau=1.0):
    """predict: (N, C, H, W) logits (NCHW like PyTorch); soft_y: (N, H, W) class ids."""
    N, C, H, W = predict.shape
    assert C == cls_num
    He = H + 2 * PAD
    Wp = ((W + 2 * PAD + 127) // 128) * 128                      # lane-dense last dim

    logits_pad = jnp.pad(predict.astype(jnp.float32),
                         ((0, 0), (0, 0), (PAD, PAD), (PAD, Wp - W - PAD)))
    labels_pad = jnp.pad(soft_y.astype(jnp.int32),
                         ((0, 0), (PAD, PAD), (PAD, Wp - W - PAD)),
                         constant_values=-1)

    log_priors = tuple(math.log(float(p) + 1e-08) for p in priors)
    prior_factors = tuple(math.exp(float(tau) * lp) for lp in log_priors)

    kernel = functools.partial(_loss_kernel, C=C, H=H, W=W, prior_factors=prior_factors)

    parts = pl.pallas_call(
        kernel,
        out_shape=jax.ShapeDtypeStruct((N, 8, 128), jnp.float32),
        grid_spec=pltpu.PrefetchScalarGridSpec(
            num_scalar_prefetch=0,
            grid=(N,),
            in_specs=[pl.BlockSpec((1, C, He, Wp), lambda n: (n, 0, 0, 0)),
                      pl.BlockSpec((1, He, Wp), lambda n: (n, 0, 0))],
            out_specs=pl.BlockSpec((1, 8, 128), lambda n: (n, 0, 0)),
        ),
        compiler_params=pltpu.CompilerParams(
            dimension_semantics=("parallel",),
            vmem_limit_bytes=32 * 1024 * 1024,
        ),
    )(logits_pad, labels_pad)

    # ---- tiny final combine in plain JAX ----
    tot = jnp.sum(parts[:, 0, :], axis=0)                        # (128,)
    inter = tot[0:C]
    y_vol = tot[C:2 * C]
    p_vol = tot[2 * C:3 * C]
    ce_part = tot[3 * C]
    bd_part = tot[3 * C + 1]

    w = jnp.asarray(dice_cls_weights, jnp.float32)
    dice = (2.0 * inter + 1e-05) / (y_vol + p_vol + 1e-05)
    wdice_loss = 1.0 - jnp.sum(dice * w) / jnp.sum(w)

    lp = jnp.asarray(log_priors, jnp.float32)
    ce_total = ce_part - float(tau) * jnp.sum(lp * y_vol)
    lace_loss = ce_total / float(N * H * W)

    bd_loss = bd_part / float(N * C)
    return wdice_loss + lace_loss + bd_loss


# ------------------- pure-JAX reference (mirrors the PyTorch module) -------------------
def reference_loss(predict, soft_y, priors, dice_cls_weights, tau):
    N, C, H, W = predict.shape
    p = jax.nn.softmax(predict, axis=1)
    onehot = jax.nn.one_hot(soft_y.astype(jnp.int32), C, axis=1, dtype=jnp.float32)
    w = jnp.asarray(dice_cls_weights, jnp.float32)

    # WeightedDiceLoss
    p2 = p.transpose(0, 2, 3, 1).reshape(-1, C)
    y2 = onehot.transpose(0, 2, 3, 1).reshape(-1, C)
    inter = (p2 * y2).sum(0); yv = y2.sum(0); pv = p2.sum(0)
    dice = (2.0 * inter + 1e-05) / (yv + pv + 1e-05)
    wdice_l = 1.0 - (dice * w).sum() / w.sum()

    # LACE
    lp = jnp.log(jnp.asarray(priors, jnp.float32) + 1e-08)
    z = predict.transpose(0, 2, 3, 1).reshape(-1, C) + tau * lp[None, :]
    q = jax.nn.softmax(z, axis=1)
    lace_l = jnp.mean(jnp.sum(-y2 * jnp.log(q), axis=1))

    # BoundaryLoss
    def mp(x, k):
        pad = (k - 1) // 2
        return lax.reduce_window(x, -jnp.inf, lax.max, (1, 1, k, k), (1, 1, 1, 1),
                                 [(0, 0), (0, 0), (pad, pad), (pad, pad)])
    gt_b = mp(1.0 - onehot, 3) - (1.0 - onehot)
    pr_b = mp(1.0 - p, 3) - (1.0 - p)
    gt_be = mp(gt_b, 5); pr_be = mp(pr_b, 5)
    gb = gt_b.reshape(N, C, -1); pb = pr_b.reshape(N, C, -1)
    gbe = gt_be.reshape(N, C, -1); pbe = pr_be.reshape(N, C, -1)
    P = (pb * gbe).sum(2) / (pb.sum(2) + 1e-07)
    R = (pbe * gb).sum(2) / (gb.sum(2) + 1e-07)
    BF1 = 2.0 * P * R / (P + R + 1e-07)
    bd_l = jnp.mean(1.0 - BF1)
    return wdice_l + lace_l + bd_l


if __name__ == "__main__":
    key = jax.random.PRNGKey(0)
    N, C, H, W = 2, 4, 16, 16
    k1, k2 = jax.random.split(key)
    predict = jax.random.normal(k1, (N, C, H, W), dtype=jnp.float32)
    soft_y = jax.random.randint(k2, (N, H, W), 0, C).astype(jnp.float32)

    # deterministic "module parameters" (from BD_LACE_WDiceLoss.__init__)
    priors = (0.4, 0.3, 0.2, 0.1)
    dice_cls_weights = (1.0, 2.0, 1.5, 0.5)
    tau = 1.0

    loss = bd_lace_wdice_loss(predict, soft_y, cls_num=C, priors=priors,
                              dice_cls_weights=dice_cls_weights, tau=tau)
    loss = jax.block_until_ready(loss)

    ref = float(reference_loss(predict, soft_y, priors, dice_cls_weights, tau))
    assert jnp.isfinite(loss), loss
    assert abs(float(loss) - ref) < 1e-03 * (1.0 + abs(ref)), (float(loss), ref)
    print("KERNEL_OK")
</pallas_src>

<mosaic_0001>
module attributes {stable_mosaic.version = 11 : i64} {
  func.func @_loss_kernel(%arg0: i32, %arg1: memref<1x4x22x128xf32, #tpu.memory_space<vmem>>, %arg2: memref<1x22x128xi32, #tpu.memory_space<vmem>>, %arg3: memref<1x8x128xf32, #tpu.memory_space<vmem>>) attributes {dimension_semantics = [#tpu.dimension_semantics<parallel>], iteration_bounds = array<i64: 2>, scalar_prefetch = 0 : i64, scratch_operands = 0 : i64, tpu.core_type = #tpu.core_type<tc>, window_params = [{transform_indices = @transform_0, window_bounds = array<i64: 1, 4, 22, 128>}, {transform_indices = @transform_1, window_bounds = array<i64: 1, 22, 128>}, {transform_indices = @transform_2, window_bounds = array<i64: 1, 8, 128>}]} {
    %c0 = arith.constant 0 : index
    %c0_0 = arith.constant 0 : index
    %c0_1 = arith.constant 0 : index
    %0 = vector.load %arg2[%c0, %c0_0, %c0_1] : memref<1x22x128xi32, #tpu.memory_space<vmem>>, vector<1x22x128xi32>
    %1 = vector.shape_cast %0 : vector<1x22x128xi32> to vector<22x128xi32>
    %2 = tpu.iota {dimensions = array<i32: 0>} : vector<22x128xi32>
    %3 = tpu.iota {dimensions = array<i32: 1>} : vector<22x128xi32>
    %c3_i32 = arith.constant 3 : i32
    %4 = vector.broadcast %c3_i32 : i32 to vector<22x128xi32>
    %5 = arith.cmpi sge, %2, %4 : vector<22x128xi32>
    %c19_i32 = arith.constant 19 : i32
    %6 = vector.broadcast %c19_i32 : i32 to vector<22x128xi32>
    %7 = arith.cmpi slt, %2, %6 : vector<22x128xi32>
    %8 = arith.andi %5, %7 : vector<22x128xi1>
    %c3_i32_2 = arith.constant 3 : i32
    %9 = vector.broadcast %c3_i32_2 : i32 to vector<22x128xi32>
    %10 = arith.cmpi sge, %3, %9 : vector<22x128xi32>
    %11 = arith.andi %8, %10 : vector<22x128xi1>
    %c19_i32_3 = arith.constant 19 : i32
    %12 = vector.broadcast %c19_i32_3 : i32 to vector<22x128xi32>
    %13 = arith.cmpi slt, %3, %12 : vector<22x128xi32>
    %14 = arith.andi %11, %13 : vector<22x128xi1>
    %15 = arith.extui %14 : vector<22x128xi1> to vector<22x128xi32>
    %16 = arith.sitofp %15 : vector<22x128xi32> to vector<22x128xf32>
    %17 = vector.extract_strided_slice %16 {offsets = [1, 0], sizes = [20, 128], strides = [1, 1]} : vector<22x128xf32> to vector<20x128xf32>
    %c0_4 = arith.constant 0 : index
    %c0_5 = arith.constant 0 : index
    %c0_6 = arith.constant 0 : index
    %c0_7 = arith.constant 0 : index
    %18 = vector.load %arg1[%c0_4, %c0_5, %c0_6, %c0_7] : memref<1x4x22x128xf32, #tpu.memory_space<vmem>>, vector<1x1x22x128xf32>
    %19 = vector.shape_cast %18 : vector<1x1x22x128xf32> to vector<22x128xf32>
    %c0_8 = arith.constant 0 : index
    %c1 = arith.constant 1 : index
    %c0_9 = arith.constant 0 : index
    %c0_10 = arith.constant 0 : index
    %20 = vector.load %arg1[%c0_8, %c1, %c0_9, %c0_10] : memref<1x4x22x128xf32, #tpu.memory_space<vmem>>, vector<1x1x22x128xf32>
    %21 = vector.shape_cast %20 : vector<1x1x22x128xf32> to vector<22x128xf32>
    %22 = arith.maximumf %19, %21 : vector<22x128xf32>
    %c0_11 = arith.constant 0 : index
    %c2 = arith.constant 2 : index
    %c0_12 = arith.constant 0 : index
    %c0_13 = arith.constant 0 : index
    %23 = vector.load %arg1[%c0_11, %c2, %c0_12, %c0_13] : memref<1x4x22x128xf32, #tpu.memory_space<vmem>>, vector<1x1x22x128xf32>
    %24 = vector.shape_cast %23 : vector<1x1x22x128xf32> to vector<22x128xf32>
    %25 = arith.maximumf %22, %24 : vector<22x128xf32>
    %c0_14 = arith.constant 0 : index
    %c3 = arith.constant 3 : index
    %c0_15 = arith.constant 0 : index
    %c0_16 = arith.constant 0 : index
    %26 = vector.load %arg1[%c0_14, %c3, %c0_15, %c0_16] : memref<1x4x22x128xf32, #tpu.memory_space<vmem>>, vector<1x1x22x128xf32>
    %27 = vector.shape_cast %26 : vector<1x1x22x128xf32> to vector<22x128xf32>
    %28 = arith.maximumf %25, %27 : vector<22x128xf32>
    %c0_17 = arith.constant 0 : index
    %c0_18 = arith.constant 0 : index
    %c0_19 = arith.constant 0 : index
    %c0_20 = arith.constant 0 : index
    %29 = vector.load %arg1[%c0_17, %c0_18, %c0_19, %c0_20] : memref<1x4x22x128xf32, #tpu.memory_space<vmem>>, vector<1x1x22x128xf32>
    %30 = vector.shape_cast %29 : vector<1x1x22x128xf32> to vector<22x128xf32>
    %31 = arith.subf %30, %28 : vector<22x128xf32>
    %32 = math.exp %31 : vector<22x128xf32>
    %cst = arith.constant 4.000000e-01 : f32
    %33 = vector.broadcast %cst : f32 to vector<22x128xf32>
    %34 = arith.mulf %32, %33 : vector<22x128xf32>
    %c0_21 = arith.constant 0 : index
    %c1_22 = arith.constant 1 : index
    %c0_23 = arith.constant 0 : index
    %c0_24 = arith.constant 0 : index
    %35 = vector.load %arg1[%c0_21, %c1_22, %c0_23, %c0_24] : memref<1x4x22x128xf32, #tpu.memory_space<vmem>>, vector<1x1x22x128xf32>
    %36 = vector.shape_cast %35 : vector<1x1x22x128xf32> to vector<22x128xf32>
    %37 = arith.subf %36, %28 : vector<22x128xf32>
    %38 = math.exp %37 : vector<22x128xf32>
    %39 = arith.addf %32, %38 : vector<22x128xf32>
    %cst_25 = arith.constant 3.000000e-01 : f32
    %40 = vector.broadcast %cst_25 : f32 to vector<22x128xf32>
    %41 = arith.mulf %38, %40 : vector<22x128xf32>
    %42 = arith.addf %34, %41 : vector<22x128xf32>
    %c0_26 = arith.constant 0 : index
    %c2_27 = arith.constant 2 : index
    %c0_28 = arith.constant 0 : index
    %c0_29 = arith.constant 0 : index
    %43 = vector.load %arg1[%c0_26, %c2_27, %c0_28, %c0_29] : memref<1x4x22x128xf32, #tpu.memory_space<vmem>>, vector<1x1x22x128xf32>
    %44 = vector.shape_cast %43 : vector<1x1x22x128xf32> to vector<22x128xf32>
    %45 = arith.subf %44, %28 : vector<22x128xf32>
    %46 = math.exp %45 : vector<22x128xf32>
    %47 = arith.addf %39, %46 : vector<22x128xf32>
    %cst_30 = arith.constant 2.000000e-01 : f32
    %48 = vector.broadcast %cst_30 : f32 to vector<22x128xf32>
    %49 = arith.mulf %46, %48 : vector<22x128xf32>
    %50 = arith.addf %42, %49 : vector<22x128xf32>
    %c0_31 = arith.constant 0 : index
    %c3_32 = arith.constant 3 : index
    %c0_33 = arith.constant 0 : index
    %c0_34 = arith.constant 0 : index
    %51 = vector.load %arg1[%c0_31, %c3_32, %c0_33, %c0_34] : memref<1x4x22x128xf32, #tpu.memory_space<vmem>>, vector<1x1x22x128xf32>
    %52 = vector.shape_cast %51 : vector<1x1x22x128xf32> to vector<22x128xf32>
    %53 = arith.subf %52, %28 : vector<22x128xf32>
    %54 = math.exp %53 : vector<22x128xf32>
    %55 = arith.addf %47, %54 : vector<22x128xf32>
    %cst_35 = arith.constant 0.100000009 : f32
    %56 = vector.broadcast %cst_35 : f32 to vector<22x128xf32>
    %57 = arith.mulf %54, %56 : vector<22x128xf32>
    %58 = arith.addf %50, %57 : vector<22x128xf32>
    %cst_36 = arith.constant 1.000000e+00 : f32
    %59 = vector.broadcast %cst_36 : f32 to vector<22x128xf32>
    %60 = arith.divf %59, %55 : vector<22x128xf32>
    %61 = math.log %58 : vector<22x128xf32>
    %c0_i32 = arith.constant 0 : i32
    %62 = vector.broadcast %c0_i32 : i32 to vector<22x128xi32>
    %63 = arith.cmpi eq, %1, %62 : vector<22x128xi32>
    %64 = arith.extui %63 : vector<22x128xi1> to vector<22x128xi32>
    %65 = arith.sitofp %64 : vector<22x128xi32> to vector<22x128xf32>
    %66 = arith.mulf %32, %60 : vector<22x128xf32>
    %67 = arith.mulf %66, %16 : vector<22x128xf32>
    %68 = arith.mulf %65, %66 : vector<22x128xf32>
    %69 = vector.shape_cast %68 : vector<22x128xf32> to vector<1x22x128xf32>
    %cst_37 = arith.constant dense<0.000000e+00> : vector<1xf32>
    %70 = vector.multi_reduction <add>, %69, %cst_37 [1, 2] : vector<1x22x128xf32> to vector<1xf32>
    %71 = vector.shape_cast %70 : vector<1xf32> to vector<1x1x1xf32>
    %72 = vector.extract %71[0, 0, 0] : f32 from vector<1x1x1xf32>
    %73 = vector.shape_cast %65 : vector<22x128xf32> to vector<1x22x128xf32>
    %cst_38 = arith.constant dense<0.000000e+00> : vector<1xf32>
    %74 = vector.multi_reduction <add>, %73, %cst_38 [1, 2] : vector<1x22x128xf32> to vector<1xf32>
    %75 = vector.shape_cast %74 : vector<1xf32> to vector<1x1x1xf32>
    %76 = vector.extract %75[0, 0, 0] : f32 from vector<1x1x1xf32>
    %77 = vector.shape_cast %67 : vector<22x128xf32> to vector<1x22x128xf32>
    %cst_39 = arith.constant dense<0.000000e+00> : vector<1xf32>
    %78 = vector.multi_reduction <add>, %77, %cst_39 [1, 2] : vector<1x22x128xf32> to vector<1xf32>
    %79 = vector.shape_cast %78 : vector<1xf32> to vector<1x1x1xf32>
    %80 = vector.extract %79[0, 0, 0] : f32 from vector<1x1x1xf32>
    %c0_40 = arith.constant 0 : index
    %c0_41 = arith.constant 0 : index
    %c0_42 = arith.constant 0 : index
    %c0_43 = arith.constant 0 : index
    %81 = vector.load %arg1[%c0_40, %c0_41, %c0_42, %c0_43] : memref<1x4x22x128xf32, #tpu.memory_space<vmem>>, vector<1x1x22x128xf32>
    %82 = vector.shape_cast %81 : vector<1x1x22x128xf32> to vector<22x128xf32>
    %83 = arith.subf %82, %28 : vector<22x128xf32>
    %84 = arith.mulf %65, %83 : vector<22x128xf32>
    %85 = vector.shape_cast %84 : vector<22x128xf32> to vector<1x22x128xf32>
    %cst_44 = arith.constant dense<0.000000e+00> : vector<1xf32>
    %86 = vector.multi_reduction <add>, %85, %cst_44 [1, 2] : vector<1x22x128xf32> to vector<1xf32>
    %87 = vector.shape_cast %86 : vector<1xf32> to vector<1x1x1xf32>
    %88 = vector.extract %87[0, 0, 0] : f32 from vector<1x1x1xf32>
    %cst_45 = arith.constant 0.000000e+00 : f32
    %89 = arith.addf %cst_45, %88 : f32
    %90 = arith.subf %16, %65 : vector<22x128xf32>
    %91 = arith.subf %16, %67 : vector<22x128xf32>
    %92 = vector.extract_strided_slice %90 {offsets = [0, 0], sizes = [20, 128], strides = [1, 1]} : vector<22x128xf32> to vector<20x128xf32>
    %93 = vector.extract_strided_slice %90 {offsets = [1, 0], sizes = [20, 128], strides = [1, 1]} : vector<22x128xf32> to vector<20x128xf32>
    %94 = arith.maximumf %92, %93 : vector<20x128xf32>
    %95 = vector.extract_strided_slice %90 {offsets = [2, 0], sizes = [20, 128], strides = [1, 1]} : vector<22x128xf32> to vector<20x128xf32>
    %96 = arith.maximumf %94, %95 : vector<20x128xf32>
    %c1_i32 = arith.constant 1 : i32
    %97 = tpu.dynamic_rotate %96 by %c1_i32 dim 1 : vector<20x128xf32>, i32 -> vector<20x128xf32>
    %98 = arith.maximumf %97, %96 : vector<20x128xf32>
    %c127_i32 = arith.constant 127 : i32
    %99 = tpu.dynamic_rotate %96 by %c127_i32 dim 1 : vector<20x128xf32>, i32 -> vector<20x128xf32>
    %100 = arith.maximumf %98, %99 : vector<20x128xf32>
    %101 = vector.extract_strided_slice %90 {offsets = [1, 0], sizes = [20, 128], strides = [1, 1]} : vector<22x128xf32> to vector<20x128xf32>
    %102 = arith.subf %100, %101 : vector<20x128xf32>
    %103 = arith.mulf %102, %17 : vector<20x128xf32>
    %104 = vector.extract_strided_slice %91 {offsets = [0, 0], sizes = [20, 128], strides = [1, 1]} : vector<22x128xf32> to vector<20x128xf32>
    %105 = vector.extract_strided_slice %91 {offsets = [1, 0], sizes = [20, 128], strides = [1, 1]} : vector<22x128xf32> to vector<20x128xf32>
    %106 = arith.maximumf %104, %105 : vector<20x128xf32>
    %107 = vector.extract_strided_slice %91 {offsets = [2, 0], sizes = [20, 128], strides = [1, 1]} : vector<22x128xf32> to vector<20x128xf32>
    %108 = arith.maximumf %106, %107 : vector<20x128xf32>
    %c1_i32_46 = arith.constant 1 : i32
    %109 = tpu.dynamic_rotate %108 by %c1_i32_46 dim 1 : vector<20x128xf32>, i32 -> vector<20x128xf32>
    %110 = arith.maximumf %109, %108 : vector<20x128xf32>
    %c127_i32_47 = arith.constant 127 : i32
    %111 = tpu.dynamic_rotate %108 by %c127_i32_47 dim 1 : vector<20x128xf32>, i32 -> vector<20x128xf32>
    %112 = arith.maximumf %110, %111 : vector<20x128xf32>
    %113 = vector.extract_strided_slice %91 {offsets = [1, 0], sizes = [20, 128], strides = [1, 1]} : vector<22x128xf32> to vector<20x128xf32>
    %114 = arith.subf %112, %113 : vector<20x128xf32>
    %115 = arith.mulf %114, %17 : vector<20x128xf32>
    %116 = vector.extract_strided_slice %103 {offsets = [0, 0], sizes = [16, 128], strides = [1, 1]} : vector<20x128xf32> to vector<16x128xf32>
    %117 = vector.extract_strided_slice %103 {offsets = [1, 0], sizes = [16, 128], strides = [1, 1]} : vector<20x128xf32> to vector<16x128xf32>
    %118 = arith.maximumf %116, %117 : vector<16x128xf32>
    %119 = vector.extract_strided_slice %103 {offsets = [2, 0], sizes = [16, 128], strides = [1, 1]} : vector<20x128xf32> to vector<16x128xf32>
    %120 = arith.maximumf %118, %119 : vector<16x128xf32>
    %121 = vector.extract_strided_slice %103 {offsets = [3, 0], sizes = [16, 128], strides = [1, 1]} : vector<20x128xf32> to vector<16x128xf32>
    %122 = arith.maximumf %120, %121 : vector<16x128xf32>
    %123 = vector.extract_strided_slice %103 {offsets = [4, 0], sizes = [16, 128], strides = [1, 1]} : vector<20x128xf32> to vector<16x128xf32>
    %124 = arith.maximumf %122, %123 : vector<16x128xf32>
    %c2_i32 = arith.constant 2 : i32
    %125 = tpu.dynamic_rotate %124 by %c2_i32 dim 1 : vector<16x128xf32>, i32 -> vector<16x128xf32>
    %126 = arith.maximumf %124, %125 : vector<16x128xf32>
    %c1_i32_48 = arith.constant 1 : i32
    %127 = tpu.dynamic_rotate %124 by %c1_i32_48 dim 1 : vector<16x128xf32>, i32 -> vector<16x128xf32>
    %128 = arith.maximumf %126, %127 : vector<16x128xf32>
    %c127_i32_49 = arith.constant 127 : i32
    %129 = tpu.dynamic_rotate %124 by %c127_i32_49 dim 1 : vector<16x128xf32>, i32 -> vector<16x128xf32>
    %130 = arith.maximumf %128, %129 : vector<16x128xf32>
    %c126_i32 = arith.constant 126 : i32
    %131 = tpu.dynamic_rotate %124 by %c126_i32 dim 1 : vector<16x128xf32>, i32 -> vector<16x128xf32>
    %132 = arith.maximumf %130, %131 : vector<16x128xf32>
    %133 = vector.extract_strided_slice %115 {offsets = [0, 0], sizes = [16, 128], strides = [1, 1]} : vector<20x128xf32> to vector<16x128xf32>
    %134 = vector.extract_strided_slice %115 {offsets = [1, 0], sizes = [16, 128], strides = [1, 1]} : vector<20x128xf32> to vector<16x128xf32>
    %135 = arith.maximumf %133, %134 : vector<16x128xf32>
    %136 = vector.extract_strided_slice %115 {offsets = [2, 0], sizes = [16, 128], strides = [1, 1]} : vector<20x128xf32> to vector<16x128xf32>
    %137 = arith.maximumf %135, %136 : vector<16x128xf32>
    %138 = vector.extract_strided_slice %115 {offsets = [3, 0], sizes = [16, 128], strides = [1, 1]} : vector<20x128xf32> to vector<16x128xf32>
    %139 = arith.maximumf %137, %138 : vector<16x128xf32>
    %140 = vector.extract_strided_slice %115 {offsets = [4, 0], sizes = [16, 128], strides = [1, 1]} : vector<20x128xf32> to vector<16x128xf32>
    %141 = arith.maximumf %139, %140 : vector<16x128xf32>
    %c2_i32_50 = arith.constant 2 : i32
    %142 = tpu.dynamic_rotate %141 by %c2_i32_50 dim 1 : vector<16x128xf32>, i32 -> vector<16x128xf32>
    %143 = arith.maximumf %141, %142 : vector<16x128xf32>
    %c1_i32_51 = arith.constant 1 : i32
    %144 = tpu.dynamic_rotate %141 by %c1_i32_51 dim 1 : vector<16x128xf32>, i32 -> vector<16x128xf32>
    %145 = arith.maximumf %143, %144 : vector<16x128xf32>
    %c127_i32_52 = arith.constant 127 : i32
    %146 = tpu.dynamic_rotate %141 by %c127_i32_52 dim 1 : vector<16x128xf32>, i32 -> vector<16x128xf32>
    %147 = arith.maximumf %145, %146 : vector<16x128xf32>
    %c126_i32_53 = arith.constant 126 : i32
    %148 = tpu.dynamic_rotate %141 by %c126_i32_53 dim 1 : vector<16x128xf32>, i32 -> vector<16x128xf32>
    %149 = arith.maximumf %147, %148 : vector<16x128xf32>
    %150 = vector.extract_strided_slice %103 {offsets = [2, 0], sizes = [16, 128], strides = [1, 1]} : vector<20x128xf32> to vector<16x128xf32>
    %151 = vector.extract_strided_slice %115 {offsets = [2, 0], sizes = [16, 128], strides = [1, 1]} : vector<20x128xf32> to vector<16x128xf32>
    %152 = arith.mulf %151, %132 : vector<16x128xf32>
    %153 = vector.shape_cast %152 : vector<16x128xf32> to vector<1x16x128xf32>
    %cst_54 = arith.constant dense<0.000000e+00> : vector<1xf32>
    %154 = vector.multi_reduction <add>, %153, %cst_54 [1, 2] : vector<1x16x128xf32> to vector<1xf32>
    %155 = vector.shape_cast %154 : vector<1xf32> to vector<1x1x1xf32>
    %156 = vector.extract %155[0, 0, 0] : f32 from vector<1x1x1xf32>
    %157 = vector.shape_cast %151 : vector<16x128xf32> to vector<1x16x128xf32>
    %cst_55 = arith.constant dense<0.000000e+00> : vector<1xf32>
    %158 = vector.multi_reduction <add>, %157, %cst_55 [1, 2] : vector<1x16x128xf32> to vector<1xf32>
    %159 = vector.shape_cast %158 : vector<1xf32> to vector<1x1x1xf32>
    %160 = vector.extract %159[0, 0, 0] : f32 from vector<1x1x1xf32>
    %cst_56 = arith.constant 1.000000e-07 : f32
    %161 = arith.addf %160, %cst_56 : f32
    %162 = arith.divf %156, %161 : f32
    %163 = arith.mulf %149, %150 : vector<16x128xf32>
    %164 = vector.shape_cast %163 : vector<16x128xf32> to vector<1x16x128xf32>
    %cst_57 = arith.constant dense<0.000000e+00> : vector<1xf32>
    %165 = vector.multi_reduction <add>, %164, %cst_57 [1, 2] : vector<1x16x128xf32> to vector<1xf32>
    %166 = vector.shape_cast %165 : vector<1xf32> to vector<1x1x1xf32>
    %167 = vector.extract %166[0, 0, 0] : f32 from vector<1x1x1xf32>
    %168 = vector.shape_cast %150 : vector<16x128xf32> to vector<1x16x128xf32>
    %cst_58 = arith.constant dense<0.000000e+00> : vector<1xf32>
    %169 = vector.multi_reduction <add>, %168, %cst_58 [1, 2] : vector<1x16x128xf32> to vector<1xf32>
    %170 = vector.shape_cast %169 : vector<1xf32> to vector<1x1x1xf32>
    %171 = vector.extract %170[0, 0, 0] : f32 from vector<1x1x1xf32>
    %cst_59 = arith.constant 1.000000e-07 : f32
    %172 = arith.addf %171, %cst_59 : f32
    %173 = arith.divf %167, %172 : f32
    %cst_60 = arith.constant 2.000000e+00 : f32
    %174 = arith.mulf %cst_60, %162 : f32
    %175 = arith.mulf %174, %173 : f32
    %176 = arith.addf %162, %173 : f32
    %cst_61 = arith.constant 1.000000e-07 : f32
    %177 = arith.addf %176, %cst_61 : f32
    %178 = arith.divf %175, %177 : f32
    %cst_62 = arith.constant 1.000000e+00 : f32
    %179 = arith.subf %cst_62, %178 : f32
    %cst_63 = arith.constant 0.000000e+00 : f32
    %180 = arith.addf %cst_63, %179 : f32
    %c1_i32_64 = arith.constant 1 : i32
    %181 = vector.broadcast %c1_i32_64 : i32 to vector<22x128xi32>
    %182 = arith.cmpi eq, %1, %181 : vector<22x128xi32>
    %183 = arith.extui %182 : vector<22x128xi1> to vector<22x128xi32>
    %184 = arith.sitofp %183 : vector<22x128xi32> to vector<22x128xf32>
    %185 = arith.mulf %38, %60 : vector<22x128xf32>
    %186 = arith.mulf %185, %16 : vector<22x128xf32>
    %187 = arith.mulf %184, %185 : vector<22x128xf32>
    %188 = vector.shape_cast %187 : vector<22x128xf32> to vector<1x22x128xf32>
    %cst_65 = arith.constant dense<0.000000e+00> : vector<1xf32>
    %189 = vector.multi_reduction <add>, %188, %cst_65 [1, 2] : vector<1x22x128xf32> to vector<1xf32>
    %190 = vector.shape_cast %189 : vector<1xf32> to vector<1x1x1xf32>
    %191 = vector.extract %190[0, 0, 0] : f32 from vector<1x1x1xf32>
    %192 = vector.shape_cast %184 : vector<22x128xf32> to vector<1x22x128xf32>
    %cst_66 = arith.constant dense<0.000000e+00> : vector<1xf32>
    %193 = vector.multi_reduction <add>, %192, %cst_66 [1, 2] : vector<1x22x128xf32> to vector<1xf32>
    %194 = vector.shape_cast %193 : vector<1xf32> to vector<1x1x1xf32>
    %195 = vector.extract %194[0, 0, 0] : f32 from vector<1x1x1xf32>
    %196 = vector.shape_cast %186 : vector<22x128xf32> to vector<1x22x128xf32>
    %cst_67 = arith.constant dense<0.000000e+00> : vector<1xf32>
    %197 = vector.multi_reduction <add>, %196, %cst_67 [1, 2] : vector<1x22x128xf32> to vector<1xf32>
    %198 = vector.shape_cast %197 : vector<1xf32> to vector<1x1x1xf32>
    %199 = vector.extract %198[0, 0, 0] : f32 from vector<1x1x1xf32>
    %c0_68 = arith.constant 0 : index
    %c1_69 = arith.constant 1 : index
    %c0_70 = arith.constant 0 : index
    %c0_71 = arith.constant 0 : index
    %200 = vector.load %arg1[%c0_68, %c1_69, %c0_70, %c0_71] : memref<1x4x22x128xf32, #tpu.memory_space<vmem>>, vector<1x1x22x128xf32>
    %201 = vector.shape_cast %200 : vector<1x1x22x128xf32> to vector<22x128xf32>
    %202 = arith.subf %201, %28 : vector<22x128xf32>
    %203 = arith.mulf %184, %202 : vector<22x128xf32>
    %204 = vector.shape_cast %203 : vector<22x128xf32> to vector<1x22x128xf32>
    %cst_72 = arith.constant dense<0.000000e+00> : vector<1xf32>
    %205 = vector.multi_reduction <add>, %204, %cst_72 [1, 2] : vector<1x22x128xf32> to vector<1xf32>
    %206 = vector.shape_cast %205 : vector<1xf32> to vector<1x1x1xf32>
    %207 = vector.extract %206[0, 0, 0] : f32 from vector<1x1x1xf32>
    %208 = arith.addf %89, %207 : f32
    %209 = arith.addf %65, %184 : vector<22x128xf32>
    %210 = arith.subf %16, %184 : vector<22x128xf32>
    %211 = arith.subf %16, %186 : vector<22x128xf32>
    %212 = vector.extract_strided_slice %210 {offsets = [0, 0], sizes = [20, 128], strides = [1, 1]} : vector<22x128xf32> to vector<20x128xf32>
    %213 = vector.extract_strided_slice %210 {offsets = [1, 0], sizes = [20, 128], strides = [1, 1]} : vector<22x128xf32> to vector<20x128xf32>
    %214 = arith.maximumf %212, %213 : vector<20x128xf32>
    %215 = vector.extract_strided_slice %210 {offsets = [2, 0], sizes = [20, 128], strides = [1, 1]} : vector<22x128xf32> to vector<20x128xf32>
    %216 = arith.maximumf %214, %215 : vector<20x128xf32>
    %c1_i32_73 = arith.constant 1 : i32
    %217 = tpu.dynamic_rotate %216 by %c1_i32_73 dim 1 : vector<20x128xf32>, i32 -> vector<20x128xf32>
    %218 = arith.maximumf %217, %216 : vector<20x128xf32>
    %c127_i32_74 = arith.constant 127 : i32
    %219 = tpu.dynamic_rotate %216 by %c127_i32_74 dim 1 : vector<20x128xf32>, i32 -> vector<20x128xf32>
    %220 = arith.maximumf %218, %219 : vector<20x128xf32>
    %221 = vector.extract_strided_slice %210 {offsets = [1, 0], sizes = [20, 128], strides = [1, 1]} : vector<22x128xf32> to vector<20x128xf32>
    %222 = arith.subf %220, %221 : vector<20x128xf32>
    %223 = arith.mulf %222, %17 : vector<20x128xf32>
    %224 = vector.extract_strided_slice %211 {offsets = [0, 0], sizes = [20, 128], strides = [1, 1]} : vector<22x128xf32> to vector<20x128xf32>
    %225 = vector.extract_strided_slice %211 {offsets = [1, 0], sizes = [20, 128], strides = [1, 1]} : vector<22x128xf32> to vector<20x128xf32>
    %226 = arith.maximumf %224, %225 : vector<20x128xf32>
    %227 = vector.extract_strided_slice %211 {offsets = [2, 0], sizes = [20, 128], strides = [1, 1]} : vector<22x128xf32> to vector<20x128xf32>
    %228 = arith.maximumf %226, %227 : vector<20x128xf32>
    %c1_i32_75 = arith.constant 1 : i32
    %229 = tpu.dynamic_rotate %228 by %c1_i32_75 dim 1 : vector<20x128xf32>, i32 -> vector<20x128xf32>
    %230 = arith.maximumf %229, %228 : vector<20x128xf32>
    %c127_i32_76 = arith.constant 127 : i32
    %231 = tpu.dynamic_rotate %228 by %c127_i32_76 dim 1 : vector<20x128xf32>, i32 -> vector<20x128xf32>
    %232 = arith.maximumf %230, %231 : vector<20x128xf32>
    %233 = vector.extract_strided_slice %211 {offsets = [1, 0], sizes = [20, 128], strides = [1, 1]} : vector<22x128xf32> to vector<20x128xf32>
    %234 = arith.subf %232, %233 : vector<20x128xf32>
    %235 = arith.mulf %234, %17 : vector<20x128xf32>
    %236 = vector.extract_strided_slice %223 {offsets = [0, 0], sizes = [16, 128], strides = [1, 1]} : vector<20x128xf32> to vector<16x128xf32>
    %237 = vector.extract_strided_slice %223 {offsets = [1, 0], sizes = [16, 128], strides = [1, 1]} : vector<20x128xf32> to vector<16x128xf32>
    %238 = arith.maximumf %236, %237 : vector<16x128xf32>
    %239 = vector.extract_strided_slice %223 {offsets = [2, 0], sizes = [16, 128], strides = [1, 1]} : vector<20x128xf32> to vector<16x128xf32>
    %240 = arith.maximumf %238, %239 : vector<16x128xf32>
    %241 = vector.extract_strided_slice %223 {offsets = [3, 0], sizes = [16, 128], strides = [1, 1]} : vector<20x128xf32> to vector<16x128xf32>
    %242 = arith.maximumf %240, %241 : vector<16x128xf32>
    %243 = vector.extract_strided_slice %223 {offsets = [4, 0], sizes = [16, 128], strides = [1, 1]} : vector<20x128xf32> to vector<16x128xf32>
    %244 = arith.maximumf %242, %243 : vector<16x128xf32>
    %c2_i32_77 = arith.constant 2 : i32
    %245 = tpu.dynamic_rotate %244 by %c2_i32_77 dim 1 : vector<16x128xf32>, i32 -> vector<16x128xf32>
    %246 = arith.maximumf %244, %245 : vector<16x128xf32>
    %c1_i32_78 = arith.constant 1 : i32
    %247 = tpu.dynamic_rotate %244 by %c1_i32_78 dim 1 : vector<16x128xf32>, i32 -> vector<16x128xf32>
    %248 = arith.maximumf %246, %247 : vector<16x128xf32>
    %c127_i32_79 = arith.constant 127 : i32
    %249 = tpu.dynamic_rotate %244 by %c127_i32_79 dim 1 : vector<16x128xf32>, i32 -> vector<16x128xf32>
    %250 = arith.maximumf %248, %249 : vector<16x128xf32>
    %c126_i32_80 = arith.constant 126 : i32
    %251 = tpu.dynamic_rotate %244 by %c126_i32_80 dim 1 : vector<16x128xf32>, i32 -> vector<16x128xf32>
    %252 = arith.maximumf %250, %251 : vector<16x128xf32>
    %253 = vector.extract_strided_slice %235 {offsets = [0, 0], sizes = [16, 128], strides = [1, 1]} : vector<20x128xf32> to vector<16x128xf32>
    %254 = vector.extract_strided_slice %235 {offsets = [1, 0], sizes = [16, 128], strides = [1, 1]} : vector<20x128xf32> to vector<16x128xf32>
    %255 = arith.maximumf %253, %254 : vector<16x128xf32>
    %256 = vector.extract_strided_slice %235 {offsets = [2, 0], sizes = [16, 128], strides = [1, 1]} : vector<20x128xf32> to vector<16x128xf32>
    %257 = arith.maximumf %255, %256 : vector<16x128xf32>
    %258 = vector.extract_strided_slice %235 {offsets = [3, 0], sizes = [16, 128], strides = [1, 1]} : vector<20x128xf32> to vector<16x128xf32>
    %259 = arith.maximumf %257, %258 : vector<16x128xf32>
    %260 = vector.extract_strided_slice %235 {offsets = [4, 0], sizes = [16, 128], strides = [1, 1]} : vector<20x128xf32> to vector<16x128xf32>
    %261 = arith.maximumf %259, %260 : vector<16x128xf32>
    %c2_i32_81 = arith.constant 2 : i32
    %262 = tpu.dynamic_rotate %261 by %c2_i32_81 dim 1 : vector<16x128xf32>, i32 -> vector<16x128xf32>
    %263 = arith.maximumf %261, %262 : vector<16x128xf32>
    %c1_i32_82 = arith.constant 1 : i32
    %264 = tpu.dynamic_rotate %261 by %c1_i32_82 dim 1 : vector<16x128xf32>, i32 -> vector<16x128xf32>
    %265 = arith.maximumf %263, %264 : vector<16x128xf32>
    %c127_i32_83 = arith.constant 127 : i32
    %266 = tpu.dynamic_rotate %261 by %c127_i32_83 dim 1 : vector<16x128xf32>, i32 -> vector<16x128xf32>
    %267 = arith.maximumf %265, %266 : vector<16x128xf32>
    %c126_i32_84 = arith.constant 126 : i32
    %268 = tpu.dynamic_rotate %261 by %c126_i32_84 dim 1 : vector<16x128xf32>, i32 -> vector<16x128xf32>
    %269 = arith.maximumf %267, %268 : vector<16x128xf32>
    %270 = vector.extract_strided_slice %223 {offsets = [2, 0], sizes = [16, 128], strides = [1, 1]} : vector<20x128xf32> to vector<16x128xf32>
    %271 = vector.extract_strided_slice %235 {offsets = [2, 0], sizes = [16, 128], strides = [1, 1]} : vector<20x128xf32> to vector<16x128xf32>
    %272 = arith.mulf %271, %252 : vector<16x128xf32>
    %273 = vector.shape_cast %272 : vector<16x128xf32> to vector<1x16x128xf32>
    %cst_85 = arith.constant dense<0.000000e+00> : vector<1xf32>
    %274 = vector.multi_reduction <add>, %273, %cst_85 [1, 2] : vector<1x16x128xf32> to vector<1xf32>
    %275 = vector.shape_cast %274 : vector<1xf32> to vector<1x1x1xf32>
    %276 = vector.extract %275[0, 0, 0] : f32 from vector<1x1x1xf32>
    %277 = vector.shape_cast %271 : vector<16x128xf32> to vector<1x16x128xf32>
    %cst_86 = arith.constant dense<0.000000e+00> : vector<1xf32>
    %278 = vector.multi_reduction <add>, %277, %cst_86 [1, 2] : vector<1x16x128xf32> to vector<1xf32>
    %279 = vector.shape_cast %278 : vector<1xf32> to vector<1x1x1xf32>
    %280 = vector.extract %279[0, 0, 0] : f32 from vector<1x1x1xf32>
    %cst_87 = arith.constant 1.000000e-07 : f32
    %281 = arith.addf %280, %cst_87 : f32
    %282 = arith.divf %276, %281 : f32
    %283 = arith.mulf %269, %270 : vector<16x128xf32>
    %284 = vector.shape_cast %283 : vector<16x128xf32> to vector<1x16x128xf32>
    %cst_88 = arith.constant dense<0.000000e+00> : vector<1xf32>
    %285 = vector.multi_reduction <add>, %284, %cst_88 [1, 2] : vector<1x16x128xf32> to vector<1xf32>
    %286 = vector.shape_cast %285 : vector<1xf32> to vector<1x1x1xf32>
    %287 = vector.extract %286[0, 0, 0] : f32 from vector<1x1x1xf32>
    %288 = vector.shape_cast %270 : vector<16x128xf32> to vector<1x16x128xf32>
    %cst_89 = arith.constant dense<0.000000e+00> : vector<1xf32>
    %289 = vector.multi_reduction <add>, %288, %cst_89 [1, 2] : vector<1x16x128xf32> to vector<1xf32>
    %290 = vector.shape_cast %289 : vector<1xf32> to vector<1x1x1xf32>
    %291 = vector.extract %290[0, 0, 0] : f32 from vector<1x1x1xf32>
    %cst_90 = arith.constant 1.000000e-07 : f32
    %292 = arith.addf %291, %cst_90 : f32
    %293 = arith.divf %287, %292 : f32
    %cst_91 = arith.constant 2.000000e+00 : f32
    %294 = arith.mulf %cst_91, %282 : f32
    %295 = arith.mulf %294, %293 : f32
    %296 = arith.addf %282, %293 : f32
    %cst_92 = arith.constant 1.000000e-07 : f32
    %297 = arith.addf %296, %cst_92 : f32
    %298 = arith.divf %295, %297 : f32
    %cst_93 = arith.constant 1.000000e+00 : f32
    %299 = arith.subf %cst_93, %298 : f32
    %300 = arith.addf %180, %299 : f32
    %c2_i32_94 = arith.constant 2 : i32
    %301 = vector.broadcast %c2_i32_94 : i32 to vector<22x128xi32>
    %302 = arith.cmpi eq, %1, %301 : vector<22x128xi32>
    %303 = arith.extui %302 : vector<22x128xi1> to vector<22x128xi32>
    %304 = arith.sitofp %303 : vector<22x128xi32> to vector<22x128xf32>
    %305 = arith.mulf %46, %60 : vector<22x128xf32>
    %306 = arith.mulf %305, %16 : vector<22x128xf32>
    %307 = arith.mulf %304, %305 : vector<22x128xf32>
    %308 = vector.shape_cast %307 : vector<22x128xf32> to vector<1x22x128xf32>
    %cst_95 = arith.constant dense<0.000000e+00> : vector<1xf32>
    %309 = vector.multi_reduction <add>, %308, %cst_95 [1, 2] : vector<1x22x128xf32> to vector<1xf32>
    %310 = vector.shape_cast %309 : vector<1xf32> to vector<1x1x1xf32>
    %311 = vector.extract %310[0, 0, 0] : f32 from vector<1x1x1xf32>
    %312 = vector.shape_cast %304 : vector<22x128xf32> to vector<1x22x128xf32>
    %cst_96 = arith.constant dense<0.000000e+00> : vector<1xf32>
    %313 = vector.multi_reduction <add>, %312, %cst_96 [1, 2] : vector<1x22x128xf32> to vector<1xf32>
    %314 = vector.shape_cast %313 : vector<1xf32> to vector<1x1x1xf32>
    %315 = vector.extract %314[0, 0, 0] : f32 from vector<1x1x1xf32>
    %316 = vector.shape_cast %306 : vector<22x128xf32> to vector<1x22x128xf32>
    %cst_97 = arith.constant dense<0.000000e+00> : vector<1xf32>
    %317 = vector.multi_reduction <add>, %316, %cst_97 [1, 2] : vector<1x22x128xf32> to vector<1xf32>
    %318 = vector.shape_cast %317 : vector<1xf32> to vector<1x1x1xf32>
    %319 = vector.extract %318[0, 0, 0] : f32 from vector<1x1x1xf32>
    %c0_98 = arith.constant 0 : index
    %c2_99 = arith.constant 2 : index
    %c0_100 = arith.constant 0 : index
    %c0_101 = arith.constant 0 : index
    %320 = vector.load %arg1[%c0_98, %c2_99, %c0_100, %c0_101] : memref<1x4x22x128xf32, #tpu.memory_space<vmem>>, vector<1x1x22x128xf32>
    %321 = vector.shape_cast %320 : vector<1x1x22x128xf32> to vector<22x128xf32>
    %322 = arith.subf %321, %28 : vector<22x128xf32>
    %323 = arith.mulf %304, %322 : vector<22x128xf32>
    %324 = vector.shape_cast %323 : vector<22x128xf32> to vector<1x22x128xf32>
    %cst_102 = arith.constant dense<0.000000e+00> : vector<1xf32>
    %325 = vector.multi_reduction <add>, %324, %cst_102 [1, 2] : vector<1x22x128xf32> to vector<1xf32>
    %326 = vector.shape_cast %325 : vector<1xf32> to vector<1x1x1xf32>
    %327 = vector.extract %326[0, 0, 0] : f32 from vector<1x1x1xf32>
    %328 = arith.addf %208, %327 : f32
    %329 = arith.addf %209, %304 : vector<22x128xf32>
    %330 = arith.subf %16, %304 : vector<22x128xf32>
    %331 = arith.subf %16, %306 : vector<22x128xf32>
    %332 = vector.extract_strided_slice %330 {offsets = [0, 0], sizes = [20, 128], strides = [1, 1]} : vector<22x128xf32> to vector<20x128xf32>
    %333 = vector.extract_strided_slice %330 {offsets = [1, 0], sizes = [20, 128], strides = [1, 1]} : vector<22x128xf32> to vector<20x128xf32>
    %334 = arith.maximumf %332, %333 : vector<20x128xf32>
    %335 = vector.extract_strided_slice %330 {offsets = [2, 0], sizes = [20, 128], strides = [1, 1]} : vector<22x128xf32> to vector<20x128xf32>
    %336 = arith.maximumf %334, %335 : vector<20x128xf32>
    %c1_i32_103 = arith.constant 1 : i32
    %337 = tpu.dynamic_rotate %336 by %c1_i32_103 dim 1 : vector<20x128xf32>, i32 -> vector<20x128xf32>
    %338 = arith.maximumf %337, %336 : vector<20x128xf32>
    %c127_i32_104 = arith.constant 127 : i32
    %339 = tpu.dynamic_rotate %336 by %c127_i32_104 dim 1 : vector<20x128xf32>, i32 -> vector<20x128xf32>
    %340 = arith.maximumf %338, %339 : vector<20x128xf32>
    %341 = vector.extract_strided_slice %330 {offsets = [1, 0], sizes = [20, 128], strides = [1, 1]} : vector<22x128xf32> to vector<20x128xf32>
    %342 = arith.subf %340, %341 : vector<20x128xf32>
    %343 = arith.mulf %342, %17 : vector<20x128xf32>
    %344 = vector.extract_strided_slice %331 {offsets = [0, 0], sizes = [20, 128], strides = [1, 1]} : vector<22x128xf32> to vector<20x128xf32>
    %345 = vector.extract_strided_slice %331 {offsets = [1, 0], sizes = [20, 128], strides = [1, 1]} : vector<22x128xf32> to vector<20x128xf32>
    %346 = arith.maximumf %344, %345 : vector<20x128xf32>
    %347 = vector.extract_strided_slice %331 {offsets = [2, 0], sizes = [20, 128], strides = [1, 1]} : vector<22x128xf32> to vector<20x128xf32>
    %348 = arith.maximumf %346, %347 : vector<20x128xf32>
    %c1_i32_105 = arith.constant 1 : i32
    %349 = tpu.dynamic_rotate %348 by %c1_i32_105 dim 1 : vector<20x128xf32>, i32 -> vector<20x128xf32>
    %350 = arith.maximumf %349, %348 : vector<20x128xf32>
    %c127_i32_106 = arith.constant 127 : i32
    %351 = tpu.dynamic_rotate %348 by %c127_i32_106 dim 1 : vector<20x128xf32>, i32 -> vector<20x128xf32>
    %352 = arith.maximumf %350, %351 : vector<20x128xf32>
    %353 = vector.extract_strided_slice %331 {offsets = [1, 0], sizes = [20, 128], strides = [1, 1]} : vector<22x128xf32> to vector<20x128xf32>
    %354 = arith.subf %352, %353 : vector<20x128xf32>
    %355 = arith.mulf %354, %17 : vector<20x128xf32>
    %356 = vector.extract_strided_slice %343 {offsets = [0, 0], sizes = [16, 128], strides = [1, 1]} : vector<20x128xf32> to vector<16x128xf32>
    %357 = vector.extract_strided_slice %343 {offsets = [1, 0], sizes = [16, 128], strides = [1, 1]} : vector<20x128xf32> to vector<16x128xf32>
    %358 = arith.maximumf %356, %357 : vector<16x128xf32>
    %359 = vector.extract_strided_slice %343 {offsets = [2, 0], sizes = [16, 128], strides = [1, 1]} : vector<20x128xf32> to vector<16x128xf32>
    %360 = arith.maximumf %358, %359 : vector<16x128xf32>
    %361 = vector.extract_strided_slice %343 {offsets = [3, 0], sizes = [16, 128], strides = [1, 1]} : vector<20x128xf32> to vector<16x128xf32>
    %362 = arith.maximumf %360, %361 : vector<16x128xf32>
    %363 = vector.extract_strided_slice %343 {offsets = [4, 0], sizes = [16, 128], strides = [1, 1]} : vector<20x128xf32> to vector<16x128xf32>
    %364 = arith.maximumf %362, %363 : vector<16x128xf32>
    %c2_i32_107 = arith.constant 2 : i32
    %365 = tpu.dynamic_rotate %364 by %c2_i32_107 dim 1 : vector<16x128xf32>, i32 -> vector<16x128xf32>
    %366 = arith.maximumf %364, %365 : vector<16x128xf32>
    %c1_i32_108 = arith.constant 1 : i32
    %367 = tpu.dynamic_rotate %364 by %c1_i32_108 dim 1 : vector<16x128xf32>, i32 -> vector<16x128xf32>
    %368 = arith.maximumf %366, %367 : vector<16x128xf32>
    %c127_i32_109 = arith.constant 127 : i32
    %369 = tpu.dynamic_rotate %364 by %c127_i32_109 dim 1 : vector<16x128xf32>, i32 -> vector<16x128xf32>
    %370 = arith.maximumf %368, %369 : vector<16x128xf32>
    %c126_i32_110 = arith.constant 126 : i32
    %371 = tpu.dynamic_rotate %364 by %c126_i32_110 dim 1 : vector<16x128xf32>, i32 -> vector<16x128xf32>
    %372 = arith.maximumf %370, %371 : vector<16x128xf32>
    %373 = vector.extract_strided_slice %355 {offsets = [0, 0], sizes = [16, 128], strides = [1, 1]} : vector<20x128xf32> to vector<16x128xf32>
    %374 = vector.extract_strided_slice %355 {offsets = [1, 0], sizes = [16, 128], strides = [1, 1]} : vector<20x128xf32> to vector<16x128xf32>
    %375 = arith.maximumf %373, %374 : vector<16x128xf32>
    %376 = vector.extract_strided_slice %355 {offsets = [2, 0], sizes = [16, 128], strides = [1, 1]} : vector<20x128xf32> to vector<16x128xf32>
    %377 = arith.maximumf %375, %376 : vector<16x128xf32>
    %378 = vector.extract_strided_slice %355 {offsets = [3, 0], sizes = [16, 128], strides = [1, 1]} : vector<20x128xf32> to vector<16x128xf32>
    %379 = arith.maximumf %377, %378 : vector<16x128xf32>
    %380 = vector.extract_strided_slice %355 {offsets = [4, 0], sizes = [16, 128], strides = [1, 1]} : vector<20x128xf32> to vector<16x128xf32>
    %381 = arith.maximumf %379, %380 : vector<16x128xf32>
    %c2_i32_111 = arith.constant 2 : i32
    %382 = tpu.dynamic_rotate %381 by %c2_i32_111 dim 1 : vector<16x128xf32>, i32 -> vector<16x128xf32>
    %383 = arith.maximumf %381, %382 : vector<16x128xf32>
    %c1_i32_112 = arith.constant 1 : i32
    %384 = tpu.dynamic_rotate %381 by %c1_i32_112 dim 1 : vector<16x128xf32>, i32 -> vector<16x128xf32>
    %385 = arith.maximumf %383, %384 : vector<16x128xf32>
    %c127_i32_113 = arith.constant 127 : i32
    %386 = tpu.dynamic_rotate %381 by %c127_i32_113 dim 1 : vector<16x128xf32>, i32 -> vector<16x128xf32>
    %387 = arith.maximumf %385, %386 : vector<16x128xf32>
    %c126_i32_114 = arith.constant 126 : i32
    %388 = tpu.dynamic_rotate %381 by %c126_i32_114 dim 1 : vector<16x128xf32>, i32 -> vector<16x128xf32>
    %389 = arith.maximumf %387, %388 : vector<16x128xf32>
    %390 = vector.extract_strided_slice %343 {offsets = [2, 0], sizes = [16, 128], strides = [1, 1]} : vector<20x128xf32> to vector<16x128xf32>
    %391 = vector.extract_strided_slice %355 {offsets = [2, 0], sizes = [16, 128], strides = [1, 1]} : vector<20x128xf32> to vector<16x128xf32>
    %392 = arith.mulf %391, %372 : vector<16x128xf32>
    %393 = vector.shape_cast %392 : vector<16x128xf32> to vector<1x16x128xf32>
    %cst_115 = arith.constant dense<0.000000e+00> : vector<1xf32>
    %394 = vector.multi_reduction <add>, %393, %cst_115 [1, 2] : vector<1x16x128xf32> to vector<1xf32>
    %395 = vector.shape_cast %394 : vector<1xf32> to vector<1x1x1xf32>
    %396 = vector.extract %395[0, 0, 0] : f32 from vector<1x1x1xf32>
    %397 = vector.shape_cast %391 : vector<16x128xf32> to vector<1x16x128xf32>
    %cst_116 = arith.constant dense<0.000000e+00> : vector<1xf32>
    %398 = vector.multi_reduction <add>, %397, %cst_116 [1, 2] : vector<1x16x128xf32> to vector<1xf32>
    %399 = vector.shape_cast %398 : vector<1xf32> to vector<1x1x1xf32>
    %400 = vector.extract %399[0, 0, 0] : f32 from vector<1x1x1xf32>
    %cst_117 = arith.constant 1.000000e-07 : f32
    %401 = arith.addf %400, %cst_117 : f32
    %402 = arith.divf %396, %401 : f32
    %403 = arith.mulf %389, %390 : vector<16x128xf32>
    %404 = vector.shape_cast %403 : vector<16x128xf32> to vector<1x16x128xf32>
    %cst_118 = arith.constant dense<0.000000e+00> : vector<1xf32>
    %405 = vector.multi_reduction <add>, %404, %cst_118 [1, 2] : vector<1x16x128xf32> to vector<1xf32>
    %406 = vector.shape_cast %405 : vector<1xf32> to vector<1x1x1xf32>
    %407 = vector.extract %406[0, 0, 0] : f32 from vector<1x1x1xf32>
    %408 = vector.shape_cast %390 : vector<16x128xf32> to vector<1x16x128xf32>
    %cst_119 = arith.constant dense<0.000000e+00> : vector<1xf32>
    %409 = vector.multi_reduction <add>, %408, %cst_119 [1, 2] : vector<1x16x128xf32> to vector<1xf32>
    %410 = vector.shape_cast %409 : vector<1xf32> to vector<1x1x1xf32>
    %411 = vector.extract %410[0, 0, 0] : f32 from vector<1x1x1xf32>
    %cst_120 = arith.constant 1.000000e-07 : f32
    %412 = arith.addf %411, %cst_120 : f32
    %413 = arith.divf %407, %412 : f32
    %cst_121 = arith.constant 2.000000e+00 : f32
    %414 = arith.mulf %cst_121, %402 : f32
    %415 = arith.mulf %414, %413 : f32
    %416 = arith.addf %402, %413 : f32
    %cst_122 = arith.constant 1.000000e-07 : f32
    %417 = arith.addf %416, %cst_122 : f32
    %418 = arith.divf %415, %417 : f32
    %cst_123 = arith.constant 1.000000e+00 : f32
    %419 = arith.subf %cst_123, %418 : f32
    %420 = arith.addf %300, %419 : f32
    %c3_i32_124 = arith.constant 3 : i32
    %421 = vector.broadcast %c3_i32_124 : i32 to vector<22x128xi32>
    %422 = arith.cmpi eq, %1, %421 : vector<22x128xi32>
    %423 = arith.extui %422 : vector<22x128xi1> to vector<22x128xi32>
    %424 = arith.sitofp %423 : vector<22x128xi32> to vector<22x128xf32>
    %425 = arith.mulf %54, %60 : vector<22x128xf32>
    %426 = arith.mulf %425, %16 : vector<22x128xf32>
    %427 = arith.mulf %424, %425 : vector<22x128xf32>
    %428 = vector.shape_cast %427 : vector<22x128xf32> to vector<1x22x128xf32>
    %cst_125 = arith.constant dense<0.000000e+00> : vector<1xf32>
    %429 = vector.multi_reduction <add>, %428, %cst_125 [1, 2] : vector<1x22x128xf32> to vector<1xf32>
    %430 = vector.shape_cast %429 : vector<1xf32> to vector<1x1x1xf32>
    %431 = vector.extract %430[0, 0, 0] : f32 from vector<1x1x1xf32>
    %432 = vector.shape_cast %424 : vector<22x128xf32> to vector<1x22x128xf32>
    %cst_126 = arith.constant dense<0.000000e+00> : vector<1xf32>
    %433 = vector.multi_reduction <add>, %432, %cst_126 [1, 2] : vector<1x22x128xf32> to vector<1xf32>
    %434 = vector.shape_cast %433 : vector<1xf32> to vector<1x1x1xf32>
    %435 = vector.extract %434[0, 0, 0] : f32 from vector<1x1x1xf32>
    %436 = vector.shape_cast %426 : vector<22x128xf32> to vector<1x22x128xf32>
    %cst_127 = arith.constant dense<0.000000e+00> : vector<1xf32>
    %437 = vector.multi_reduction <add>, %436, %cst_127 [1, 2] : vector<1x22x128xf32> to vector<1xf32>
    %438 = vector.shape_cast %437 : vector<1xf32> to vector<1x1x1xf32>
    %439 = vector.extract %438[0, 0, 0] : f32 from vector<1x1x1xf32>
    %c0_128 = arith.constant 0 : index
    %c3_129 = arith.constant 3 : index
    %c0_130 = arith.constant 0 : index
    %c0_131 = arith.constant 0 : index
    %440 = vector.load %arg1[%c0_128, %c3_129, %c0_130, %c0_131] : memref<1x4x22x128xf32, #tpu.memory_space<vmem>>, vector<1x1x22x128xf32>
    %441 = vector.shape_cast %440 : vector<1x1x22x128xf32> to vector<22x128xf32>
    %442 = arith.subf %441, %28 : vector<22x128xf32>
    %443 = arith.mulf %424, %442 : vector<22x128xf32>
    %444 = vector.shape_cast %443 : vector<22x128xf32> to vector<1x22x128xf32>
    %cst_132 = arith.constant dense<0.000000e+00> : vector<1xf32>
    %445 = vector.multi_reduction <add>, %444, %cst_132 [1, 2] : vector<1x22x128xf32> to vector<1xf32>
    %446 = vector.shape_cast %445 : vector<1xf32> to vector<1x1x1xf32>
    %447 = vector.extract %446[0, 0, 0] : f32 from vector<1x1x1xf32>
    %448 = arith.addf %328, %447 : f32
    %449 = arith.addf %329, %424 : vector<22x128xf32>
    %450 = arith.subf %16, %424 : vector<22x128xf32>
    %451 = arith.subf %16, %426 : vector<22x128xf32>
    %452 = vector.extract_strided_slice %450 {offsets = [0, 0], sizes = [20, 128], strides = [1, 1]} : vector<22x128xf32> to vector<20x128xf32>
    %453 = vector.extract_strided_slice %450 {offsets = [1, 0], sizes = [20, 128], strides = [1, 1]} : vector<22x128xf32> to vector<20x128xf32>
    %454 = arith.maximumf %452, %453 : vector<20x128xf32>
    %455 = vector.extract_strided_slice %450 {offsets = [2, 0], sizes = [20, 128], strides = [1, 1]} : vector<22x128xf32> to vector<20x128xf32>
    %456 = arith.maximumf %454, %455 : vector<20x128xf32>
    %c1_i32_133 = arith.constant 1 : i32
    %457 = tpu.dynamic_rotate %456 by %c1_i32_133 dim 1 : vector<20x128xf32>, i32 -> vector<20x128xf32>
    %458 = arith.maximumf %457, %456 : vector<20x128xf32>
    %c127_i32_134 = arith.constant 127 : i32
    %459 = tpu.dynamic_rotate %456 by %c127_i32_134 dim 1 : vector<20x128xf32>, i32 -> vector<20x128xf32>
    %460 = arith.maximumf %458, %459 : vector<20x128xf32>
    %461 = vector.extract_strided_slice %450 {offsets = [1, 0], sizes = [20, 128], strides = [1, 1]} : vector<22x128xf32> to vector<20x128xf32>
    %462 = arith.subf %460, %461 : vector<20x128xf32>
    %463 = arith.mulf %462, %17 : vector<20x128xf32>
    %464 = vector.extract_strided_slice %451 {offsets = [0, 0], sizes = [20, 128], strides = [1, 1]} : vector<22x128xf32> to vector<20x128xf32>
    %465 = vector.extract_strided_slice %451 {offsets = [1, 0], sizes = [20, 128], strides = [1, 1]} : vector<22x128xf32> to vector<20x128xf32>
    %466 = arith.maximumf %464, %465 : vector<20x128xf32>
    %467 = vector.extract_strided_slice %451 {offsets = [2, 0], sizes = [20, 128], strides = [1, 1]} : vector<22x128xf32> to vector<20x128xf32>
    %468 = arith.maximumf %466, %467 : vector<20x128xf32>
    %c1_i32_135 = arith.constant 1 : i32
    %469 = tpu.dynamic_rotate %468 by %c1_i32_135 dim 1 : vector<20x128xf32>, i32 -> vector<20x128xf32>
    %470 = arith.maximumf %469, %468 : vector<20x128xf32>
    %c127_i32_136 = arith.constant 127 : i32
    %471 = tpu.dynamic_rotate %468 by %c127_i32_136 dim 1 : vector<20x128xf32>, i32 -> vector<20x128xf32>
    %472 = arith.maximumf %470, %471 : vector<20x128xf32>
    %473 = vector.extract_strided_slice %451 {offsets = [1, 0], sizes = [20, 128], strides = [1, 1]} : vector<22x128xf32> to vector<20x128xf32>
    %474 = arith.subf %472, %473 : vector<20x128xf32>
    %475 = arith.mulf %474, %17 : vector<20x128xf32>
    %476 = vector.extract_strided_slice %463 {offsets = [0, 0], sizes = [16, 128], strides = [1, 1]} : vector<20x128xf32> to vector<16x128xf32>
    %477 = vector.extract_strided_slice %463 {offsets = [1, 0], sizes = [16, 128], strides = [1, 1]} : vector<20x128xf32> to vector<16x128xf32>
    %478 = arith.maximumf %476, %477 : vector<16x128xf32>
    %479 = vector.extract_strided_slice %463 {offsets = [2, 0], sizes = [16, 128], strides = [1, 1]} : vector<20x128xf32> to vector<16x128xf32>
    %480 = arith.maximumf %478, %479 : vector<16x128xf32>
    %481 = vector.extract_strided_slice %463 {offsets = [3, 0], sizes = [16, 128], strides = [1, 1]} : vector<20x128xf32> to vector<16x128xf32>
    %482 = arith.maximumf %480, %481 : vector<16x128xf32>
    %483 = vector.extract_strided_slice %463 {offsets = [4, 0], sizes = [16, 128], strides = [1, 1]} : vector<20x128xf32> to vector<16x128xf32>
    %484 = arith.maximumf %482, %483 : vector<16x128xf32>
    %c2_i32_137 = arith.constant 2 : i32
    %485 = tpu.dynamic_rotate %484 by %c2_i32_137 dim 1 : vector<16x128xf32>, i32 -> vector<16x128xf32>
    %486 = arith.maximumf %484, %485 : vector<16x128xf32>
    %c1_i32_138 = arith.constant 1 : i32
    %487 = tpu.dynamic_rotate %484 by %c1_i32_138 dim 1 : vector<16x128xf32>, i32 -> vector<16x128xf32>
    %488 = arith.maximumf %486, %487 : vector<16x128xf32>
    %c127_i32_139 = arith.constant 127 : i32
    %489 = tpu.dynamic_rotate %484 by %c127_i32_139 dim 1 : vector<16x128xf32>, i32 -> vector<16x128xf32>
    %490 = arith.maximumf %488, %489 : vector<16x128xf32>
    %c126_i32_140 = arith.constant 126 : i32
    %491 = tpu.dynamic_rotate %484 by %c126_i32_140 dim 1 : vector<16x128xf32>, i32 -> vector<16x128xf32>
    %492 = arith.maximumf %490, %491 : vector<16x128xf32>
    %493 = vector.extract_strided_slice %475 {offsets = [0, 0], sizes = [16, 128], strides = [1, 1]} : vector<20x128xf32> to vector<16x128xf32>
    %494 = vector.extract_strided_slice %475 {offsets = [1, 0], sizes = [16, 128], strides = [1, 1]} : vector<20x128xf32> to vector<16x128xf32>
    %495 = arith.maximumf %493, %494 : vector<16x128xf32>
    %496 = vector.extract_strided_slice %475 {offsets = [2, 0], sizes = [16, 128], strides = [1, 1]} : vector<20x128xf32> to vector<16x128xf32>
    %497 = arith.maximumf %495, %496 : vector<16x128xf32>
    %498 = vector.extract_strided_slice %475 {offsets = [3, 0], sizes = [16, 128], strides = [1, 1]} : vector<20x128xf32> to vector<16x128xf32>
    %499 = arith.maximumf %497, %498 : vector<16x128xf32>
    %500 = vector.extract_strided_slice %475 {offsets = [4, 0], sizes = [16, 128], strides = [1, 1]} : vector<20x128xf32> to vector<16x128xf32>
    %501 = arith.maximumf %499, %500 : vector<16x128xf32>
    %c2_i32_141 = arith.constant 2 : i32
    %502 = tpu.dynamic_rotate %501 by %c2_i32_141 dim 1 : vector<16x128xf32>, i32 -> vector<16x128xf32>
    %503 = arith.maximumf %501, %502 : vector<16x128xf32>
    %c1_i32_142 = arith.constant 1 : i32
    %504 = tpu.dynamic_rotate %501 by %c1_i32_142 dim 1 : vector<16x128xf32>, i32 -> vector<16x128xf32>
    %505 = arith.maximumf %503, %504 : vector<16x128xf32>
    %c127_i32_143 = arith.constant 127 : i32
    %506 = tpu.dynamic_rotate %501 by %c127_i32_143 dim 1 : vector<16x128xf32>, i32 -> vector<16x128xf32>
    %507 = arith.maximumf %505, %506 : vector<16x128xf32>
    %c126_i32_144 = arith.constant 126 : i32
    %508 = tpu.dynamic_rotate %501 by %c126_i32_144 dim 1 : vector<16x128xf32>, i32 -> vector<16x128xf32>
    %509 = arith.maximumf %507, %508 : vector<16x128xf32>
    %510 = vector.extract_strided_slice %463 {offsets = [2, 0], sizes = [16, 128], strides = [1, 1]} : vector<20x128xf32> to vector<16x128xf32>
    %511 = vector.extract_strided_slice %475 {offsets = [2, 0], sizes = [16, 128], strides = [1, 1]} : vector<20x128xf32> to vector<16x128xf32>
    %512 = arith.mulf %511, %492 : vector<16x128xf32>
    %513 = vector.shape_cast %512 : vector<16x128xf32> to vector<1x16x128xf32>
    %cst_145 = arith.constant dense<0.000000e+00> : vector<1xf32>
    %514 = vector.multi_reduction <add>, %513, %cst_145 [1, 2] : vector<1x16x128xf32> to vector<1xf32>
    %515 = vector.shape_cast %514 : vector<1xf32> to vector<1x1x1xf32>
    %516 = vector.extract %515[0, 0, 0] : f32 from vector<1x1x1xf32>
    %517 = vector.shape_cast %511 : vector<16x128xf32> to vector<1x16x128xf32>
    %cst_146 = arith.constant dense<0.000000e+00> : vector<1xf32>
    %518 = vector.multi_reduction <add>, %517, %cst_146 [1, 2] : vector<1x16x128xf32> to vector<1xf32>
    %519 = vector.shape_cast %518 : vector<1xf32> to vector<1x1x1xf32>
    %520 = vector.extract %519[0, 0, 0] : f32 from vector<1x1x1xf32>
    %cst_147 = arith.constant 1.000000e-07 : f32
    %521 = arith.addf %520, %cst_147 : f32
    %522 = arith.divf %516, %521 : f32
    %523 = arith.mulf %509, %510 : vector<16x128xf32>
    %524 = vector.shape_cast %523 : vector<16x128xf32> to vector<1x16x128xf32>
    %cst_148 = arith.constant dense<0.000000e+00> : vector<1xf32>
    %525 = vector.multi_reduction <add>, %524, %cst_148 [1, 2] : vector<1x16x128xf32> to vector<1xf32>
    %526 = vector.shape_cast %525 : vector<1xf32> to vector<1x1x1xf32>
    %527 = vector.extract %526[0, 0, 0] : f32 from vector<1x1x1xf32>
    %528 = vector.shape_cast %510 : vector<16x128xf32> to vector<1x16x128xf32>
    %cst_149 = arith.constant dense<0.000000e+00> : vector<1xf32>
    %529 = vector.multi_reduction <add>, %528, %cst_149 [1, 2] : vector<1x16x128xf32> to vector<1xf32>
    %530 = vector.shape_cast %529 : vector<1xf32> to vector<1x1x1xf32>
    %531 = vector.extract %530[0, 0, 0] : f32 from vector<1x1x1xf32>
    %cst_150 = arith.constant 1.000000e-07 : f32
    %532 = arith.addf %531, %cst_150 : f32
    %533 = arith.divf %527, %532 : f32
    %cst_151 = arith.constant 2.000000e+00 : f32
    %534 = arith.mulf %cst_151, %522 : f32
    %535 = arith.mulf %534, %533 : f32
    %536 = arith.addf %522, %533 : f32
    %cst_152 = arith.constant 1.000000e-07 : f32
    %537 = arith.addf %536, %cst_152 : f32
    %538 = arith.divf %535, %537 : f32
    %cst_153 = arith.constant 1.000000e+00 : f32
    %539 = arith.subf %cst_153, %538 : f32
    %540 = arith.addf %420, %539 : f32
    %541 = arith.mulf %449, %61 : vector<22x128xf32>
    %542 = vector.shape_cast %541 : vector<22x128xf32> to vector<1x22x128xf32>
    %cst_154 = arith.constant dense<0.000000e+00> : vector<1xf32>
    %543 = vector.multi_reduction <add>, %542, %cst_154 [1, 2] : vector<1x22x128xf32> to vector<1xf32>
    %544 = vector.shape_cast %543 : vector<1xf32> to vector<1x1x1xf32>
    %545 = vector.extract %544[0, 0, 0] : f32 from vector<1x1x1xf32>
    %546 = arith.subf %545, %448 : f32
    %547 = tpu.iota {dimensions = array<i32: 1>} : vector<8x128xi32>
    %cst_155 = arith.constant 0.000000e+00 : f32
    %548 = vector.broadcast %cst_155 : f32 to vector<8x128xf32>
    %c0_i32_156 = arith.constant 0 : i32
    %549 = vector.broadcast %c0_i32_156 : i32 to vector<8x128xi32>
    %550 = arith.cmpi eq, %547, %549 : vector<8x128xi32>
    %cst_157 = arith.constant 0.000000e+00 : f32
    %551 = vector.broadcast %72 : f32 to vector<8x128xf32>
    %552 = vector.broadcast %cst_157 : f32 to vector<8x128xf32>
    %553 = arith.select %550, %551, %552 : vector<8x128xi1>, vector<8x128xf32>
    %554 = arith.addf %548, %553 : vector<8x128xf32>
    %c1_i32_158 = arith.constant 1 : i32
    %555 = vector.broadcast %c1_i32_158 : i32 to vector<8x128xi32>
    %556 = arith.cmpi eq, %547, %555 : vector<8x128xi32>
    %cst_159 = arith.constant 0.000000e+00 : f32
    %557 = vector.broadcast %191 : f32 to vector<8x128xf32>
    %558 = vector.broadcast %cst_159 : f32 to vector<8x128xf32>
    %559 = arith.select %556, %557, %558 : vector<8x128xi1>, vector<8x128xf32>
    %560 = arith.addf %554, %559 : vector<8x128xf32>
    %c2_i32_160 = arith.constant 2 : i32
    %561 = vector.broadcast %c2_i32_160 : i32 to vector<8x128xi32>
    %562 = arith.cmpi eq, %547, %561 : vector<8x128xi32>
    %cst_161 = arith.constant 0.000000e+00 : f32
    %563 = vector.broadcast %311 : f32 to vector<8x128xf32>
    %564 = vector.broadcast %cst_161 : f32 to vector<8x128xf32>
    %565 = arith.select %562, %563, %564 : vector<8x128xi1>, vector<8x128xf32>
    %566 = arith.addf %560, %565 : vector<8x128xf32>
    %c3_i32_162 = arith.constant 3 : i32
    %567 = vector.broadcast %c3_i32_162 : i32 to vector<8x128xi32>
    %568 = arith.cmpi eq, %547, %567 : vector<8x128xi32>
    %cst_163 = arith.constant 0.000000e+00 : f32
    %569 = vector.broadcast %431 : f32 to vector<8x128xf32>
    %570 = vector.broadcast %cst_163 : f32 to vector<8x128xf32>
    %571 = arith.select %568, %569, %570 : vector<8x128xi1>, vector<8x128xf32>
    %572 = arith.addf %566, %571 : vector<8x128xf32>
    %c4_i32 = arith.constant 4 : i32
    %573 = vector.broadcast %c4_i32 : i32 to vector<8x128xi32>
    %574 = arith.cmpi eq, %547, %573 : vector<8x128xi32>
    %cst_164 = arith.constant 0.000000e+00 : f32
    %575 = vector.broadcast %76 : f32 to vector<8x128xf32>
    %576 = vector.broadcast %cst_164 : f32 to vector<8x128xf32>
    %577 = arith.select %574, %575, %576 : vector<8x128xi1>, vector<8x128xf32>
    %578 = arith.addf %572, %577 : vector<8x128xf32>
    %c5_i32 = arith.constant 5 : i32
    %579 = vector.broadcast %c5_i32 : i32 to vector<8x128xi32>
    %580 = arith.cmpi eq, %547, %579 : vector<8x128xi32>
    %cst_165 = arith.constant 0.000000e+00 : f32
    %581 = vector.broadcast %195 : f32 to vector<8x128xf32>
    %582 = vector.broadcast %cst_165 : f32 to vector<8x128xf32>
    %583 = arith.select %580, %581, %582 : vector<8x128xi1>, vector<8x128xf32>
    %584 = arith.addf %578, %583 : vector<8x128xf32>
    %c6_i32 = arith.constant 6 : i32
    %585 = vector.broadcast %c6_i32 : i32 to vector<8x128xi32>
    %586 = arith.cmpi eq, %547, %585 : vector<8x128xi32>
    %cst_166 = arith.constant 0.000000e+00 : f32
    %587 = vector.broadcast %315 : f32 to vector<8x128xf32>
    %588 = vector.broadcast %cst_166 : f32 to vector<8x128xf32>
    %589 = arith.select %586, %587, %588 : vector<8x128xi1>, vector<8x128xf32>
    %590 = arith.addf %584, %589 : vector<8x128xf32>
    %c7_i32 = arith.constant 7 : i32
    %591 = vector.broadcast %c7_i32 : i32 to vector<8x128xi32>
    %592 = arith.cmpi eq, %547, %591 : vector<8x128xi32>
    %cst_167 = arith.constant 0.000000e+00 : f32
    %593 = vector.broadcast %435 : f32 to vector<8x128xf32>
    %594 = vector.broadcast %cst_167 : f32 to vector<8x128xf32>
    %595 = arith.select %592, %593, %594 : vector<8x128xi1>, vector<8x128xf32>
    %596 = arith.addf %590, %595 : vector<8x128xf32>
    %c8_i32 = arith.constant 8 : i32
    %597 = vector.broadcast %c8_i32 : i32 to vector<8x128xi32>
    %598 = arith.cmpi eq, %547, %597 : vector<8x128xi32>
    %cst_168 = arith.constant 0.000000e+00 : f32
    %599 = vector.broadcast %80 : f32 to vector<8x128xf32>
    %600 = vector.broadcast %cst_168 : f32 to vector<8x128xf32>
    %601 = arith.select %598, %599, %600 : vector<8x128xi1>, vector<8x128xf32>
    %602 = arith.addf %596, %601 : vector<8x128xf32>
    %c9_i32 = arith.constant 9 : i32
    %603 = vector.broadcast %c9_i32 : i32 to vector<8x128xi32>
    %604 = arith.cmpi eq, %547, %603 : vector<8x128xi32>
    %cst_169 = arith.constant 0.000000e+00 : f32
    %605 = vector.broadcast %199 : f32 to vector<8x128xf32>
    %606 = vector.broadcast %cst_169 : f32 to vector<8x128xf32>
    %607 = arith.select %604, %605, %606 : vector<8x128xi1>, vector<8x128xf32>
    %608 = arith.addf %602, %607 : vector<8x128xf32>
    %c10_i32 = arith.constant 10 : i32
    %609 = vector.broadcast %c10_i32 : i32 to vector<8x128xi32>
    %610 = arith.cmpi eq, %547, %609 : vector<8x128xi32>
    %cst_170 = arith.constant 0.000000e+00 : f32
    %611 = vector.broadcast %319 : f32 to vector<8x128xf32>
    %612 = vector.broadcast %cst_170 : f32 to vector<8x128xf32>
    %613 = arith.select %610, %611, %612 : vector<8x128xi1>, vector<8x128xf32>
    %614 = arith.addf %608, %613 : vector<8x128xf32>
    %c11_i32 = arith.constant 11 : i32
    %615 = vector.broadcast %c11_i32 : i32 to vector<8x128xi32>
    %616 = arith.cmpi eq, %547, %615 : vector<8x128xi32>
    %cst_171 = arith.constant 0.000000e+00 : f32
    %617 = vector.broadcast %439 : f32 to vector<8x128xf32>
    %618 = vector.broadcast %cst_171 : f32 to vector<8x128xf32>
    %619 = arith.select %616, %617, %618 : vector<8x128xi1>, vector<8x128xf32>
    %620 = arith.addf %614, %619 : vector<8x128xf32>
    %c12_i32 = arith.constant 12 : i32
    %621 = vector.broadcast %c12_i32 : i32 to vector<8x128xi32>
    %622 = arith.cmpi eq, %547, %621 : vector<8x128xi32>
    %cst_172 = arith.constant 0.000000e+00 : f32
    %623 = vector.broadcast %546 : f32 to vector<8x128xf32>
    %624 = vector.broadcast %cst_172 : f32 to vector<8x128xf32>
    %625 = arith.select %622, %623, %624 : vector<8x128xi1>, vector<8x128xf32>
    %626 = arith.addf %620, %625 : vector<8x128xf32>
    %c13_i32 = arith.constant 13 : i32
    %627 = vector.broadcast %c13_i32 : i32 to vector<8x128xi32>
    %628 = arith.cmpi eq, %547, %627 : vector<8x128xi32>
    %cst_173 = arith.constant 0.000000e+00 : f32
    %629 = vector.broadcast %540 : f32 to vector<8x128xf32>
    %630 = vector.broadcast %cst_173 : f32 to vector<8x128xf32>
    %631 = arith.select %628, %629, %630 : vector<8x128xi1>, vector<8x128xf32>
    %632 = arith.addf %626, %631 : vector<8x128xf32>
    %633 = vector.shape_cast %632 : vector<8x128xf32> to vector<1x8x128xf32>
    %c0_174 = arith.constant 0 : index
    %c0_175 = arith.constant 0 : index
    %c0_176 = arith.constant 0 : index
    %634 = vector.load %arg3[%c0_174, %c0_175, %c0_176] : memref<1x8x128xf32, #tpu.memory_space<vmem>>, vector<1x8x128xf32>
    tpu.vector_store %arg3[%c0_174, %c0_175, %c0_176], %633 {strides = array<i32>} : memref<1x8x128xf32, #tpu.memory_space<vmem>>, vector<1x8x128xf32>,
    return
  }
  func.func @transform_0(%arg0: i32) -> (i32, i32, i32, i32) {
    %c0_i32 = arith.constant 0 : i32
    %c0_i32_0 = arith.constant 0 : i32
    %c0_i32_1 = arith.constant 0 : i32
    %c0_i32_2 = arith.constant 0 : i32
    return %arg0, %c0_i32, %c0_i32_0, %c0_i32_1 : i32, i32, i32, i32
  }
  func.func @transform_1(%arg0: i32) -> (i32, i32, i32) {
    %c0_i32 = arith.constant 0 : i32
    %c0_i32_0 = arith.constant 0 : i32
    %c0_i32_1 = arith.constant 0 : i32
    return %arg0, %c0_i32, %c0_i32_0 : i32, i32, i32
  }
  func.func @transform_2(%arg0: i32) -> (i32, i32, i32) {
    %c0_i32 = arith.constant 0 : i32
    %c0_i32_0 = arith.constant 0 : i32
    %c0_i32_1 = arith.constant 0 : i32
    return %arg0, %c0_i32, %c0_i32_0 : i32, i32, i32
  }
}

</mosaic_0001>

<bundles_post_ra>
// kernel: tpu_custom_call.1
= control target key start
LH: loop header
LB: loop body
LE: loop exit
PB: predicated region body
PF: predicated region fallthrough
CT: control target
= control target key end

     0   :  { %s3720_s0 = inlined_call_operand.vmem [shape: f32[2,4,22,128], index: 0, kind: input, shape index: {}]   ;;  %s3721_s1 = inlined_call_operand.vmem [shape: s32[2,22,128], index: 1, kind: input, shape index: {}]   ;;  %s3722_s2 = inlined_call_operand.hbm [shape: f32[2,8,128], index: 2, kind: output, shape index: {}]  }
   0x1   :  { %3771 = sst [smem:[#allocation34_spill]] %s3720_s0 }
   0x2   :  { %7 = vsyncpa [#allocation3], 0 }
   0x3   :  { %9 = vsyncpa [#allocation3 + $0x1], 0  ;;  %s2330_s9 = smov 0   ;;  %s2332_s10 = smov 0  }
   0x4   :  { %s2334_s11 = smov 0   ;;  %s2336_s12 = smov 0  }
   0x5 LB: > { %s2351_s13 = sadd.s32 4294967295, %s2307_s12   ;;  %s2011_s14 = sadd.s32 4294967294, %s2307_s12   ;;  %s2307_s12 = sphi %s2336_s12, %s3843_s12   ;;  %s2303_s11 = sphi %s2334_s11, %s3842_s11   ;;  %s2299_s10 = sphi %s2332_s10, %s3841_s10   ;;  %s2295_s9 = sphi %s2330_s9, %s3840_s9  }
   0x6   : > { %s2355_s15 = sadd.s32 1, %s2307_s12   ;;  %s74_s16 = sadd.s32 1, %s2303_s11 }
   0x7   : > { %s71_s17 = ssub.s32 %s2307_s12, %s2355_s15  ;;  %p84_p0 = scmp.ne.s32.totalorder %s2303_s11, %s2299_s10 }
   0x8   : > { %p72_p1 = scmp.eq.s32.totalorder %s71_s17, 0  ;;  %p85_p2 = scmp.eq.s32.totalorder %s2351_s13, 1 }
   0x9   : > { %p90_p3 = scmp.ne.s32.totalorder %s2299_s10, %s2295_s9  ;;  %p91_p4 = scmp.eq.s32.totalorder %s2011_s14, 1 }
   0xa   : > { %s2366_s18 = scalar_select %p72_p1, %s2303_s11, %s74_s16  }
   0xb   : > { %p2368_p5 = por %p85_p2, %p84_p0  ;;  %p2372_p6 = por %p91_p4, %p90_p3 }
   0xc   : > { %p2014_p7 = scmp.ge.s32.totalorder %s2307_s12, 1  ;;  %p125_p8 = scmp.lt.s32.totalorder %s2307_s12, 3 }
   0xe   : > { %p126_p9 = pnand %p2014_p7, %p125_p8 }
  0x10   : > { %129 = sbr.rel (%p126_p9) target bundleno = 1891 (0x763), region = 28 }
  0x17   : > { %p152_p10 = scmp.lt.s32.totalorder %s2351_s13, 1  ;;  %v165_v0 = vlaneseq  ;;  %s3775_s0 = sld [smem:[#allocation34_spill]]  ;;  %v3723_v6 = vmov 0.0   ;;  %vm315_vm10 = vcmask 1045504   ;;  %vm376_vm13 = vcmask 1046528  }
  0x18   : > { %s3768_s30 = smov 1   ;;  %s3762_s3 = smov 127   ;;  %vm504_vm14 = vcmask 1044480   ;;  %vm514_vm15 = vcmask 1043456  }
  0x19   : > { %s153_s21 = scalar_select %p152_p10, %s2351_s13, 1  ;;  %v166_v1 = vshrl.u32 %v165_v0, 7  ;;  %v2380_v2 = vand.u32 127, %v165_v0 }
  0x1a   : > { %s3764_s4 = smov 2   ;;  %s3766_s5 = smov 126  }
  0x1b   : > { %3774 = vst [vmem:[#allocation5_spill] sm:$0xff] %v2380_v2  ;;  %s2047_s22 = smul.u32 24, %s153_s21  ;;  %v168_v3 = vadd.s32 16, %v166_v1  ;;  %vm180_vm0 = vcmp.ge.s32.totalorder %v2380_v2, 3  ;;  %vm184_vm1 = vcmp.lt.s32.totalorder %v2380_v2, 19  ;;  %vm171_vm2 = vcmp.ge.s32.totalorder %v166_v1, 3 }
  0x1c   : > { %s2046_s23 = smul.u32 96, %s153_s21  ;;  %vm181_vm3 = vmand %vm171_vm2, %vm180_vm0 }
  0x1d   : > { %s2389_s26 = scalar_lea.vmem %s3721_s1, %s2047_s22  ;;  %vm176_vm4 = vcmp.lt.s32.totalorder %v168_v3, 19  ;;  %vm185_vm5 = vmand %vm181_vm3, %vm184_vm1  ;;  %vm613_vm3 = vcmask 1041408  }
  0x1e   : > { %v2394_v4 = vld [vmem:[%s2389_s26 + $0x10] sm:$0x3f]  ;;  %vm183_vm6 = vmand %vm176_vm4, %vm180_vm0  ;;  %s2401_s29 = scalar_lea.vmem %s3775_s0, %s2046_s23  ;;  %v2404_v5 = vld [vmem:[%s2389_s26] sm:$0xff]  ;;  %v2407_v7 = vsel %vm185_vm5, 1.0, %v3723_v6 }
  0x1f   : > { %vm187_vm7 = vmand %vm183_vm6, %vm184_vm1  ;;  %vm298_vm8 = vcmp.eq.s32.totalorder %v2394_v4, 0  ;;  %v2413_v8 = vld [vmem:[%s2389_s26 + $0x8] sm:$0xff]  ;;  %vm296_vm9 = vcmp.eq.s32.totalorder %v2404_v5, 0  ;;  %v194_v9 = vld [vmem:[%s2401_s29] sm:$0xff]  ;;  %vm697_vm2 = vcmp.eq.s32.totalorder %v2394_v4, 1 }
  0x20   : > { %v2418_v10 = vsel %vm187_vm7, 1.0, %v3723_v6  ;;  %v2421_v11 = vsel %vm298_vm8, 1.0, %v3723_v6  ;;  %vm186_vm11 = vmand %vm180_vm0, %vm184_vm1  ;;  %vm297_vm12 = vcmp.eq.s32.totalorder %v2413_v8, 0  ;;  %v2429_v12 = vsel %vm296_vm9, 1.0, %v3723_v6  ;;  %v195_v13 = vld [vmem:[%s2401_s29 + $0x8] sm:$0xff]  ;;  %v2021_v14 = vld [vmem:[%s2401_s29 + $0x18] sm:$0xff] }
  0x21   : > { %3776 = vst [vmem:[#allocation6_spill] sm:$0xff] %v2421_v11  ;;  %3777 = vst [vmem:[#allocation7_spill] sm:$0xff] %v2429_v12  ;;  %v369_v15 = vsub.f32 %v2418_v10, %v2421_v11  ;;  %v2436_v16 = vsel %vm186_vm11, 1.0, %v3723_v6  ;;  %v2439_v17 = vsel %vm297_vm12, 1.0, %v3723_v6  ;;  %v367_v18 = vsub.f32 %v2407_v7, %v2429_v12  ;;  %v196_v19 = vld [vmem:[%s2401_s29 + $0x10] sm:$0x3f] }
  0x22   : > { %3778 = vst [vmem:[#allocation8_spill] sm:$0xff] %v2439_v17  ;;  %v2022_v20 = vld [vmem:[%s2401_s29 + $0x20] sm:$0xff]  ;;  %v2024_v21 = vld [vmem:[%s2401_s29 + $0x30] sm:$0xff]  ;;  %v368_v22 = vsub.f32 %v2436_v16, %v2439_v17  ;;  %v2023_v23 = vld [vmem:[%s2401_s29 + $0x28] sm:$0x3f]  ;;  %v201_v24 = vmax.f32 %v194_v9, %v2021_v14  ;;  %vm695_vm0 = vcmp.eq.s32.totalorder %v2404_v5, 1 }
  0x23   : > { %v202_v25 = vmax.f32 %v195_v13, %v2022_v20  ;;  %v2025_v26 = vld [vmem:[%s2401_s29 + $0x38] sm:$0xff]  ;;  %v2450_v27 = vrot.slane %v369_v15, 1  ;;  %v391_v28 = vrot.slane %v369_v15, 2  ;;  %v377_v29 = vrot.slane %v367_v18, 1  ;;  %v2026_v34 = vld [vmem:[%s2401_s29 + $0x40] sm:$0x3f] }
  0x24   : > { %v388_v30 = vrot.slane %v367_v18, 2  ;;  %v378_v31 = vrot.slane %v368_v22, 1  ;;  %v389_v32 = vrot.slane %v368_v22, 2  ;;  %v203_v33 = vmax.f32 %v196_v19, %v2023_v23  ;;  %v2027_v38 = vld [vmem:[%s2401_s29 + $0x48] sm:$0xff]  ;;  %v2028_v39 = vld [vmem:[%s2401_s29 + $0x50] sm:$0xff] }
  0x25   : > { %v208_v35 = vmax.f32 %v201_v24, %v2024_v21  ;;  %v387_v36 = vmax.f32 %v369_v15, %v2450_v27  ;;  %v209_v37 = vmax.f32 %v202_v25, %v2025_v26  ;;  %v2029_v43 = vld [vmem:[%s2401_s29 + $0x58] sm:$0x3f]  ;;  %vm696_vm1 = vcmp.eq.s32.totalorder %v2413_v8, 1 }
  0x26   : > { %v2457_v40 = vsel %vm376_vm13, %v377_v29, %v378_v31  ;;  %v390_v41 = vsel %vm315_vm10, %v388_v30, %v389_v32  ;;  %v2462_v42 = vsel %vm376_vm13, %v378_v31, %v2450_v27  ;;  %v210_v47 = vmax.f32 %v203_v33, %v2026_v34 }
  0x27   : > { %v2465_v44 = vmax.f32 %v387_v36, %v391_v28  ;;  %v385_v45 = vmax.f32 %v367_v18, %v2457_v40  ;;  %v386_v46 = vmax.f32 %v368_v22, %v2462_v42  ;;  %v392_v48 = vsel %vm315_vm10, %v389_v32, %v391_v28 }
  0x28   : > { %v215_v49 = vmax.f32 %v208_v35, %v2027_v38  ;;  %v216_v50 = vmax.f32 %v209_v37, %v2028_v39  ;;  %v217_v52 = vmax.f32 %v210_v47, %v2029_v43 }
  0x29   : > { %403 = vrot.lane.b32.xlu1 %v2465_v44, %s3768_s30  ;;  %v2472_v51 = vmax.f32 %v385_v45, %v390_v41  ;;  %v2484_v57 = vmax.f32 %v386_v46, %v392_v48 }
  0x2a   : > { %v2474_v53 = vsub.f32 %v194_v9, %v215_v49  ;;  %v2476_v54 = vsub.f32 %v195_v13, %v216_v50  ;;  %v2478_v55 = vsub.f32 %v2021_v14, %v215_v49  ;;  %v2480_v56 = vsub.f32 %v2022_v20, %v216_v50 }
  0x2b   : > { %399 = vrot.lane.b32.xlu0 %v2472_v51, %s3768_s30  ;;  %v2486_v58 = vsub.f32 %v196_v19, %v217_v52  ;;  %v2488_v59 = vsub.f32 %v2023_v23, %v217_v52  ;;  %v2492_v62 = vsub.f32 %v2024_v21, %v215_v49  ;;  %v2498_v1 = vsub.f32 %v2025_v26, %v216_v50 }
  0x2c   : > { %v221_v60 = vmul.f32 1.442695, %v2474_v53  ;;  %v223_v61 = vmul.f32 1.442695, %v2476_v54  ;;  %v233_v0 = vmul.f32 1.442695, %v2478_v55  ;;  %v2501_v9 = vsub.f32 %v2026_v34, %v217_v52 }
  0x2d   : > { %3779 = vst [vmem:[#allocation9_spill] sm:$0xff] %v2492_v62  ;;  %408 = vrot.lane.b32.xlu1 %v2472_v51, %s3762_s3  ;;  %v225_v63 = vmul.f32 1.442695, %v2486_v58  ;;  %3780 = vst [vmem:[#allocation10_spill] sm:$0xff] %v2498_v1  ;;  %v235_v3 = vmul.f32 1.442695, %v2480_v56  ;;  %v2506_v14 = vsub.f32 %v2027_v38, %v215_v49  ;;  %v2509_v18 = vsub.f32 %v2028_v39, %v216_v50 }
  0x2e   : > { %2182 = vpow2.f32 %v221_v60  ;;  %3781 = vst [vmem:[#allocation11_spill] sm:$0xff] %v2501_v9  ;;  %v237_v13 = vmul.f32 1.442695, %v2488_v59  ;;  %v251_v15 = vmul.f32 1.442695, %v2492_v62  ;;  %v2514_v20 = vsub.f32 %v2029_v43, %v217_v52 }
  0x2f   : > { %401 = vrot.lane.b32.xlu0 %v2484_v57, %s3768_s30  ;;  %2184 = vpow2.f32 %v223_v61  ;;  %3782 = vst [vmem:[#allocation12_spill] sm:$0xff] %v2506_v14  ;;  %3783 = vst [vmem:[#allocation13_spill] sm:$0xff] %v2509_v18  ;;  %v253_v19 = vmul.f32 1.442695, %v2498_v1  ;;  %v255_v21 = vmul.f32 1.442695, %v2501_v9 }
  0x30   : > { %2186 = vpow2.f32 %v225_v63  ;;  %3784 = vst [vmem:[#allocation14_spill] sm:$0xff] %v2514_v20  ;;  %v269_v22 = vmul.f32 1.442695, %v2506_v14  ;;  %v271_v23 = vmul.f32 1.442695, %v2509_v18 }
  0x31   : > { %412 = vrot.lane.b32.xlu1 %v2465_v44, %s3762_s3  ;;  %2188 = vpow2.f32 %v233_v0  ;;  %v273_v24 = vmul.f32 1.442695, %v2514_v20 }
  0x32   : > { %2190 = vpow2.f32 %v235_v3 }
  0x33   : > { %410 = vrot.lane.b32.xlu0 %v2484_v57, %s3762_s3  ;;  %2192 = vpow2.f32 %v237_v13 }
  0x34   : > { %2194 = vpow2.f32 %v251_v15 }
  0x35   : > { %2196 = vpow2.f32 %v253_v19 }
  0x36   : > { %2198 = vpow2.f32 %v255_v21 }
  0x37   : > { %2200 = vpow2.f32 %v269_v22 }
  0x38   : > { %v2522_v25 = vpop.eup %2182  ;;  %2202 = vpow2.f32 %v271_v23 }
  0x39   : > { %3785 = vst [vmem:[#allocation15_spill] sm:$0xff] %v2522_v25  ;;  %v2524_v26 = vpop.eup %2184  ;;  %2204 = vpow2.f32 %v273_v24 }
  0x3a   : > { %3786 = vst [vmem:[#allocation16_spill] sm:$0xff] %v2524_v26  ;;  %v2526_v28 = vpop.eup %2186 }
  0x3b   : > { %3787 = vst [vmem:[#allocation17_spill] sm:$0xff] %v2526_v28  ;;  %v2528_v29 = vpop.eup %2188 }
  0x3c   : > { %3788 = vst [vmem:[#allocation18_spill] sm:$0xff] %v2528_v29  ;;  %v2530_v30 = vpop.eup %2190  ;;  %v239_v31 = vadd.f32 %v2528_v29, %v2522_v25 }
  0x3d   : > { %3789 = vst [vmem:[#allocation19_spill] sm:$0xff] %v2530_v30  ;;  %v2534_v32 = vpop.eup %2192  ;;  %v240_v33 = vadd.f32 %v2530_v30, %v2524_v26 }
  0x3e   : > { %3790 = vst [vmem:[#allocation20_spill] sm:$0xff] %v2534_v32  ;;  %v2538_v34 = vpop.eup %2194  ;;  %v241_v35 = vadd.f32 %v2534_v32, %v2526_v28 }
  0x3f   : > { %3791 = vst [vmem:[#allocation21_spill] sm:$0xff] %v2538_v34  ;;  %v2542_v36 = vpop.eup %2196  ;;  %v257_v37 = vadd.f32 %v2538_v34, %v239_v31 }
  0x40   : > { %3792 = vst [vmem:[#allocation22_spill] sm:$0xff] %v2542_v36  ;;  %v2545_v38 = vpop.eup %2198  ;;  %v258_v39 = vadd.f32 %v2542_v36, %v240_v33 }
  0x41   : > { %3793 = vst [vmem:[#allocation23_spill] sm:$0xff] %v2545_v38  ;;  %v2548_v41 = vpop.eup %2200  ;;  %v259_v43 = vadd.f32 %v2545_v38, %v241_v35 }
  0x42   : > { %3794 = vst [vmem:[#allocation24_spill] sm:$0xff] %v2548_v41  ;;  %v2551_v45 = vpop.eup %2202  ;;  %v275_v46 = vadd.f32 %v2548_v41, %v257_v37 }
  0x43   : > { %3795 = vst [vmem:[#allocation25_spill] sm:$0xff] %v2551_v45  ;;  %v2554_v47 = vpop.eup %2204  ;;  %v276_v48 = vadd.f32 %v2551_v45, %v258_v39 }
  0x44   : > { %3796 = vst [vmem:[#allocation26_spill] sm:$0xff] %v2554_v47  ;;  %v277_v49 = vadd.f32 %v2554_v47, %v259_v43  ;;  %2206 = vrcp.f32 %v275_v46 }
  0x45   : > { %2208 = vrcp.f32 %v276_v48 }
  0x46   : > { %2210 = vrcp.f32 %v277_v49 }
  0x4e   : > { %v2558_v50 = vpop.eup %2206 }
  0x4f   : > { %3797 = vst [vmem:[#allocation27_spill] sm:$0xff] %v2558_v50  ;;  %v2560_v52 = vpop.eup %2208  ;;  %v305_v60 = vmul.f32 %v2558_v50, %v2522_v25 }
  0x50   : > { %v2564_v61 = vpop.eup %2210  ;;  %v306_v63 = vmul.f32 %v2560_v52, %v2524_v26 }
  0x51   : > { %3798 = vst [vmem:[#allocation28_spill] sm:$0xff] %v2564_v61  ;;  %v307_v0 = vmul.f32 %v2564_v61, %v2526_v28  ;;  %v311_v3 = vmul.f32 %v2429_v12, %v305_v60  ;;  %v308_v13 = vmul.f32 %v2407_v7, %v305_v60 }
  0x52   : > { %v309_v15 = vmul.f32 %v2436_v16, %v306_v63  ;;  %v312_v19 = vmul.f32 %v2439_v17, %v306_v63 }
  0x53   : > { %v310_v21 = vmul.f32 %v2418_v10, %v307_v0  ;;  %v313_v22 = vmul.f32 %v2421_v11, %v307_v0  ;;  %v370_v31 = vsub.f32 %v2407_v7, %v308_v13 }
  0x54   : > { %v314_v23 = vadd.f32 %v312_v19, %v311_v3  ;;  %v371_v24 = vsub.f32 %v2436_v16, %v309_v15  ;;  %v339_v33 = vadd.f32 %v309_v15, %v308_v13 }
  0x55   : > { %v316_v35 = vsel %vm315_vm10, %v313_v22, 0.0  ;;  %v372_v37 = vsub.f32 %v2418_v10, %v310_v21  ;;  %v340_v43 = vsel %vm315_vm10, %v310_v21, 0.0  ;;  %v437_v63 = vrot.slane %v370_v31, 1 }
  0x56   : > { %v317_v39 = vadd.f32 %v316_v35, %v314_v23  ;;  %v438_v49 = vrot.slane %v371_v24, 1  ;;  %v2583_v60 = vadd.f32 %v340_v43, %v339_v33  ;;  %v449_v0 = vrot.slane %v371_v24, 2 }
  0x57   : > { %v2581_v46 = vrot.slane %v372_v37, 1  ;;  %v451_v48 = vrot.slane %v372_v37, 2  ;;  %v448_v23 = vrot.slane %v370_v31, 2  ;;  %v352_v43 = vmul.f32 %v2439_v17, %v2476_v54 }
  0x58   : > { %318 = vadd.xlane.f32.xlu0 %v317_v39  ;;  %v2595_v22 = vsel %vm376_vm13, %v437_v63, %v438_v49  ;;  %v351_v39 = vmul.f32 %v2429_v12, %v2474_v53 }
  0x59   : > { %v447_v3 = vmax.f32 %v372_v37, %v2581_v46  ;;  %v2588_v13 = vsel %vm376_vm13, %v438_v49, %v2581_v46  ;;  %v452_v19 = vsel %vm315_vm10, %v449_v0, %v451_v48  ;;  %v445_v35 = vmax.f32 %v370_v31, %v2595_v22 }
  0x5a   : > { %v446_v15 = vmax.f32 %v371_v24, %v2588_v13  ;;  %v450_v37 = vsel %vm315_vm10, %v448_v23, %v449_v0  ;;  %v354_v31 = vadd.f32 %v352_v43, %v351_v39  ;;  %v423_v23 = vrot.slane %v2407_v7, 1 }
  0x5b   : > { %v2592_v21 = vmax.f32 %v447_v3, %v451_v48  ;;  %v2605_v24 = vmax.f32 %v445_v35, %v450_v37  ;;  %v353_v48 = vmul.f32 %v2421_v11, %v2486_v58  ;;  %v424_v35 = vrot.slane %v2436_v16, 1 }
  0x5c   : > { %v2599_v33 = vmax.f32 %v446_v15, %v452_v19  ;;  %v2629_v39 = vrot.slane %v2418_v10, 1 }
  0x5d   : > { %472 = vrot.lane.b32.xlu1 %v2592_v21, %s3762_s3  ;;  %v355_v49 = vsel %vm315_vm10, %v353_v48, 0.0 }
  0x5e   : > { %v2616_v63 = vadd.f32 %v355_v49, %v354_v31 }
  0x61   : > { %461 = vrot.lane.b32.xlu1 %v2599_v33, %s3768_s30 }
  0x65   : > { %468 = vrot.lane.b32.xlu1 %v2605_v24, %s3762_s3 }
  0x6e   : > { %463 = vrot.lane.b32.xlu0 %v2592_v21, %s3768_s30 }
  0x72   : > { %459 = vrot.lane.b32.xlu0 %v2605_v24, %s3768_s30 }
  0x76   : > { %470 = vrot.lane.b32.xlu0 %v2599_v33, %s3762_s3 }
  0x9b   : > { %v404_v53 = vpop.permute.xlu1 %403 }
  0x9c   : > { %v407_v15 = vmax.f32 %v404_v53, %v2465_v44 }
  0x9d   : > { %v400_v54 = vpop.permute.xlu0 %399 }
  0x9e   : > { %v405_v58 = vmax.f32 %v400_v54, %v2472_v51  ;;  %v2635_v54 = vsel %vm376_vm13, %v423_v23, %v424_v35 }
  0x9f   : > { %v409_v0 = vpop.permute.xlu1 %408 }
  0xa0   : > { %v414_v19 = vmax.f32 %v405_v58, %v409_v0  ;;  %v2640_v58 = vsel %vm376_vm13, %v424_v35, %v2629_v39 }
  0xa1   : > { %v402_v3 = vpop.permute.xlu0 %401 }
  0xa2   : > { %v406_v48 = vmax.f32 %v402_v3, %v2484_v57  ;;  %v417_v49 = vsub.f32 %v414_v19, %v2457_v40 }
  0xa3   : > { %v413_v37 = vpop.permute.xlu1 %412 }
  0xa4   : > { %v416_v43 = vmax.f32 %v407_v15, %v413_v37  ;;  %v431_v15 = vmul.f32 %v2635_v54, %v417_v49 }
  0xa5   : > { %v411_v31 = vpop.permute.xlu0 %410 }
  0xa6   : > { %v419_v51 = vsub.f32 %v416_v43, %v2450_v27  ;;  %v415_v44 = vmax.f32 %v406_v48, %v411_v31  ;;  %v486_v37 = vrot.slane %v431_v15, 1  ;;  %v495_v31 = vrot.slane %v431_v15, 2 }
  0xa8   : > { %v433_v53 = vmul.f32 %v2629_v39, %v419_v51  ;;  %v418_v0 = vsub.f32 %v415_v44, %v2462_v42 }
  0xaa   : > { %v489_v57 = vrot.slane %v433_v53, 1  ;;  %v432_v3 = vmul.f32 %v2640_v58, %v418_v0  ;;  %v498_v40 = vrot.slane %v433_v53, 2  ;;  %v508_v23 = vrot.slane %v433_v53, 3 }
  0xab   : > { %v518_v6 = vrot.slane %v433_v53, 4  ;;  %v505_v0 = vrot.slane %v431_v15, 3  ;;  %v515_v53 = vrot.slane %v431_v15, 4 }
  0xac   : > { %v487_v19 = vrot.slane %v432_v3, 1  ;;  %v496_v27 = vrot.slane %v432_v3, 2  ;;  %v506_v43 = vrot.slane %v432_v3, 3  ;;  %v516_v49 = vrot.slane %v432_v3, 4 }
  0xae   : > { %v490_v48 = vsel %vm376_vm13, %v487_v19, %v489_v57  ;;  %v488_v35 = vsel %vm376_vm13, %v486_v37, %v487_v19  ;;  %v2648_v42 = vsel %vm315_vm10, %v496_v27, %v498_v40  ;;  %v2652_v26 = vsel %vm315_vm10, %v495_v31, %v496_v27 }
  0xaf   : > { %v494_v51 = vmax.f32 %v432_v3, %v490_v48  ;;  %v493_v44 = vmax.f32 %v431_v15, %v488_v35  ;;  %v509_v57 = vsel %vm504_vm14, %v506_v43, %v508_v23  ;;  %v507_v19 = vsel %vm504_vm14, %v505_v0, %v506_v43 }
  0xb0   : > { %v519_v40 = vsel %vm514_vm15, %v516_v49, %v518_v6  ;;  %v517_v35 = vsel %vm514_vm15, %v515_v53, %v516_v49  ;;  %v327_v6 = vadd.f32 %v2439_v17, %v2429_v12 }
  0xb1   : > { %v503_v28 = vmax.f32 %v494_v51, %v2648_v42  ;;  %v502_v48 = vmax.f32 %v493_v44, %v2652_v26 }
  0xb3   : > { %v513_v25 = vmax.f32 %v503_v28, %v509_v57  ;;  %v512_v37 = vmax.f32 %v502_v48, %v507_v19  ;;  %v3799_v28 = vmov 0.0  }
  0xb4   : > { %v2686_v15 = vsel %vm695_vm0, 1.0, %v3799_v28  ;;  %v2689_v27 = vsel %vm696_vm1, 1.0, %v3799_v28  ;;  %v2698_v44 = vsel %vm697_vm2, 1.0, %v3799_v28 }
  0xb5   : > { %v2658_v3 = vmax.f32 %v513_v25, %v519_v40  ;;  %v2661_v51 = vmax.f32 %v512_v37, %v517_v35  ;;  %v328_v25 = vsel %vm315_vm10, %v2421_v11, 0.0  ;;  %3800 = vst [vmem:[#allocation29_spill] sm:$0xff] %v2686_v15  ;;  %3801 = vst [vmem:[#allocation30_spill] sm:$0xff] %v2689_v27  ;;  %v768_v8 = vsub.f32 %v2407_v7, %v2686_v15 }
  0xb6   : > { %v329_v5 = vadd.f32 %v328_v25, %v327_v6  ;;  %v769_v31 = vsub.f32 %v2436_v16, %v2689_v27  ;;  %3802 = vst [vmem:[#allocation31_spill] sm:$0xff] %v2698_v44  ;;  %v770_v19 = vsub.f32 %v2418_v10, %v2698_v44 }
  0xb7   : > { %526 = vrot.lane.b32.xlu1 %v2658_v3, %s3764_s4  ;;  %524 = vrot.lane.b32.xlu0 %v2661_v51, %s3764_s4  ;;  %v777_v48 = vrot.slane %v768_v8, 1 }
  0xb8   : > { %v791_v18 = vrot.slane %v770_v19, 2 }
  0xbb   : > { %532 = vrot.lane.b32.xlu1 %v2658_v3, %s3768_s30  ;;  %530 = vrot.lane.b32.xlu0 %v2661_v51, %s3768_s30 }
  0xbf   : > { %538 = vrot.lane.b32.xlu1 %v2658_v3, %s3762_s3  ;;  %536 = vrot.lane.b32.xlu0 %v2661_v51, %s3762_s3 }
  0xc3   : > { %544 = vrot.lane.b32.xlu1 %v2658_v3, %s3766_s5  ;;  %542 = vrot.lane.b32.xlu0 %v2661_v51, %s3766_s5 }
  0xcf   : > { %v473_v23 = vpop.permute.xlu1 %472 }
  0xd3   : > { %v462_v4 = vpop.permute.xlu1 %461 }
  0xd4   : > { %v466_v12 = vmax.f32 %v462_v4, %v2599_v33 }
  0xe2   : > { %342 = vadd.xlane.f32.xlu0 %v2583_v60  ;;  %v778_v60 = vrot.slane %v769_v31, 1 }
  0xe4   : > { %v2705_v25 = vsel %vm376_vm13, %v777_v48, %v778_v60 }
  0xe5   : > { %v319_v43 = vpop.xlane.xlu0 %318 }
  0xe6   : > { %v320_v49 = vrot.slane %v319_v43, 4  ;;  %357 = vadd.xlane.f32.xlu0 %v2616_v63  ;;  %v469_v63 = vpop.permute.xlu1 %468 }
  0xe7   : > { %330 = vadd.xlane.f32.xlu1 %v329_v5  ;;  %v2707_v5 = vrot.slane %v770_v19, 1 }
  0xe8   : > { %v321_v0 = vadd.f32 %v320_v49, %v319_v43  ;;  %v788_v43 = vrot.slane %v768_v8, 2  ;;  %v789_v49 = vrot.slane %v769_v31, 2 }
  0xe9   : > { %v464_v57 = vpop.permute.xlu0 %463 }
  0xea   : > { %v467_v53 = vmax.f32 %v464_v57, %v2592_v21  ;;  %v322_v40 = vrot.slane %v321_v0, 2  ;;  %v790_v48 = vsel %vm315_vm10, %v788_v43, %v789_v49 }
  0xec   : > { %v476_v37 = vmax.f32 %v467_v53, %v473_v23  ;;  %v323_v35 = vadd.f32 %v322_v40, %v321_v0  ;;  %v785_v0 = vmax.f32 %v768_v8, %v2705_v25 }
  0xed   : > { %v460_v6 = vpop.permute.xlu0 %459 }
  0xee   : > { %v479_v11 = vsub.f32 %v476_v37, %v2581_v46  ;;  %v465_v17 = vmax.f32 %v460_v6, %v2605_v24  ;;  %v324_v20 = vrot.slane %v323_v35, 1  ;;  %v2719_v46 = vsel %vm376_vm13, %v778_v60, %v2707_v5 }
  0xef   : > { %v787_v24 = vmax.f32 %v770_v19, %v2707_v5  ;;  %v786_v8 = vmax.f32 %v769_v31, %v2719_v46  ;;  %v792_v60 = vsel %vm315_vm10, %v789_v49, %v791_v18 }
  0xf0   : > { %v474_v21 = vmax.f32 %v465_v17, %v469_v63  ;;  %v325_v57 = vadd.f32 %v324_v20, %v323_v35  ;;  %v2715_v53 = vmul.f32 %v479_v11, %v2629_v39  ;;  %v2723_v20 = vmax.f32 %v785_v0, %v790_v48 }
  0xf1   : > { %v471_v23 = vpop.permute.xlu0 %470  ;;  %v2742_v35 = vmax.f32 %v787_v24, %v791_v18  ;;  %v2744_v6 = vmax.f32 %v786_v8, %v792_v60 }
  0xf2   : > { %v475_v40 = vmax.f32 %v466_v12, %v471_v23  ;;  %2048 = vpush %v325_v57  ;;  %v477_v17 = vsub.f32 %v474_v21, %v2595_v22  ;;  %v554_v11 = vrot.slane %v2715_v53, 1  ;;  %v563_v12 = vrot.slane %v2715_v53, 2 }
  0xf3   : > { %v572_v37 = vrot.slane %v2715_v53, 3  ;;  %v581_v21 = vrot.slane %v2715_v53, 4 }
  0xf4   : > { %v478_v33 = vsub.f32 %v475_v40, %v2588_v13  ;;  %v2735_v13 = vmul.f32 %v477_v17, %v2635_v54 }
  0xf6   : > { %v2730_v4 = vmul.f32 %v478_v33, %v2640_v58  ;;  %v551_v0 = vrot.slane %v2735_v13, 1  ;;  %v560_v17 = vrot.slane %v2735_v13, 2 }
  0xf8   : > { %v552_v22 = vrot.slane %v2730_v4, 1  ;;  %v561_v19 = vrot.slane %v2730_v4, 2  ;;  %v570_v31 = vrot.slane %v2730_v4, 3  ;;  %799 = vrot.lane.b32.xlu1 %v2723_v20, %s3768_s30  ;;  %v579_v63 = vrot.slane %v2730_v4, 4 }
  0xfa   : > { %v555_v43 = vsel %vm376_vm13, %v552_v22, %v554_v11  ;;  %v564_v49 = vsel %vm315_vm10, %v561_v19, %v563_v12  ;;  %v573_v23 = vsel %vm504_vm14, %v570_v31, %v572_v37  ;;  %v582_v48 = vsel %vm514_vm15, %v579_v63, %v581_v21 }
  0xfb   : > { %v559_v57 = vmax.f32 %v2730_v4, %v555_v43  ;;  %v553_v33 = vsel %vm376_vm13, %v551_v0, %v552_v22  ;;  %v562_v11 = vsel %vm315_vm10, %v560_v17, %v561_v19  ;;  %v569_v12 = vrot.slane %v2735_v13, 3 }
  0xfc   : > { %803 = vrot.lane.b32.xlu1 %v2742_v35, %s3768_s30  ;;  %801 = vrot.lane.b32.xlu0 %v2744_v6, %s3768_s30  ;;  %v558_v8 = vmax.f32 %v2735_v13, %v553_v33  ;;  %v578_v22 = vrot.slane %v2735_v13, 4  ;;  %v2782_v0 = vmul.f32 %v2558_v50, %v2528_v29 }
  0xfd   : > { %v568_v18 = vmax.f32 %v559_v57, %v564_v49  ;;  %v571_v37 = vsel %vm504_vm14, %v569_v12, %v570_v31  ;;  %v643_v57 = vadd.f32 %v564_v49, %v562_v11 }
  0xfe   : > { %v567_v60 = vmax.f32 %v558_v8, %v562_v11  ;;  %v580_v21 = vsel %vm514_vm15, %v578_v22, %v579_v63  ;;  %v2806_v22 = vmul.f32 %v2564_v61, %v2534_v32 }
  0xff   : > { %v577_v40 = vmax.f32 %v568_v18, %v573_v23  ;;  %v2786_v18 = vmul.f32 %v2560_v52, %v2530_v30 }
 0x100   : > { %808 = vrot.lane.b32.xlu1 %v2723_v20, %s3762_s3  ;;  %v576_v43 = vmax.f32 %v567_v60, %v571_v37 }
 0x101   : > { %v2762_v24 = vmax.f32 %v577_v40, %v582_v48  ;;  %v2790_v40 = vmul.f32 %v2407_v7, %v2782_v0  ;;  %v2794_v49 = vmul.f32 %v2436_v16, %v2786_v18 }
 0x102   : > { %v2776_v19 = vmax.f32 %v576_v43, %v580_v21 }
 0x103   : > { %v771_v60 = vsub.f32 %v2407_v7, %v2790_v40  ;;  %v772_v37 = vsub.f32 %v2436_v16, %v2794_v49 }
 0x104   : > { %589 = vrot.lane.b32.xlu1 %v2762_v24, %s3764_s4 }
 0x108   : > { %595 = vrot.lane.b32.xlu1 %v2762_v24, %s3768_s30 }
 0x10c   : > { %601 = vrot.lane.b32.xlu1 %v2762_v24, %s3762_s3 }
 0x110   : > { %605 = vrot.lane.b32.xlu1 %v2776_v19, %s3766_s5 }
 0x11b   : > { %644 = vadd.xlane.f32.xlu0 %v643_v57 }
 0x123   : > { %s2926_s6 = spop %2048 }
 0x129   : > { %v527_v23 = vpop.permute.xlu1 %526  ;;  %v525_v31 = vpop.permute.xlu0 %524 }
 0x12a   : > { %v529_v33 = vmax.f32 %v2658_v3, %v527_v23  ;;  %v528_v17 = vmax.f32 %v2661_v51, %v525_v31  ;;  %v826_v31 = vrot.slane %v771_v60, 1 }
 0x12d   : > { %v533_v63 = vpop.permute.xlu1 %532  ;;  %v531_v48 = vpop.permute.xlu0 %530 }
 0x12e   : > { %v535_v11 = vmax.f32 %v529_v33, %v533_v63  ;;  %v534_v43 = vmax.f32 %v528_v17, %v531_v48  ;;  %v827_v63 = vrot.slane %v772_v37, 1  ;;  %v2812_v33 = vmul.f32 %v2418_v10, %v2806_v22 }
 0x130   : > { %v2818_v17 = vsel %vm376_vm13, %v826_v31, %v827_v63 }
 0x131   : > { %v539_v8 = vpop.permute.xlu1 %538  ;;  %v537_v12 = vpop.permute.xlu0 %536  ;;  %587 = vrot.lane.b32.xlu0 %v2776_v19, %s3764_s4 }
 0x132   : > { %v541_v3 = vmax.f32 %v535_v11, %v539_v8  ;;  %v540_v21 = vmax.f32 %v534_v43, %v537_v12  ;;  %v773_v8 = vsub.f32 %v2418_v10, %v2812_v33  ;;  %v837_v43 = vrot.slane %v771_v60, 2 }
 0x135   : > { %v545_v51 = vpop.permute.xlu1 %544  ;;  %v543_v23 = vpop.permute.xlu0 %542  ;;  %593 = vrot.lane.b32.xlu0 %v2776_v19, %s3768_s30 }
 0x136   : > { %v547_v57 = vmax.f32 %v541_v3, %v545_v51  ;;  %v546_v30 = vmax.f32 %v540_v21, %v543_v23  ;;  %v838_v3 = vrot.slane %v772_v37, 2  ;;  %v2828_v23 = vrot.slane %v773_v8, 1 }
 0x138   : > { %v615_v29 = vrot.slane %v547_v57, 6  ;;  %v614_v32 = vrot.slane %v546_v30, 6  ;;  %v834_v57 = vmax.f32 %v771_v60, %v2818_v17  ;;  %v839_v31 = vsel %vm315_vm10, %v837_v43, %v838_v3 }
 0x139   : > { %599 = vrot.lane.b32.xlu0 %v2776_v19, %s3762_s3  ;;  %v2840_v60 = vsel %vm376_vm13, %v827_v63, %v2828_v23 }
 0x13a   : > { %v622_v48 = vmul.f32 %v615_v29, %v2715_v53  ;;  %v616_v11 = vsel %vm613_vm3, %v614_v32, %v615_v29  ;;  %v620_v12 = vmul.f32 %v614_v32, %v2735_v13  ;;  %v835_v43 = vmax.f32 %v772_v37, %v2840_v60 }
 0x13b   : > { %v621_v30 = vmul.f32 %v616_v11, %v2730_v4  ;;  %v2835_v4 = vmax.f32 %v834_v57, %v839_v31  ;;  %v840_v11 = vrot.slane %v773_v8, 2 }
 0x13c   : > { %v629_v21 = vrot.slane %v622_v48, 2  ;;  %v626_v51 = vrot.slane %v620_v12, 2  ;;  %v836_v48 = vmax.f32 %v773_v8, %v2828_v23 }
 0x13d   : > { %607 = vrot.lane.b32.xlu0 %v2762_v24, %s3766_s5  ;;  %v627_v53 = vrot.slane %v621_v30, 2 }
 0x13e   : > { %v2844_v12 = vmax.f32 %v836_v48, %v840_v11 }
 0x13f   : > { %v628_v29 = vsel %vm315_vm10, %v626_v51, %v627_v53  ;;  %v630_v32 = vsel %vm315_vm10, %v627_v53, %v629_v21  ;;  %v841_v21 = vsel %vm315_vm10, %v838_v3, %v840_v11  ;;  %v670_v3 = vadd.f32 %v2648_v42, %v2652_v26 }
 0x140   : > { %v633_v13 = vadd.f32 %v630_v32, %v628_v29  ;;  %v2850_v30 = vmax.f32 %v835_v43, %v841_v21 }
 0x141   : > { %810 = vrot.lane.b32.xlu0 %v2744_v6, %s3762_s3 }
 0x142   : > { %634 = vadd.xlane.f32.xlu1 %v633_v13 }
 0x145   : > { %848 = vrot.lane.b32.xlu0 %v2835_v4, %s3768_s30 }
 0x149   : > { %852 = vrot.lane.b32.xlu0 %v2844_v12, %s3768_s30 }
 0x14d   : > { %859 = vrot.lane.b32.xlu0 %v2850_v30, %s3762_s3 }
 0x153   : > { %812 = vrot.lane.b32.xlu1 %v2742_v35, %s3762_s3 }
 0x16f   : > { %v343_v63 = vpop.xlane.xlu0 %342 }
 0x170   : > { %v344_v8 = vrot.slane %v343_v63, 4 }
 0x172   : > { %v345_v51 = vadd.f32 %v344_v8, %v343_v63 }
 0x173   : > { %v358_v57 = vpop.xlane.xlu0 %357 }
 0x174   : > { %v331_v53 = vpop.xlane.xlu1 %330  ;;  %v359_v37 = vrot.slane %v358_v57, 4  ;;  %v346_v29 = vrot.slane %v345_v51, 2 }
 0x175   : > { %v332_v31 = vrot.slane %v331_v53, 4 }
 0x176   : > { %v360_v13 = vadd.f32 %v359_v37, %v358_v57  ;;  %v347_v48 = vadd.f32 %v346_v29, %v345_v51 }
 0x177   : > { %v333_v32 = vadd.f32 %v332_v31, %v331_v53  ;;  %671 = vadd.xlane.f32.xlu1 %v670_v3  ;;  %v802_v51 = vpop.permute.xlu0 %801 }
 0x178   : > { %v348_v43 = vrot.slane %v347_v48, 1  ;;  %v361_v21 = vrot.slane %v360_v13, 2  ;;  %v800_v53 = vpop.permute.xlu1 %799 }
 0x179   : > { %v334_v11 = vrot.slane %v333_v32, 2 }
 0x17a   : > { %v362_v2 = vadd.f32 %v361_v21, %v360_v13  ;;  %v349_v47 = vadd.f32 %v348_v43, %v347_v48  ;;  %v806_v13 = vmax.f32 %v802_v51, %v2744_v6 }
 0x17b   : > { %v335_v14 = vadd.f32 %v334_v11, %v333_v32 }
 0x17c   : > { %v363_v63 = vrot.slane %v362_v2, 1  ;;  %v804_v37 = vpop.permute.xlu1 %803 }
 0x17d   : > { %v336_v41 = vrot.slane %v335_v14, 1  ;;  %v807_v38 = vmax.f32 %v804_v37, %v2742_v35 }
 0x17e   : > { %v364_v45 = vadd.f32 %v363_v63, %v362_v2 }
 0x17f   : > { %v337_v8 = vadd.f32 %v336_v41, %v335_v14 }
 0x180   : > { %v809_v2 = vpop.permute.xlu1 %808 }
 0x181   : > { %2050 = vpush %v337_v8 }
 0x182   : > { %2052 = vpush %v349_v47 }
 0x183   : > { %2054 = vpush %v364_v45  ;;  %v805_v45 = vmax.f32 %v800_v53, %v2723_v20 }
 0x184   : > { %v2873_v3 = vpop.permute.xlu1 %589 }
 0x185   : > { %v814_v47 = vmax.f32 %v805_v45, %v809_v2 }
 0x187   : > { %v817_v32 = vsub.f32 %v814_v47, %v2705_v25 }
 0x188   : > { %850 = vrot.lane.b32.xlu1 %v2850_v30, %s3768_s30  ;;  %v2878_v21 = vpop.permute.xlu1 %595 }
 0x189   : > { %v820_v43 = vmul.f32 %v817_v32, %v2635_v54 }
 0x18b   : > { %v875_v20 = vrot.slane %v820_v43, 1  ;;  %v884_v45 = vrot.slane %v820_v43, 2  ;;  %v893_v51 = vrot.slane %v820_v43, 3 }
 0x18c   : > { %857 = vrot.lane.b32.xlu1 %v2835_v4, %s3762_s3  ;;  %v2882_v9 = vpop.permute.xlu1 %601 }
 0x190   : > { %861 = vrot.lane.b32.xlu1 %v2844_v12, %s3762_s3  ;;  %v2890_v62 = vpop.permute.xlu1 %605 }
 0x1a8   : > { %v645_v57 = vpop.xlane.xlu0 %644 }
 0x1ac   : > { %v2864_v31 = vpop.permute.xlu0 %587 }
 0x1b0   : > { %v2866_v14 = vpop.permute.xlu0 %593 }
 0x1b2   : > { %s2928_s7 = spop %2050 }
 0x1b3   : > { %s2931_s8 = spop %2052 }
 0x1b4   : > { %v2868_v41 = vpop.permute.xlu0 %599  ;;  %s2933_s14 = spop %2054 }
 0x1b8   : > { %v2871_v29 = vpop.permute.xlu0 %607 }
 0x1bc   : > { %v811_v48 = vpop.permute.xlu0 %810 }
 0x1bd   : > { %v815_v11 = vmax.f32 %v806_v13, %v811_v48  ;;  %v646_v13 = vrot.slane %v645_v57, 4 }
 0x1bf   : > { %v818_v63 = vsub.f32 %v815_v11, %v2719_v46  ;;  %v902_v11 = vrot.slane %v820_v43, 4  ;;  %v647_v34 = vadd.f32 %v646_v13, %v645_v57 }
 0x1c1   : > { %v821_v8 = vmul.f32 %v818_v63, %v2640_v58 }
 0x1c3   : > { %v876_v53 = vrot.slane %v821_v8, 1  ;;  %v885_v2 = vrot.slane %v821_v8, 2  ;;  %v894_v1 = vrot.slane %v821_v8, 3  ;;  %v903_v32 = vrot.slane %v821_v8, 4 }
 0x1c5   : > { %v877_v25 = vsel %vm376_vm13, %v875_v20, %v876_v53  ;;  %v2886_v47 = vsel %vm315_vm10, %v884_v45, %v885_v2  ;;  %v895_v48 = vsel %vm504_vm14, %v893_v51, %v894_v1  ;;  %v904_v50 = vsel %vm514_vm15, %v902_v11, %v903_v32 }
 0x1c6   : > { %v882_v6 = vmax.f32 %v820_v43, %v877_v25  ;;  %3803 = vst [vmem:[#allocation32_spill] sm:$0xff] %v2886_v47  ;;  %v648_v25 = vrot.slane %v647_v34, 2 }
 0x1c8   : > { %v891_v46 = vmax.f32 %v882_v6, %v2886_v47 }
 0x1ca   : > { %v900_v63 = vmax.f32 %v891_v46, %v895_v48  ;;  %v649_v48 = vadd.f32 %v648_v25, %v647_v34 }
 0x1cc   : > { %v2893_v61 = vmax.f32 %v900_v63, %v904_v50  ;;  %v650_v63 = vrot.slane %v649_v48, 1 }
 0x1ce   : > { %911 = vrot.lane.b32.xlu0 %v2893_v61, %s3764_s4  ;;  %v651_v34 = vadd.f32 %v650_v63, %v649_v48 }
 0x1cf   : > { %v635_v20 = vpop.xlane.xlu1 %634 }
 0x1d0   : > { %v636_v45 = vrot.slane %v635_v20, 4 }
 0x1d2   : > { %v637_v6 = vadd.f32 %v636_v45, %v635_v20  ;;  %917 = vrot.lane.b32.xlu0 %v2893_v61, %s3768_s30 }
 0x1d3   : > { %v813_v43 = vpop.permute.xlu1 %812 }
 0x1d4   : > { %v816_v51 = vmax.f32 %v807_v38, %v813_v43  ;;  %v638_v46 = vrot.slane %v637_v6, 2 }
 0x1d6   : > { %v819_v57 = vsub.f32 %v816_v51, %v2707_v5  ;;  %923 = vrot.lane.b32.xlu0 %v2893_v61, %s3762_s3  ;;  %v639_v50 = vadd.f32 %v638_v46, %v637_v6 }
 0x1d8   : > { %v822_v13 = vmul.f32 %v819_v57, %v2629_v39  ;;  %v640_v11 = vrot.slane %v639_v50, 1 }
 0x1da   : > { %v878_v47 = vrot.slane %v822_v13, 1  ;;  %v887_v35 = vrot.slane %v822_v13, 2  ;;  %929 = vrot.lane.b32.xlu0 %v2893_v61, %s3766_s5  ;;  %v641_v37 = vadd.f32 %v640_v11, %v639_v50  ;;  %v896_v20 = vrot.slane %v822_v13, 3 }
 0x1db   : > { %v905_v45 = vrot.slane %v822_v13, 4 }
 0x1dc   : > { %v879_v38 = vsel %vm376_vm13, %v876_v53, %v878_v47  ;;  %2056 = vpush %v641_v37  ;;  %v2908_v25 = vsel %vm315_vm10, %v885_v2, %v887_v35  ;;  %v897_v43 = vsel %vm504_vm14, %v894_v1, %v896_v20 }
 0x1dd   : > { %v883_v5 = vmax.f32 %v821_v8, %v879_v38  ;;  %2058 = vpush %v651_v34  ;;  %v906_v46 = vsel %vm514_vm15, %v903_v32, %v905_v45  ;;  %v849_v8 = vpop.permute.xlu0 %848 }
 0x1de   : > { %v854_v48 = vmax.f32 %v849_v8, %v2835_v4 }
 0x1df   : > { %v892_v6 = vmax.f32 %v883_v5, %v2908_v25 }
 0x1e1   : > { %v901_v51 = vmax.f32 %v892_v6, %v897_v43  ;;  %v853_v53 = vpop.permute.xlu0 %852 }
 0x1e2   : > { %v856_v35 = vmax.f32 %v853_v53, %v2844_v12 }
 0x1e3   : > { %v2913_v57 = vmax.f32 %v901_v51, %v906_v46 }
 0x1e5   : > { %913 = vrot.lane.b32.xlu1 %v2913_v57, %s3764_s4  ;;  %v860_v47 = vpop.permute.xlu0 %859 }
 0x1e9   : > { %919 = vrot.lane.b32.xlu1 %v2913_v57, %s3768_s30 }
 0x1ed   : > { %925 = vrot.lane.b32.xlu1 %v2913_v57, %s3762_s3 }
 0x1f1   : > { %931 = vrot.lane.b32.xlu1 %v2913_v57, %s3766_s5 }
 0x204   : > { %v2923_v1 = vpop.xlane.xlu1 %671 }
 0x208   : > { %v851_v2 = vpop.permute.xlu1 %850 }
 0x209   : > { %v855_v32 = vmax.f32 %v851_v2, %v2850_v30 }
 0x20b   : > { %v864_v50 = vmax.f32 %v855_v32, %v860_v47 }
 0x20c   : > { %v858_v13 = vpop.permute.xlu1 %857 }
 0x20d   : > { %v867_v11 = vsub.f32 %v864_v50, %v2840_v60  ;;  %v863_v63 = vmax.f32 %v854_v48, %v858_v13  ;;  %s2936_s16 = spop %2056 }
 0x20e   : > { %s2059_s17 = spop %2058 }
 0x20f   : > { %v2940_v30 = vmul.f32 %v867_v11, %v2640_v58  ;;  %v866_v37 = vsub.f32 %v863_v63, %v2818_v17  ;;  %s653_s21 = sadd.f32 1e-07, %s2059_s17 }
 0x210   : > { %v862_v4 = vpop.permute.xlu1 %861 }
 0x211   : > { %v2944_v38 = vmul.f32 %v866_v37, %v2635_v54  ;;  %v865_v20 = vmax.f32 %v856_v35, %v862_v4  ;;  %v654_v34 = vstv %s653_s21  ;;  %v939_v60 = vrot.slane %v2940_v30, 1 }
 0x212   : > { %2212 = vrcp.f32 %v654_v34  ;;  %v948_v43 = vrot.slane %v2940_v30, 2  ;;  %v957_v8 = vrot.slane %v2940_v30, 3  ;;  %v966_v48 = vrot.slane %v2940_v30, 4 }
 0x213   : > { %v868_v5 = vsub.f32 %v865_v20, %v2828_v23  ;;  %v938_v12 = vrot.slane %v2944_v38, 1  ;;  %v947_v45 = vrot.slane %v2944_v38, 2  ;;  %v956_v51 = vrot.slane %v2944_v38, 3 }
 0x214   : > { %v965_v47 = vrot.slane %v2944_v38, 4 }
 0x215   : > { %v2951_v6 = vmul.f32 %v868_v5, %v2629_v39  ;;  %v940_v17 = vsel %vm376_vm13, %v938_v12, %v939_v60  ;;  %v949_v2 = vsel %vm315_vm10, %v947_v45, %v948_v43  ;;  %v958_v13 = vsel %vm504_vm14, %v956_v51, %v957_v8 }
 0x216   : > { %v945_v46 = vmax.f32 %v2944_v38, %v940_v17  ;;  %v967_v20 = vsel %vm514_vm15, %v965_v47, %v966_v48 }
 0x217   : > { %v941_v53 = vrot.slane %v2951_v6, 1  ;;  %v950_v23 = vrot.slane %v2951_v6, 2  ;;  %v959_v50 = vrot.slane %v2951_v6, 3  ;;  %v968_v4 = vrot.slane %v2951_v6, 4 }
 0x218   : > { %v954_v32 = vmax.f32 %v945_v46, %v949_v2  ;;  %v592_v46 = vmax.f32 %v2762_v24, %v2873_v3 }
 0x219   : > { %v942_v11 = vsel %vm376_vm13, %v939_v60, %v941_v53  ;;  %v951_v63 = vsel %vm315_vm10, %v948_v43, %v950_v23  ;;  %v960_v17 = vsel %vm504_vm14, %v957_v8, %v959_v50  ;;  %v969_v43 = vsel %vm514_vm15, %v966_v48, %v968_v4 }
 0x21a   : > { %v963_v35 = vmax.f32 %v954_v32, %v958_v13  ;;  %v946_v37 = vmax.f32 %v2940_v30, %v942_v11  ;;  %v2970_v34 = vadd.f32 %v951_v63, %v949_v2  ;;  %v591_v8 = vmax.f32 %v2776_v19, %v2864_v31 }
 0x21b   : > { %v598_v53 = vmax.f32 %v592_v46, %v2878_v21  ;;  %v725_v19 = vadd.f32 %v2689_v27, %v2686_v15  ;;  %v726_v31 = vsel %vm315_vm10, %v2698_v44, 0.0 }
 0x21c   : > { %v2972_v5 = vmax.f32 %v963_v35, %v967_v20  ;;  %v955_v12 = vmax.f32 %v946_v37, %v951_v63  ;;  %v2213_v45 = vpop.eup %2212  ;;  %v597_v23 = vmax.f32 %v591_v8, %v2866_v14  ;;  %v710_v20 = vmul.f32 %v2686_v15, %v2782_v0 }
 0x21d   : > { %2060 = vpush %v2213_v45  ;;  %v604_v2 = vmax.f32 %v598_v53, %v2882_v9  ;;  %v727_v14 = vadd.f32 %v726_v31, %v725_v19  ;;  %v749_v0 = vmul.f32 %v2686_v15, %v2478_v55 }
 0x21e   : > { %974 = vrot.lane.b32.xlu0 %v2972_v5, %s3764_s4  ;;  %v964_v60 = vmax.f32 %v955_v12, %v960_v17  ;;  %v603_v47 = vmax.f32 %v597_v23, %v2868_v41  ;;  %v711_v12 = vmul.f32 %v2689_v27, %v2786_v18  ;;  %v737_v23 = vadd.f32 %v2794_v49, %v2790_v40 }
 0x21f   : > { %v610_v32 = vmax.f32 %v604_v2, %v2871_v29  ;;  %v750_v18 = vmul.f32 %v2689_v27, %v2480_v56 }
 0x220   : > { %v2978_v51 = vmax.f32 %v964_v60, %v969_v43  ;;  %v609_v48 = vmax.f32 %v603_v47, %v2890_v62  ;;  %v712_v60 = vmul.f32 %v2698_v44, %v2806_v22  ;;  %v738_v22 = vsel %vm315_vm10, %v2812_v33, 0.0  ;;  %v3033_v33 = vld [vmem:[%s2389_s26] sm:$0xff] }
 0x221   : > { %v659_v50 = vmul.f32 %v610_v32, %v2648_v42  ;;  %v751_v47 = vmul.f32 %v2698_v44, %v2488_v59  ;;  %v739_v49 = vadd.f32 %v738_v22, %v737_v23  ;;  %v752_v55 = vadd.f32 %v750_v18, %v749_v0  ;;  %v3037_v59 = vld [vmem:[%s2389_s26 + $0x8] sm:$0xff] }
 0x222   : > { %976 = vrot.lane.b32.xlu1 %v2978_v51, %s3764_s4  ;;  %980 = vrot.lane.b32.xlu0 %v2972_v5, %s3768_s30  ;;  %v658_v13 = vmul.f32 %v609_v48, %v2652_v26  ;;  %vm1081_vm4 = vcmp.eq.s32.totalorder %v3033_v33, 2  ;;  %vm1082_vm5 = vcmp.eq.s32.totalorder %v3037_v59, 2  ;;  %vm1467_vm7 = vcmp.eq.s32.totalorder %v3033_v33, 3 }
 0x223   : > { %v753_v48 = vsel %vm315_vm10, %v751_v47, 0.0  ;;  %v3046_v31 = vsel %vm1082_vm5, 1.0, %v3799_v28  ;;  %vm1468_vm8 = vcmp.eq.s32.totalorder %v3037_v59, 3 }
 0x224   : > { %v660_v24 = vadd.f32 %v659_v50, %v658_v13  ;;  %v754_v13 = vadd.f32 %v753_v48, %v752_v55 }
 0x226   : > { %982 = vrot.lane.b32.xlu1 %v2978_v51, %s3768_s30 }
 0x22a   : > { %988 = vrot.lane.b32.xlu1 %v2978_v51, %s3762_s3 }
 0x240   : > { %v912_v41 = vpop.permute.xlu0 %911 }
 0x241   : > { %661 = vadd.xlane.f32.xlu0 %v660_v24  ;;  %v915_v21 = vmax.f32 %v2893_v61, %v912_v41  ;;  %v714_v61 = vsel %vm315_vm10, %v712_v60, 0.0  ;;  %v1155_v41 = vsub.f32 %v2436_v16, %v3046_v31 }
 0x244   : > { %v918_v29 = vpop.permute.xlu0 %917 }
 0x245   : > { %v921_v35 = vmax.f32 %v915_v21, %v918_v29 }
 0x248   : > { %v924_v42 = vpop.permute.xlu0 %923 }
 0x249   : > { %v927_v45 = vmax.f32 %v921_v35, %v924_v42 }
 0x24c   : > { %v930_v4 = vpop.permute.xlu0 %929 }
 0x24d   : > { %v933_v43 = vmax.f32 %v927_v45, %v930_v4 }
 0x24e   : > { %728 = vadd.xlane.f32.xlu1 %v727_v14  ;;  %s3162_s22 = spop %2060 }
 0x24f   : > { %v1000_v8 = vrot.slane %v933_v43, 6 }
 0x251   : > { %v1006_v56 = vmul.f32 %v1000_v8, %v2944_v38  ;;  %v3043_v38 = vsel %vm1081_vm4, 1.0, %v3799_v28 }
 0x257   : > { %v914_v9 = vpop.permute.xlu1 %913  ;;  %986 = vrot.lane.b32.xlu0 %v2972_v5, %s3762_s3 }
 0x258   : > { %v916_v3 = vmax.f32 %v2913_v57, %v914_v9  ;;  %v713_v57 = vadd.f32 %v711_v12, %v710_v20  ;;  %v1154_v9 = vsub.f32 %v2407_v7, %v3043_v38 }
 0x25a   : > { %v715_v53 = vadd.f32 %v714_v61, %v713_v57  ;;  %v1163_v29 = vrot.slane %v1154_v9, 1  ;;  %v3805_v61 = vld [vmem:[#allocation23_spill] sm:$0xff] }
 0x25b   : > { %v920_v62 = vpop.permute.xlu1 %919 }
 0x25c   : > { %v922_v11 = vmax.f32 %v916_v3, %v920_v62  ;;  %v3053_v62 = vld [vmem:[%s2389_s26 + $0x10] sm:$0x3f]  ;;  %s3186_s26 = smul.f32 %s3162_s22, %s2936_s16 }
 0x25d   : > { %vm1083_vm6 = vcmp.eq.s32.totalorder %v3053_v62, 2  ;;  %vm1469_vm9 = vcmp.eq.s32.totalorder %v3053_v62, 3 }
 0x25e   : > { %v3057_v42 = vsel %vm1083_vm6, 1.0, %v3799_v28  ;;  %s685_s17 = smul.f32 2.0, %s3186_s26 }
 0x25f   : > { %992 = vrot.lane.b32.xlu1 %v2972_v5, %s3766_s5  ;;  %v926_v26 = vpop.permute.xlu1 %925  ;;  %3804 = vst [vmem:[#allocation33_spill] sm:$0xff] %v3057_v42  ;;  %v1156_v3 = vsub.f32 %v2418_v10, %v3057_v42 }
 0x260   : > { %v928_v37 = vmax.f32 %v922_v11, %v926_v26  ;;  %v1164_v26 = vrot.slane %v1155_v41, 1  ;;  %v1174_v11 = vrot.slane %v1154_v9, 2 }
 0x262   : > { %v3062_v21 = vsel %vm376_vm13, %v1163_v29, %v1164_v26 }
 0x263   : > { %v932_v63 = vpop.permute.xlu1 %931  ;;  %v1171_v35 = vmax.f32 %v1154_v9, %v3062_v21 }
 0x264   : > { %v934_v17 = vmax.f32 %v928_v37, %v932_v63  ;;  %v1175_v63 = vrot.slane %v1155_v41, 2  ;;  %v3065_v37 = vrot.slane %v1156_v3, 1 }
 0x266   : > { %v1001_v46 = vrot.slane %v934_v17, 6  ;;  %v1176_v4 = vsel %vm315_vm10, %v1174_v11, %v1175_v63  ;;  %v1173_v45 = vmax.f32 %v1156_v3, %v3065_v37  ;;  %v1177_v17 = vrot.slane %v1156_v3, 2 }
 0x267   : > { %v3068_v12 = vmax.f32 %v1171_v35, %v1176_v4  ;;  %v3097_v23 = vsel %vm376_vm13, %v1164_v26, %v3065_v37 }
 0x268   : > { %v1002_v2 = vsel %vm613_vm3, %v1000_v8, %v1001_v46  ;;  %v1008_v40 = vmul.f32 %v1001_v46, %v2951_v6  ;;  %v3076_v57 = vmax.f32 %v1173_v45, %v1177_v17  ;;  %v3806_v8 = vld [vmem:[#allocation28_spill] sm:$0xff]  ;;  %v1172_v47 = vmax.f32 %v1155_v41, %v3097_v23 }
 0x269   : > { %v1007_v32 = vmul.f32 %v1002_v2, %v2940_v30  ;;  %v1012_v30 = vrot.slane %v1006_v56, 2  ;;  %v3808_v2 = vld [vmem:[#allocation27_spill] sm:$0xff] }
 0x26a   : > { %v1015_v50 = vrot.slane %v1008_v40, 2 }
 0x26b   : > { %v1013_v24 = vrot.slane %v1007_v32, 2  ;;  %v3809_v32 = vld [vmem:[#allocation32_spill] sm:$0xff] }
 0x26c   : > { %v1056_v40 = vadd.f32 %v2908_v25, %v3809_v32 }
 0x26d   : > { %v1014_v6 = vsel %vm315_vm10, %v1012_v30, %v1013_v24  ;;  %v1016_v19 = vsel %vm315_vm10, %v1013_v24, %v1015_v50 }
 0x26e   : > { %v1019_v14 = vadd.f32 %v1016_v19, %v1014_v6 }
 0x276   : > { %716 = vadd.xlane.f32.xlu0 %v715_v53  ;;  %v3093_v53 = vmul.f32 %v3806_v8, %v3805_v61 }
 0x278   : > { %v3105_v18 = vmul.f32 %v2418_v10, %v3093_v53 }
 0x27a   : > { %740 = vadd.xlane.f32.xlu0 %v739_v49  ;;  %v1178_v49 = vsel %vm315_vm10, %v1175_v63, %v1177_v17  ;;  %v1159_v48 = vsub.f32 %v2418_v10, %v3105_v18 }
 0x27b   : > { %v3123_v50 = vmax.f32 %v1172_v47, %v1178_v49 }
 0x27c   : > { %v3126_v30 = vrot.slane %v1159_v48, 1  ;;  %v1226_v41 = vrot.slane %v1159_v48, 2 }
 0x27e   : > { %755 = vadd.xlane.f32.xlu0 %v754_v13  ;;  %v673_v13 = vrot.slane %v2923_v1, 4 }
 0x280   : > { %v674_v19 = vadd.f32 %v673_v13, %v2923_v1 }
 0x282   : > { %v675_v11 = vrot.slane %v674_v19, 2 }
 0x283   : > { %1020 = vadd.xlane.f32.xlu1 %v1019_v14 }
 0x284   : > { %v676_v17 = vadd.f32 %v675_v11, %v674_v19 }
 0x286   : > { %v677_v49 = vrot.slane %v676_v17, 1 }
 0x288   : > { %v678_v19 = vadd.f32 %v677_v49, %v676_v17 }
 0x290   : > { %v975_v20 = vpop.permute.xlu0 %974 }
 0x291   : > { %v978_v60 = vmax.f32 %v2972_v5, %v975_v20  ;;  %v3089_v5 = vmul.f32 %v2560_v52, %v2542_v36 }
 0x293   : > { %v3101_v0 = vmul.f32 %v2436_v16, %v3089_v5 }
 0x294   : > { %994 = vrot.lane.b32.xlu0 %v2978_v51, %s3766_s5  ;;  %1185 = vrot.lane.b32.xlu1 %v3068_v12, %s3768_s30  ;;  %v981_v43 = vpop.permute.xlu0 %980 }
 0x295   : > { %v3078_v46 = vmax.f32 %v978_v60, %v981_v43  ;;  %v1158_v55 = vsub.f32 %v2436_v16, %v3101_v0 }
 0x297   : > { %v1213_v24 = vrot.slane %v1158_v55, 1  ;;  %v1224_v9 = vrot.slane %v1158_v55, 2 }
 0x298   : > { %1189 = vrot.lane.b32.xlu1 %v3076_v57, %s3768_s30 }
 0x299   : > { %v3135_v14 = vsel %vm376_vm13, %v1213_v24, %v3126_v30  ;;  %v1227_v63 = vsel %vm315_vm10, %v1224_v9, %v1226_v41 }
 0x29a   : > { %v1221_v26 = vmax.f32 %v1158_v55, %v3135_v14 }
 0x29c   : > { %1194 = vrot.lane.b32.xlu1 %v3068_v12, %s3762_s3  ;;  %v3144_v45 = vmax.f32 %v1221_v26, %v1227_v63 }
 0x2a0   : > { %1198 = vrot.lane.b32.xlu1 %v3076_v57, %s3762_s3 }
 0x2b3   : > { %1030 = vadd.xlane.f32.xlu0 %v2970_v34  ;;  %v3807_v34 = vld [vmem:[#allocation21_spill] sm:$0xff] }
 0x2b4   : > { %v3109_v22 = vmul.f32 %v3808_v2, %v3807_v34 }
 0x2b6   : > { %v3121_v56 = vmul.f32 %v2407_v7, %v3109_v22 }
 0x2b8   : > { %v1157_v6 = vsub.f32 %v2407_v7, %v3121_v56 }
 0x2ba   : > { %v1212_v29 = vrot.slane %v1157_v6, 1  ;;  %v1223_v1 = vrot.slane %v1157_v6, 2 }
 0x2bc   : > { %v3142_v4 = vsel %vm376_vm13, %v1212_v29, %v1213_v24  ;;  %v1225_v47 = vsel %vm315_vm10, %v1223_v1, %v1224_v9  ;;  %v1222_v24 = vmax.f32 %v1159_v48, %v3126_v30 }
 0x2bd   : > { %v1220_v43 = vmax.f32 %v1157_v6, %v3142_v4  ;;  %v977_v6 = vpop.permute.xlu1 %976 }
 0x2be   : > { %v3155_v26 = vmax.f32 %v1222_v24, %v1226_v41  ;;  %v979_v48 = vmax.f32 %v2978_v51, %v977_v6 }
 0x2bf   : > { %v3150_v13 = vmax.f32 %v1220_v43, %v1225_v47 }
 0x2c1   : > { %v983_v9 = vpop.permute.xlu1 %982 }
 0x2c2   : > { %v985_v41 = vmax.f32 %v979_v48, %v983_v9 }
 0x2c4   : > { %1057 = vadd.xlane.f32.xlu1 %v1056_v40 }
 0x2c5   : > { %v989_v11 = vpop.permute.xlu1 %988 }
 0x2c6   : > { %v991_v43 = vmax.f32 %v985_v41, %v989_v11 }
 0x2c9   : > { %1187 = vrot.lane.b32.xlu0 %v3123_v50, %s3768_s30 }
 0x2cd   : > { %1196 = vrot.lane.b32.xlu0 %v3123_v50, %s3762_s3 }
 0x2ce   : > { %v662_v3 = vpop.xlane.xlu0 %661 }
 0x2cf   : > { %v663_v35 = vrot.slane %v662_v3, 4 }
 0x2d1   : > { %v664_v20 = vadd.f32 %v663_v35, %v662_v3 }
 0x2d2   : > { %v987_v3 = vpop.permute.xlu0 %986 }
 0x2d3   : > { %v665_v60 = vrot.slane %v664_v20, 2 }
 0x2d5   : > { %v666_v40 = vadd.f32 %v665_v60, %v664_v20  ;;  %1236 = vrot.lane.b32.xlu1 %v3144_v45, %s3768_s30  ;;  %v990_v60 = vmax.f32 %v3078_v46, %v987_v3 }
 0x2d7   : > { %v667_v55 = vrot.slane %v666_v40, 1 }
 0x2d9   : > { %v668_v29 = vadd.f32 %v667_v55, %v666_v40  ;;  %1243 = vrot.lane.b32.xlu1 %v3150_v13, %s3762_s3 }
 0x2db   : > { %2062 = vpush %v668_v29  ;;  %v729_v35 = vpop.xlane.xlu1 %728 }
 0x2dc   : > { %2064 = vpush %v678_v19 }
 0x2dd   : > { %1247 = vrot.lane.b32.xlu1 %v3155_v26, %s3762_s3 }
 0x2df   : > { %v993_v20 = vpop.permute.xlu1 %992 }
 0x2e0   : > { %v996_v47 = vmax.f32 %v990_v60, %v993_v20 }
 0x2e2   : > { %v1044_v24 = vmul.f32 %v996_v47, %v3809_v32 }
 0x303   : > { %v717_v63 = vpop.xlane.xlu0 %716 }
 0x307   : > { %v3159_v1 = vpop.xlane.xlu0 %740 }
 0x30b   : > { %v756_v17 = vpop.xlane.xlu0 %755 }
 0x30c   : > { %s3165_s23 = spop %2062 }
 0x30d   : > { %s2065_s24 = spop %2064 }
 0x30e   : > { %s680_s25 = sadd.f32 1e-07, %s2065_s24 }
 0x30f   : > { %v995_v40 = vpop.permute.xlu0 %994 }
 0x310   : > { %v681_v49 = vstv %s680_s25  ;;  %v997_v55 = vmax.f32 %v991_v43, %v995_v40  ;;  %v1021_v6 = vpop.xlane.xlu1 %1020  ;;  %v730_v43 = vrot.slane %v729_v35, 4 }
 0x311   : > { %2214 = vrcp.f32 %v681_v49 }
 0x312   : > { %v1045_v51 = vmul.f32 %v997_v55, %v2908_v25 }
 0x314   : > { %v1046_v29 = vadd.f32 %v1045_v51, %v1044_v24  ;;  %v1186_v46 = vpop.permute.xlu1 %1185  ;;  %v731_v24 = vadd.f32 %v730_v43, %v729_v35 }
 0x315   : > { %v1191_v25 = vmax.f32 %v1186_v46, %v3068_v12  ;;  %v718_v12 = vrot.slane %v717_v63, 4  ;;  %v742_v46 = vrot.slane %v3159_v1, 4 }
 0x316   : > { %1047 = vadd.xlane.f32.xlu0 %v1046_v29 }
 0x317   : > { %v719_v35 = vadd.f32 %v718_v12, %v717_v63  ;;  %v743_v43 = vadd.f32 %v742_v46, %v3159_v1 }
 0x318   : > { %v1190_v9 = vpop.permute.xlu1 %1189 }
 0x319   : > { %v1193_v32 = vmax.f32 %v1190_v9, %v3076_v57  ;;  %v757_v9 = vrot.slane %v756_v17, 4  ;;  %v720_v1 = vrot.slane %v719_v35, 2  ;;  %v744_v36 = vrot.slane %v743_v43, 2 }
 0x31b   : > { %v2215_v19 = vpop.eup %2214 }
 0x31c   : > { %2066 = vpush %v2215_v19  ;;  %v1195_v3 = vpop.permute.xlu1 %1194 }
 0x31d   : > { %v1200_v41 = vmax.f32 %v1191_v25, %v1195_v3 }
 0x31f   : > { %v1203_v49 = vsub.f32 %v1200_v41, %v3062_v21 }
 0x320   : > { %v1199_v11 = vpop.permute.xlu1 %1198 }
 0x321   : > { %v1202_v20 = vmax.f32 %v1193_v32, %v1199_v11  ;;  %v1206_v29 = vmul.f32 %v1203_v49, %v2635_v54  ;;  %v1022_v32 = vrot.slane %v1021_v6, 4 }
 0x323   : > { %v1205_v40 = vsub.f32 %v1202_v20, %v3065_v37  ;;  %v1261_v25 = vrot.slane %v1206_v29, 1  ;;  %v1270_v11 = vrot.slane %v1206_v29, 2  ;;  %v1279_v49 = vrot.slane %v1206_v29, 3 }
 0x325   : > { %v1208_v57 = vmul.f32 %v1205_v40, %v2629_v39 }
 0x327   : > { %v1264_v37 = vrot.slane %v1208_v57, 1  ;;  %v1273_v3 = vrot.slane %v1208_v57, 2 }
 0x32c   : > { %1234 = vrot.lane.b32.xlu0 %v3150_v13, %s3768_s30 }
 0x330   : > { %1238 = vrot.lane.b32.xlu0 %v3155_v26, %s3768_s30 }
 0x334   : > { %1245 = vrot.lane.b32.xlu0 %v3144_v45, %s3762_s3 }
 0x340   : > { %v1031_v48 = vpop.xlane.xlu0 %1030 }
 0x341   : > { %v1032_v40 = vrot.slane %v1031_v48, 4 }
 0x344   : > { %v1188_v60 = vpop.permute.xlu0 %1187 }
 0x345   : > { %v1192_v47 = vmax.f32 %v1188_v60, %v3123_v50  ;;  %v732_v50 = vrot.slane %v731_v24, 2 }
 0x348   : > { %v1197_v55 = vpop.permute.xlu0 %1196 }
 0x349   : > { %v1201_v51 = vmax.f32 %v1192_v47, %v1197_v55  ;;  %v758_v47 = vadd.f32 %v757_v9, %v756_v17  ;;  %v1291_v55 = vrot.slane %v1208_v57, 4  ;;  %v1023_v17 = vadd.f32 %v1022_v32, %v1021_v6 }
 0x34b   : > { %v1204_v19 = vsub.f32 %v1201_v51, %v3097_v23  ;;  %v1282_v23 = vrot.slane %v1208_v57, 3  ;;  %v1033_v57 = vadd.f32 %v1032_v40, %v1031_v48  ;;  %v1024_v6 = vrot.slane %v1023_v17, 2 }
 0x34d   : > { %v1207_v21 = vmul.f32 %v1204_v19, %v2640_v58  ;;  %s2067_s27 = spop %2066  ;;  %v1288_v19 = vrot.slane %v1206_v29, 4 }
 0x34e   : > { %s3190_s28 = smul.f32 %s2067_s27, %s3165_s23 }
 0x34f   : > { %v1262_v20 = vrot.slane %v1207_v21, 1  ;;  %v1271_v41 = vrot.slane %v1207_v21, 2  ;;  %v1280_v60 = vrot.slane %v1207_v21, 3  ;;  %v1289_v63 = vrot.slane %v1207_v21, 4 }
 0x350   : > { %s687_s29 = sadd.f32 %s3190_s28, %s3186_s26  ;;  %s3231_s21 = smul.f32 %s685_s17, %s3190_s28 }
 0x351   : > { %v1265_v51 = vsel %vm376_vm13, %v1262_v20, %v1264_v37  ;;  %v3197_v12 = vsel %vm315_vm10, %v1271_v41, %v1273_v3  ;;  %v1263_v27 = vsel %vm376_vm13, %v1261_v25, %v1262_v20  ;;  %v3201_v15 = vsel %vm315_vm10, %v1270_v11, %v1271_v41 }
 0x352   : > { %v1269_v44 = vmax.f32 %v1207_v21, %v1265_v51  ;;  %s688_s16 = sadd.f32 1e-07, %s687_s29  ;;  %v1283_v46 = vsel %vm504_vm14, %v1280_v60, %v1282_v23  ;;  %v1268_v9 = vmax.f32 %v1206_v29, %v1263_v27  ;;  %v1281_v3 = vsel %vm504_vm14, %v1279_v49, %v1280_v60 }
 0x353   : > { %v1292_v21 = vsel %vm514_vm15, %v1289_v63, %v1291_v55  ;;  %v759_v20 = vrot.slane %v758_v47, 2  ;;  %v1290_v41 = vsel %vm514_vm15, %v1288_v19, %v1289_v63  ;;  %v721_v23 = vadd.f32 %v720_v1, %v719_v35 }
 0x354   : > { %v689_v61 = vstv %s688_s16  ;;  %v1278_v37 = vmax.f32 %v1269_v44, %v3197_v12  ;;  %v1277_v25 = vmax.f32 %v1268_v9, %v3201_v15  ;;  %v1034_v27 = vrot.slane %v1033_v57, 2  ;;  %v1058_v9 = vpop.xlane.xlu1 %1057 }
 0x355   : > { %2216 = vrcp.f32 %v689_v61  ;;  %v733_v29 = vadd.f32 %v732_v50, %v731_v24  ;;  %v745_v60 = vadd.f32 %v744_v36, %v743_v43  ;;  %v760_v61 = vadd.f32 %v759_v20, %v758_v47 }
 0x356   : > { %v1287_v11 = vmax.f32 %v1278_v37, %v1283_v46  ;;  %v1286_v32 = vmax.f32 %v1277_v25, %v1281_v3  ;;  %v722_v40 = vrot.slane %v721_v23, 1  ;;  %v1025_v49 = vadd.f32 %v1024_v6, %v1023_v17 }
 0x357   : > { %v734_v55 = vrot.slane %v733_v29, 1  ;;  %v1035_v51 = vadd.f32 %v1034_v27, %v1033_v57  ;;  %v746_v63 = vrot.slane %v745_v60, 1  ;;  %v761_v35 = vrot.slane %v760_v61, 1 }
 0x358   : > { %v3209_v48 = vmax.f32 %v1287_v11, %v1292_v21  ;;  %v3211_v44 = vmax.f32 %v1286_v32, %v1290_v41  ;;  %v723_v36 = vadd.f32 %v722_v40, %v721_v23  ;;  %v1026_v50 = vrot.slane %v1025_v49, 1  ;;  %v1237_v21 = vpop.permute.xlu1 %1236 }
 0x359   : > { %v735_v43 = vadd.f32 %v734_v55, %v733_v29  ;;  %v1036_v47 = vrot.slane %v1035_v51, 1  ;;  %v747_v19 = vadd.f32 %v746_v63, %v745_v60  ;;  %v762_v1 = vadd.f32 %v761_v35, %v760_v61 }
 0x35a   : > { %1299 = vrot.lane.b32.xlu1 %v3209_v48, %s3764_s4  ;;  %1297 = vrot.lane.b32.xlu0 %v3211_v44, %s3764_s4  ;;  %v1027_v17 = vadd.f32 %v1026_v50, %v1025_v49  ;;  %v1059_v37 = vrot.slane %v1058_v9, 4 }
 0x35b   : > { %v1037_v46 = vadd.f32 %v1036_v47, %v1035_v51 }
 0x35c   : > { %v1060_v3 = vadd.f32 %v1059_v37, %v1058_v9  ;;  %v1244_v6 = vpop.permute.xlu1 %1243 }
 0x35e   : > { %1305 = vrot.lane.b32.xlu1 %v3209_v48, %s3768_s30  ;;  %1303 = vrot.lane.b32.xlu0 %v3211_v44, %s3768_s30  ;;  %v1061_v25 = vrot.slane %v1060_v3, 2 }
 0x35f   : > { %v2217_v24 = vpop.eup %2216 }
 0x360   : > { %2068 = vpush %v2217_v24  ;;  %v1062_v27 = vadd.f32 %v1061_v25, %v1060_v3  ;;  %v1248_v49 = vpop.permute.xlu1 %1247  ;;  %v1241_v24 = vmax.f32 %v1237_v21, %v3144_v45 }
 0x361   : > { %2070 = vpush %v723_v36 }
 0x362   : > { %2072 = vpush %v735_v43  ;;  %1311 = vrot.lane.b32.xlu1 %v3209_v48, %s3762_s3  ;;  %1309 = vrot.lane.b32.xlu0 %v3211_v44, %s3762_s3  ;;  %v1063_v55 = vrot.slane %v1062_v27, 1 }
 0x363   : > { %2074 = vpush %v747_v19 }
 0x364   : > { %2076 = vpush %v762_v1  ;;  %v1064_v47 = vadd.f32 %v1063_v55, %v1062_v27 }
 0x365   : > { %2078 = vpush %v1027_v17 }
 0x366   : > { %2080 = vpush %v1037_v46  ;;  %1317 = vrot.lane.b32.xlu1 %v3209_v48, %s3766_s5  ;;  %1315 = vrot.lane.b32.xlu0 %v3211_v44, %s3766_s5 }
 0x391   : > { %s3233_s22 = spop %2068 }
 0x392   : > { %s3237_s24 = spop %2070 }
 0x393   : > { %s3239_s25 = spop %2072 }
 0x394   : > { %s3241_s27 = spop %2074 }
 0x395   : > { %s3243_s29 = spop %2076 }
 0x396   : > { %s3245_s16 = spop %2078 }
 0x397   : > { %s2081_s3 = spop %2080 }
 0x398   : > { %s1039_s26 = sadd.f32 1e-07, %s2081_s3  ;;  %s3810_s3 = smov 127  }
 0x39a   : > { %v1040_v57 = vstv %s1039_s26 }
 0x39b   : > { %2218 = vrcp.f32 %v1040_v57 }
 0x3a3   : > { %v1048_v20 = vpop.xlane.xlu0 %1047 }
 0x3a4   : > { %v1049_v11 = vrot.slane %v1048_v20, 4 }
 0x3a5   : > { %v2219_v41 = vpop.eup %2218 }
 0x3a6   : > { %2082 = vpush %v2219_v41  ;;  %v1050_v32 = vadd.f32 %v1049_v11, %v1048_v20 }
 0x3a7   : > { %v1235_v23 = vpop.permute.xlu0 %1234 }
 0x3a8   : > { %v1051_v29 = vrot.slane %v1050_v32, 2  ;;  %v1240_v60 = vmax.f32 %v1235_v23, %v3150_v13 }
 0x3aa   : > { %v1052_v61 = vadd.f32 %v1051_v29, %v1050_v32  ;;  %v1249_v51 = vmax.f32 %v1240_v60, %v1244_v6 }
 0x3ab   : > { %v1239_v40 = vpop.permute.xlu0 %1238 }
 0x3ac   : > { %v1242_v63 = vmax.f32 %v1239_v40, %v3155_v26  ;;  %v1053_v35 = vrot.slane %v1052_v61, 1  ;;  %v1252_v19 = vsub.f32 %v1249_v51, %v3142_v4 }
 0x3ae   : > { %v1251_v36 = vmax.f32 %v1242_v63, %v1248_v49  ;;  %v1054_v50 = vadd.f32 %v1053_v35, %v1052_v61  ;;  %v1255_v26 = vmul.f32 %v1252_v19, %v2635_v54 }
 0x3af   : > { %v1246_v43 = vpop.permute.xlu0 %1245 }
 0x3b0   : > { %v1254_v1 = vsub.f32 %v1251_v36, %v3126_v30  ;;  %v1250_v17 = vmax.f32 %v1241_v24, %v1246_v43  ;;  %2084 = vpush %v1054_v50  ;;  %v1324_v21 = vrot.slane %v1255_v26, 1  ;;  %v1333_v25 = vrot.slane %v1255_v26, 2 }
 0x3b1   : > { %2086 = vpush %v1064_v47  ;;  %v1342_v60 = vrot.slane %v1255_v26, 3  ;;  %v1351_v63 = vrot.slane %v1255_v26, 4 }
 0x3b2   : > { %v1253_v13 = vsub.f32 %v1250_v17, %v3135_v14  ;;  %v1257_v46 = vmul.f32 %v1254_v1, %v2629_v39 }
 0x3b4   : > { %v1256_v9 = vmul.f32 %v1253_v13, %v2640_v58  ;;  %v1327_v45 = vrot.slane %v1257_v46, 1  ;;  %v1336_v57 = vrot.slane %v1257_v46, 2  ;;  %v1345_v6 = vrot.slane %v1257_v46, 3 }
 0x3b5   : > { %v1354_v61 = vrot.slane %v1257_v46, 4 }
 0x3b6   : > { %v1325_v37 = vrot.slane %v1256_v9, 1  ;;  %v1334_v3 = vrot.slane %v1256_v9, 2  ;;  %v1343_v20 = vrot.slane %v1256_v9, 3  ;;  %v1352_v32 = vrot.slane %v1256_v9, 4 }
 0x3b8   : > { %v1328_v4 = vsel %vm376_vm13, %v1325_v37, %v1327_v45  ;;  %v1337_v30 = vsel %vm315_vm10, %v1334_v3, %v1336_v57  ;;  %v1326_v14 = vsel %vm376_vm13, %v1324_v21, %v1325_v37  ;;  %v1335_v41 = vsel %vm315_vm10, %v1333_v25, %v1334_v3 }
 0x3b9   : > { %v1332_v11 = vmax.f32 %v1256_v9, %v1328_v4  ;;  %v1331_v23 = vmax.f32 %v1255_v26, %v1326_v14  ;;  %v3260_v27 = vadd.f32 %v1337_v30, %v1335_v41  ;;  %v1346_v40 = vsel %vm504_vm14, %v1343_v20, %v1345_v6 }
 0x3ba   : > { %v1344_v51 = vsel %vm504_vm14, %v1342_v60, %v1343_v20  ;;  %v1355_v35 = vsel %vm514_vm15, %v1352_v32, %v1354_v61  ;;  %v1353_v50 = vsel %vm514_vm15, %v1351_v63, %v1352_v32  ;;  %v1098_v60 = vmul.f32 %v3057_v42, %v3093_v53 }
 0x3bb   : > { %v1341_v29 = vmax.f32 %v1332_v11, %v1337_v30  ;;  %v1340_v49 = vmax.f32 %v1331_v23, %v1335_v41  ;;  %v1096_v23 = vmul.f32 %v3043_v38, %v3109_v22 }
 0x3bc   : > { %v1100_v22 = vsel %vm315_vm10, %v1098_v60, 0.0 }
 0x3bd   : > { %v1350_v55 = vmax.f32 %v1341_v29, %v1346_v40  ;;  %v1349_v24 = vmax.f32 %v1340_v49, %v1344_v51 }
 0x3bf   : > { %v3265_v36 = vmax.f32 %v1350_v55, %v1355_v35  ;;  %v3268_v43 = vmax.f32 %v1349_v24, %v1353_v50  ;;  %v1111_v35 = vadd.f32 %v3046_v31, %v3043_v38  ;;  %v3811_v24 = vld [vmem:[#allocation9_spill] sm:$0xff] }
 0x3c0   : > { %v1135_v50 = vmul.f32 %v3043_v38, %v3811_v24 }
 0x3c1   : > { %1362 = vrot.lane.b32.xlu1 %v3265_v36, %s3764_s4  ;;  %1360 = vrot.lane.b32.xlu0 %v3268_v43, %s3764_s4 }
 0x3c5   : > { %1368 = vrot.lane.b32.xlu1 %v3265_v36, %s3768_s30  ;;  %1366 = vrot.lane.b32.xlu0 %v3268_v43, %s3768_s30 }
 0x3c9   : > { %1374 = vrot.lane.b32.xlu1 %v3265_v36, %s3810_s3  ;;  %1372 = vrot.lane.b32.xlu0 %v3268_v43, %s3810_s3 }
 0x3cc   : > { %v1300_v47 = vpop.permute.xlu1 %1299  ;;  %v1298_v19 = vpop.permute.xlu0 %1297 }
 0x3cd   : > { %v1302_v13 = vmax.f32 %v3209_v48, %v1300_v47  ;;  %v1301_v45 = vmax.f32 %v3211_v44, %v1298_v19  ;;  %v1097_v48 = vmul.f32 %v3046_v31, %v3089_v5  ;;  %v3812_v47 = vld [vmem:[#allocation10_spill] sm:$0xff] }
 0x3ce   : > { %v1136_v19 = vmul.f32 %v3046_v31, %v3812_v47 }
 0x3d0   : > { %v1306_v1 = vpop.permute.xlu1 %1305  ;;  %v1304_v17 = vpop.permute.xlu0 %1303 }
 0x3d1   : > { %v1308_v37 = vmax.f32 %v1302_v13, %v1306_v1  ;;  %v1307_v21 = vmax.f32 %v1301_v45, %v1304_v17  ;;  %v1124_v1 = vsel %vm315_vm10, %v3105_v18, 0.0  ;;  %v1112_v17 = vsel %vm315_vm10, %v3057_v42, 0.0  ;;  %v3813_v13 = vld [vmem:[#allocation11_spill] sm:$0xff] }
 0x3d2   : > { %v1137_v45 = vmul.f32 %v3057_v42, %v3813_v13  ;;  %v3320_v18 = vsel %vm1467_vm7, 1.0, %v3799_v28 }
 0x3d4   : > { %v1312_v57 = vpop.permute.xlu1 %1311  ;;  %v1310_v3 = vpop.permute.xlu0 %1309 }
 0x3d5   : > { %v1314_v25 = vmax.f32 %v1308_v37, %v1312_v57  ;;  %v1313_v4 = vmax.f32 %v1307_v21, %v1310_v3  ;;  %v1138_v57 = vadd.f32 %v1136_v19, %v1135_v50  ;;  %v1139_v37 = vsel %vm315_vm10, %v1137_v45, 0.0 }
 0x3d7   : > { %s3291_s28 = spop %2082  ;;  %v1140_v3 = vadd.f32 %v1139_v37, %v1138_v57 }
 0x3d8   : > { %v1318_v30 = vpop.permute.xlu1 %1317  ;;  %v1316_v11 = vpop.permute.xlu0 %1315 }
 0x3d9   : > { %v1320_v20 = vmax.f32 %v1314_v25, %v1318_v30  ;;  %v1319_v14 = vmax.f32 %v1313_v4, %v1316_v11  ;;  %v3323_v25 = vsel %vm1468_vm8, 1.0, %v3799_v28  ;;  %v1540_v4 = vsub.f32 %v2407_v7, %v3320_v18 }
 0x3da   : > { %v1541_v30 = vsub.f32 %v2436_v16, %v3323_v25 }
 0x3db   : > { %v1387_v41 = vrot.slane %v1320_v20, 6  ;;  %v1386_v6 = vrot.slane %v1319_v14, 6  ;;  %v1549_v33 = vrot.slane %v1540_v4, 1  ;;  %v3340_v20 = vsel %vm1469_vm9, 1.0, %v3799_v28 }
 0x3dc   : > { %v1550_v59 = vrot.slane %v1541_v30, 1  ;;  %v1542_v11 = vsub.f32 %v2418_v10, %v3340_v20  ;;  %v1560_v62 = vrot.slane %v1540_v4, 2 }
 0x3dd   : > { %v1394_v32 = vmul.f32 %v1387_v41, %v1257_v46  ;;  %v1388_v44 = vsel %vm613_vm3, %v1386_v6, %v1387_v41  ;;  %v1392_v29 = vmul.f32 %v1386_v6, %v1255_v26  ;;  %v1099_v46 = vadd.f32 %v1097_v48, %v1096_v23 }
 0x3de   : > { %v1393_v40 = vmul.f32 %v1388_v44, %v1256_v9  ;;  %v1123_v9 = vadd.f32 %v3101_v0, %v3121_v56  ;;  %v1113_v56 = vadd.f32 %v1112_v17, %v1111_v35  ;;  %v3346_v41 = vsel %vm376_vm13, %v1549_v33, %v1550_v59 }
 0x3df   : > { %v1401_v61 = vrot.slane %v1394_v32, 2  ;;  %v1398_v49 = vrot.slane %v1392_v29, 2  ;;  %v1101_v53 = vadd.f32 %v1100_v22, %v1099_v46  ;;  %v1561_v6 = vrot.slane %v1541_v30, 2  ;;  %v3815_v46 = vld [vmem:[#allocation25_spill] sm:$0xff] }
 0x3e0   : > { %v1399_v55 = vrot.slane %v1393_v40, 2  ;;  %v1125_v0 = vadd.f32 %v1124_v1, %v1123_v9  ;;  %v1557_v32 = vmax.f32 %v1540_v4, %v3346_v41  ;;  %v3349_v23 = vrot.slane %v1542_v11, 1 }
 0x3e1   : > { %s3293_s17 = spop %2084  ;;  %v1562_v28 = vsel %vm315_vm10, %v1560_v62, %v1561_v6  ;;  %v1563_v44 = vrot.slane %v1542_v11, 2  ;;  %v3379_v22 = vmul.f32 %v2560_v52, %v3815_v46  ;;  %v1442_v52 = vadd.f32 %v3197_v12, %v3201_v15 }
 0x3e2   : > { %s2087_s26 = spop %2086  ;;  %v1400_v5 = vsel %vm315_vm10, %v1398_v49, %v1399_v55  ;;  %v1402_v26 = vsel %vm315_vm10, %v1399_v55, %v1401_v61  ;;  %v3352_v48 = vmax.f32 %v1557_v32, %v1562_v28  ;;  %v3357_v29 = vsel %vm376_vm13, %v1550_v59, %v3349_v23 }
 0x3e3   : > { %s1066_s4 = sadd.f32 1e-07, %s2087_s26  ;;  %v1405_v51 = vadd.f32 %v1402_v26, %v1400_v5  ;;  %v1558_v40 = vmax.f32 %v1541_v30, %v3357_v29  ;;  %v1564_v49 = vsel %vm315_vm10, %v1561_v6, %v1563_v44  ;;  %v3816_v5 = vld [vmem:[#allocation26_spill] sm:$0xff] }
 0x3e4   : > { %v3383_v26 = vmul.f32 %v3806_v8, %v3816_v5 }
 0x3e5   : > { %v1067_v63 = vstv %s1066_s4  ;;  %s3331_s4 = smul.f32 %s3291_s28, %s3245_s16  ;;  %v3367_v55 = vmax.f32 %v1558_v40, %v1564_v49 }
 0x3e6   : > { %2220 = vrcp.f32 %v1067_v63  ;;  %v3391_v63 = vmul.f32 %v2418_v10, %v3383_v26 }
 0x3e8   : > { %1102 = vadd.xlane.f32.xlu0 %v1101_v53  ;;  %v3817_v53 = vld [vmem:[#allocation24_spill] sm:$0xff]  ;;  %v1545_v35 = vsub.f32 %v2418_v10, %v3391_v63 }
 0x3e9   : > { %v3395_v9 = vmul.f32 %v3808_v2, %v3817_v53 }
 0x3ea   : > { %v3409_v2 = vrot.slane %v1545_v35, 1  ;;  %v1612_v1 = vrot.slane %v1545_v35, 2 }
 0x3eb   : > { %v3406_v24 = vmul.f32 %v2407_v7, %v3395_v9 }
 0x3ec   : > { %1126 = vadd.xlane.f32.xlu0 %v1125_v0 }
 0x3ed   : > { %1114 = vadd.xlane.f32.xlu1 %v1113_v56  ;;  %v1543_v10 = vsub.f32 %v2407_v7, %v3406_v24 }
 0x3ef   : > { %v1598_v13 = vrot.slane %v1543_v10, 1  ;;  %v1609_v7 = vrot.slane %v1543_v10, 2 }
 0x3f0   : > { %v2221_v21 = vpop.eup %2220  ;;  %1141 = vadd.xlane.f32.xlu0 %v1140_v3 }
 0x3f1   : > { %2088 = vpush %v2221_v21 }
 0x3fe   : > { %1378 = vrot.lane.b32.xlu1 %v3268_v43, %s3766_s5 }
 0x406   : > { %1380 = vrot.lane.b32.xlu0 %v3265_v36, %s3766_s5 }
 0x422   : > { %s2089_s26 = spop %2088  ;;  %1406 = vadd.xlane.f32.xlu1 %v1405_v51  ;;  %v3387_v51 = vmul.f32 %v2436_v16, %v3379_v22 }
 0x423   : > { %s3335_s5 = smul.f32 %s2089_s26, %s3293_s17 }
 0x424   : > { %v1544_v8 = vsub.f32 %v2436_v16, %v3387_v51  ;;  %s3818_s26 = smul.f32 %s3233_s22, %s3231_s21  ;;  %s764_s22 = sadd.f32 %s3243_s29, %s2933_s14 }
 0x425   : > { %s1073_s23 = sadd.f32 %s3335_s5, %s3331_s4  ;;  %1416 = vadd.xlane.f32.xlu0 %v3260_v27  ;;  %v1559_v27 = vmax.f32 %v1542_v11, %v3349_v23  ;;  %s3820_s14 = smov 2  }
 0x426   : > { %v1599_v50 = vrot.slane %v1544_v8, 1  ;;  %s3414_s0 = ssub.f32 1.0, %s3818_s26  ;;  %v1610_v19 = vrot.slane %v1544_v8, 2  ;;  %s3821_s29 = smov 126  }
 0x427   : > { %s1074_s30 = sadd.f32 1e-07, %s1073_s23  ;;  %v3361_v61 = vmax.f32 %v1559_v27, %v1563_v44  ;;  %s1071_s23 = smul.f32 2.0, %s3331_s4 }
 0x428   : > { %v3422_v16 = vsel %vm376_vm13, %v1599_v50, %v3409_v2  ;;  %v1613_v56 = vsel %vm315_vm10, %v1610_v19, %v1612_v1  ;;  %v3429_v57 = vsel %vm376_vm13, %v1598_v13, %v1599_v50  ;;  %v1611_v30 = vsel %vm315_vm10, %v1609_v7, %v1610_v19 }
 0x429   : > { %v1075_v14 = vstv %s1074_s30  ;;  %s3814_s30 = smov 1   ;;  %s1072_s16 = smul.f32 %s1071_s23, %s3335_s5  ;;  %v1607_v0 = vmax.f32 %v1544_v8, %v3422_v16  ;;  %v1606_v4 = vmax.f32 %v1543_v10, %v3429_v57 }
 0x42a   : > { %2222 = vrcp.f32 %v1075_v14  ;;  %v1608_v14 = vmax.f32 %v1545_v35, %v3409_v2 }
 0x42b   : > { %v3431_v3 = vmax.f32 %v1607_v0, %v1613_v56  ;;  %v3437_v11 = vmax.f32 %v1606_v4, %v1611_v30 }
 0x42c   : > { %v3443_v44 = vmax.f32 %v1608_v14, %v1612_v1 }
 0x433   : > { %1571 = vrot.lane.b32.xlu1 %v3352_v48, %s3814_s30  ;;  %v1361_v47 = vpop.permute.xlu0 %1360  ;;  %v1363_v17 = vpop.permute.xlu1 %1362 }
 0x434   : > { %v2223_v60 = vpop.eup %2222  ;;  %v1364_v32 = vmax.f32 %v3268_v43, %v1361_v47  ;;  %v1365_v8 = vmax.f32 %v3265_v36, %v1363_v17 }
 0x435   : > { %2090 = vpush %v2223_v60 }
 0x437   : > { %1575 = vrot.lane.b32.xlu1 %v3361_v61, %s3814_s30  ;;  %v1367_v45 = vpop.permute.xlu0 %1366  ;;  %v1369_v37 = vpop.permute.xlu1 %1368 }
 0x438   : > { %v1371_v43 = vmax.f32 %v1365_v8, %v1369_v37  ;;  %v1870_v8 = vstv %s2926_s6 }
 0x43b   : > { %1580 = vrot.lane.b32.xlu1 %v3352_v48, %s3810_s3  ;;  %1573 = vrot.lane.b32.xlu0 %v3367_v55, %s3814_s30  ;;  %v1373_v21 = vpop.permute.xlu0 %1372  ;;  %v1375_v33 = vpop.permute.xlu1 %1374 }
 0x43c   : > { %v1377_v30 = vmax.f32 %v1371_v43, %v1375_v33 }
 0x43f   : > { %1584 = vrot.lane.b32.xlu1 %v3361_v61, %s3810_s3  ;;  %1582 = vrot.lane.b32.xlu0 %v3367_v55, %s3810_s3 }
 0x463   : > { %1443 = vadd.xlane.f32.xlu1 %v1442_v52  ;;  %v1370_v52 = vmax.f32 %v1364_v32, %v1367_v45 }
 0x465   : > { %v1376_v19 = vmax.f32 %v1370_v52, %v1373_v21 }
 0x466   : > { %s2091_s28 = spop %2090 }
 0x467   : > { %s1078_s17 = smul.f32 %s2091_s28, %s1072_s16 }
 0x469   : > { %s3418_s4 = ssub.f32 1.0, %s1078_s17 }
 0x46b   : > { %s1080_s5 = sadd.f32 %s3418_s4, %s3414_s0 }
 0x474   : > { %1622 = vrot.lane.b32.xlu1 %v3431_v3, %s3814_s30 }
 0x475   : > { %v1103_v59 = vpop.xlane.xlu0 %1102 }
 0x476   : > { %v1104_v62 = vrot.slane %v1103_v59, 4 }
 0x478   : > { %1629 = vrot.lane.b32.xlu1 %v3437_v11, %s3810_s3  ;;  %v1105_v6 = vadd.f32 %v1104_v62, %v1103_v59 }
 0x479   : > { %v1127_v28 = vpop.xlane.xlu0 %1126 }
 0x47a   : > { %v1115_v27 = vpop.xlane.xlu1 %1114  ;;  %v1106_v60 = vrot.slane %v1105_v6, 2  ;;  %v1128_v40 = vrot.slane %v1127_v28, 4 }
 0x47b   : > { %v1116_v49 = vrot.slane %v1115_v27, 4 }
 0x47c   : > { %1633 = vrot.lane.b32.xlu1 %v3443_v44, %s3810_s3  ;;  %v1129_v35 = vadd.f32 %v1128_v40, %v1127_v28  ;;  %v1107_v10 = vadd.f32 %v1106_v60, %v1105_v6 }
 0x47d   : > { %v1117_v50 = vadd.f32 %v1116_v49, %v1115_v27  ;;  %v1142_v13 = vpop.xlane.xlu0 %1141 }
 0x47e   : > { %v1379_v0 = vpop.permute.xlu1 %1378  ;;  %v1130_v47 = vrot.slane %v1129_v35, 2  ;;  %v1143_v1 = vrot.slane %v1142_v13, 4  ;;  %v1108_v4 = vrot.slane %v1107_v10, 1 }
 0x47f   : > { %v1118_v56 = vrot.slane %v1117_v50, 2  ;;  %v1382_v7 = vmax.f32 %v1376_v19, %v1379_v0 }
 0x480   : > { %v1144_v59 = vadd.f32 %v1143_v1, %v1142_v13  ;;  %v1131_v14 = vadd.f32 %v1130_v47, %v1129_v35  ;;  %v1109_v32 = vadd.f32 %v1108_v4, %v1107_v10 }
 0x481   : > { %v1119_v45 = vadd.f32 %v1118_v56, %v1117_v50  ;;  %v1381_v62 = vpop.permute.xlu0 %1380  ;;  %v1430_v21 = vmul.f32 %v1382_v7, %v3201_v15 }
 0x482   : > { %v1145_v42 = vrot.slane %v1144_v59, 2  ;;  %v1383_v36 = vmax.f32 %v1377_v30, %v1381_v62  ;;  %v1132_v28 = vrot.slane %v1131_v14, 1  ;;  %2092 = vpush %v1109_v32 }
 0x483   : > { %v1120_v17 = vrot.slane %v1119_v45, 1 }
 0x484   : > { %v1431_v37 = vmul.f32 %v1383_v36, %v3197_v12  ;;  %v1133_v27 = vadd.f32 %v1132_v28, %v1131_v14  ;;  %v1146_v60 = vadd.f32 %v1145_v42, %v1144_v59  ;;  %v3819_v12 = vld [vmem:[#allocation5_spill] sm:$0xff]  ;;  %v1874_v42 = vstv %s3237_s24 }
 0x485   : > { %v1121_v6 = vadd.f32 %v1120_v17, %v1119_v45  ;;  %vm1873_vm11 = vcmp.eq.s32.totalorder %v3819_v12, 1  ;;  %vm1869_vm12 = vcmp.eq.s32.totalorder %v3819_v12, 0  ;;  %vm1877_vm0 = vcmp.eq.s32.totalorder %v3819_v12, 2 }
 0x486   : > { %v1432_v33 = vadd.f32 %v1431_v37, %v1430_v21  ;;  %v1147_v40 = vrot.slane %v1146_v60, 1  ;;  %v1875_v50 = vsel %vm1873_vm11, %v1874_v42, 0.0  ;;  %v1871_v43 = vsel %vm1869_vm12, %v1870_v8, 0.0 }
 0x487   : > { %2094 = vpush %v1121_v6  ;;  %v1876_v47 = vadd.f32 %v1875_v50, %v1871_v43  ;;  %vm1897_vm1 = vcmp.eq.s32.totalorder %v3819_v12, 7  ;;  %vm1901_vm2 = vcmp.eq.s32.totalorder %v3819_v12, 8  ;;  %vm1909_vm4 = vcmp.eq.s32.totalorder %v3819_v12, 10 }
 0x488   : > { %2096 = vpush %v1133_v27  ;;  %1433 = vadd.xlane.f32.xlu0 %v1432_v33  ;;  %v1148_v49 = vadd.f32 %v1147_v40, %v1146_v60  ;;  %vm1913_vm5 = vcmp.eq.s32.totalorder %v3819_v12, 11  ;;  %vm1917_vm6 = vcmp.eq.s32.totalorder %v3819_v12, 12  ;;  %vm1921_vm7 = vcmp.eq.s32.totalorder %v3819_v12, 13 }
 0x48a   : > { %2098 = vpush %v1148_v49 }
 0x49e   : > { %1620 = vrot.lane.b32.xlu0 %v3437_v11, %s3814_s30 }
 0x4a2   : > { %1624 = vrot.lane.b32.xlu0 %v3443_v44, %s3814_s30 }
 0x4a6   : > { %1631 = vrot.lane.b32.xlu0 %v3431_v3, %s3810_s3 }
 0x4af   : > { %v1407_v15 = vpop.xlane.xlu1 %1406 }
 0x4b0   : > { %v1408_v52 = vrot.slane %v1407_v15, 4 }
 0x4b2   : > { %v1409_v35 = vadd.f32 %v1408_v52, %v1407_v15  ;;  %v1417_v10 = vpop.xlane.xlu0 %1416 }
 0x4b3   : > { %v1572_v19 = vpop.permute.xlu1 %1571  ;;  %v1418_v0 = vrot.slane %v1417_v10, 4  ;;  %s2093_s21 = spop %2092 }
 0x4b4   : > { %v1410_v13 = vrot.slane %v1409_v35, 2  ;;  %v1878_v1 = vstv %s2093_s21  ;;  %v1577_v14 = vmax.f32 %v1572_v19, %v3352_v48 }
 0x4b5   : > { %v1419_v56 = vadd.f32 %v1418_v0, %v1417_v10  ;;  %v1879_v4 = vsel %vm1877_vm0, %v1878_v1, 0.0 }
 0x4b6   : > { %v1411_v7 = vadd.f32 %v1410_v13, %v1409_v35  ;;  %v1574_v59 = vpop.permute.xlu0 %1573  ;;  %v3462_v62 = vadd.f32 %v1879_v4, %v1876_v47 }
 0x4b7   : > { %v1576_v30 = vpop.permute.xlu1 %1575  ;;  %v1420_v45 = vrot.slane %v1419_v56, 2  ;;  %v1578_v32 = vmax.f32 %v1574_v59, %v3367_v55 }
 0x4b8   : > { %s3465_s6 = spop %2094  ;;  %v1412_v36 = vrot.slane %v1411_v7, 1  ;;  %v1579_v6 = vmax.f32 %v1576_v30, %v3361_v61 }
 0x4b9   : > { %v1421_v17 = vadd.f32 %v1420_v45, %v1419_v56  ;;  %s3469_s24 = spop %2096 }
 0x4ba   : > { %v1583_v21 = vpop.permute.xlu0 %1582  ;;  %v1413_v37 = vadd.f32 %v1412_v36, %v1411_v7 }
 0x4bb   : > { %v1581_v28 = vpop.permute.xlu1 %1580  ;;  %s2099_s23 = spop %2098  ;;  %v1587_v60 = vmax.f32 %v1578_v32, %v1583_v21  ;;  %v1422_v48 = vrot.slane %v1421_v17, 1 }
 0x4bc   : > { %v1586_v27 = vmax.f32 %v1577_v14, %v1581_v28  ;;  %s3472_s16 = sadd.f32 %s2099_s23, %s764_s22  ;;  %2100 = vpush %v1413_v37 }
 0x4bd   : > { %v1590_v33 = vsub.f32 %v1587_v60, %v3357_v29  ;;  %v1423_v40 = vadd.f32 %v1422_v48, %v1421_v17 }
 0x4be   : > { %v1589_v55 = vsub.f32 %v1586_v27, %v3346_v41 }
 0x4bf   : > { %v1585_v49 = vpop.permute.xlu1 %1584  ;;  %v1593_v42 = vmul.f32 %v1590_v33, %v2640_v58  ;;  %2102 = vpush %v1423_v40 }
 0x4c0   : > { %v1592_v15 = vmul.f32 %v1589_v55, %v2635_v54  ;;  %v1588_v52 = vmax.f32 %v1579_v6, %v1585_v49 }
 0x4c1   : > { %v1648_v35 = vrot.slane %v1593_v42, 1  ;;  %v1657_v50 = vrot.slane %v1593_v42, 2  ;;  %v1666_v19 = vrot.slane %v1593_v42, 3  ;;  %v1675_v29 = vrot.slane %v1593_v42, 4 }
 0x4c2   : > { %v1647_v61 = vrot.slane %v1592_v15, 1  ;;  %v1656_v8 = vrot.slane %v1592_v15, 2  ;;  %v1665_v10 = vrot.slane %v1592_v15, 3  ;;  %v1591_v13 = vsub.f32 %v1588_v52, %v3349_v23 }
 0x4c3   : > { %v1674_v0 = vrot.slane %v1592_v15, 4 }
 0x4c4   : > { %v1649_v41 = vsel %vm376_vm13, %v1647_v61, %v1648_v35  ;;  %v1594_v43 = vmul.f32 %v1591_v13, %v2629_v39  ;;  %v3482_v56 = vsel %vm315_vm10, %v1656_v8, %v1657_v50  ;;  %v1667_v30 = vsel %vm504_vm14, %v1665_v10, %v1666_v19 }
 0x4c5   : > { %v1654_v47 = vmax.f32 %v1592_v15, %v1649_v41  ;;  %v1676_v32 = vsel %vm514_vm15, %v1674_v0, %v1675_v29 }
 0x4c6   : > { %v1650_v1 = vrot.slane %v1594_v43, 1  ;;  %v1659_v7 = vrot.slane %v1594_v43, 2  ;;  %v1668_v4 = vrot.slane %v1594_v43, 3  ;;  %v1677_v14 = vrot.slane %v1594_v43, 4 }
 0x4c7   : > { %v1663_v59 = vmax.f32 %v1654_v47, %v3482_v56 }
 0x4c8   : > { %v1651_v45 = vsel %vm376_vm13, %v1648_v35, %v1650_v1  ;;  %v3488_v23 = vsel %vm315_vm10, %v1657_v50, %v1659_v7  ;;  %v1669_v28 = vsel %vm504_vm14, %v1666_v19, %v1668_v4  ;;  %v1678_v6 = vsel %vm514_vm15, %v1675_v29, %v1677_v14 }
 0x4c9   : > { %v1672_v36 = vmax.f32 %v1663_v59, %v1667_v30  ;;  %v1655_v17 = vmax.f32 %v1593_v42, %v1651_v45 }
 0x4cb   : > { %v3492_v21 = vmax.f32 %v1672_v36, %v1676_v32  ;;  %v1664_v37 = vmax.f32 %v1655_v17, %v3488_v23 }
 0x4cd   : > { %1683 = vrot.lane.b32.xlu0 %v3492_v21, %s3820_s14  ;;  %v1673_v27 = vmax.f32 %v1664_v37, %v1669_v28 }
 0x4cf   : > { %v3498_v60 = vmax.f32 %v1673_v27, %v1678_v6 }
 0x4d1   : > { %1685 = vrot.lane.b32.xlu1 %v3498_v60, %s3820_s14  ;;  %1689 = vrot.lane.b32.xlu0 %v3492_v21, %s3814_s30 }
 0x4d5   : > { %1691 = vrot.lane.b32.xlu1 %v3498_v60, %s3814_s30  ;;  %1695 = vrot.lane.b32.xlu0 %v3492_v21, %s3810_s3 }
 0x4d9   : > { %1697 = vrot.lane.b32.xlu1 %v3498_v60, %s3810_s3  ;;  %1701 = vrot.lane.b32.xlu0 %v3492_v21, %s3821_s29 }
 0x4dd   : > { %1703 = vrot.lane.b32.xlu1 %v3498_v60, %s3821_s29 }
 0x4ed   : > { %s3514_s28 = spop %2100 }
 0x4f0   : > { %s2103_s17 = spop %2102  ;;  %v1444_v33 = vpop.xlane.xlu1 %1443 }
 0x4f1   : > { %s1425_s26 = sadd.f32 1e-07, %s2103_s17  ;;  %v1445_v40 = vrot.slane %v1444_v33, 4 }
 0x4f3   : > { %v1426_v48 = vstv %s1425_s26  ;;  %v1446_v49 = vadd.f32 %v1445_v40, %v1444_v33 }
 0x4f4   : > { %2224 = vrcp.f32 %v1426_v48  ;;  %v1623_v15 = vpop.permute.xlu1 %1622 }
 0x4f5   : > { %v1447_v42 = vrot.slane %v1446_v49, 2  ;;  %v1627_v4 = vmax.f32 %v1623_v15, %v3431_v3 }
 0x4f7   : > { %v1448_v10 = vadd.f32 %v1447_v42, %v1446_v49 }
 0x4f8   : > { %v1630_v8 = vpop.permute.xlu1 %1629 }
 0x4f9   : > { %v1449_v43 = vrot.slane %v1448_v10, 1 }
 0x4fb   : > { %v1450_v14 = vadd.f32 %v1449_v43, %v1448_v10 }
 0x4fc   : > { %v1634_v29 = vpop.permute.xlu1 %1633 }
 0x4fe   : > { %v2225_v55 = vpop.eup %2224 }
 0x4ff   : > { %2104 = vpush %v2225_v55 }
 0x515   : > { %v1434_v52 = vpop.xlane.xlu0 %1433 }
 0x516   : > { %v1435_v61 = vrot.slane %v1434_v52, 4 }
 0x518   : > { %v1436_v35 = vadd.f32 %v1435_v61, %v1434_v52 }
 0x519   : > { %v1621_v50 = vpop.permute.xlu0 %1620 }
 0x51a   : > { %v1437_v19 = vrot.slane %v1436_v35, 2  ;;  %v1626_v13 = vmax.f32 %v1621_v50, %v3437_v11 }
 0x51c   : > { %v1438_v0 = vadd.f32 %v1437_v19, %v1436_v35  ;;  %v1635_v47 = vmax.f32 %v1626_v13, %v1630_v8 }
 0x51d   : > { %v1625_v41 = vpop.permute.xlu0 %1624 }
 0x51e   : > { %v1628_v1 = vmax.f32 %v1625_v41, %v3443_v44  ;;  %v1439_v7 = vrot.slane %v1438_v0, 1  ;;  %v1638_v32 = vsub.f32 %v1635_v47, %v3429_v57 }
 0x520   : > { %v1637_v30 = vmax.f32 %v1628_v1, %v1634_v29  ;;  %v1440_v59 = vadd.f32 %v1439_v7, %v1438_v0  ;;  %v1641_v44 = vmul.f32 %v1638_v32, %v2635_v54 }
 0x521   : > { %v1632_v45 = vpop.permute.xlu0 %1631 }
 0x522   : > { %v1640_v36 = vsub.f32 %v1637_v30, %v3409_v2  ;;  %v1636_v17 = vmax.f32 %v1627_v4, %v1632_v45  ;;  %2106 = vpush %v1440_v59  ;;  %v1710_v27 = vrot.slane %v1641_v44, 1  ;;  %v1719_v48 = vrot.slane %v1641_v44, 2 }
 0x523   : > { %2108 = vpush %v1450_v14  ;;  %v1728_v61 = vrot.slane %v1641_v44, 3  ;;  %v1737_v13 = vrot.slane %v1641_v44, 4 }
 0x524   : > { %v1639_v11 = vsub.f32 %v1636_v17, %v3422_v16  ;;  %v3523_v28 = vmul.f32 %v1640_v36, %v2629_v39 }
 0x526   : > { %v3527_v3 = vmul.f32 %v1639_v11, %v2640_v58  ;;  %v1713_v37 = vrot.slane %v3523_v28, 1  ;;  %v1722_v6 = vrot.slane %v3523_v28, 2  ;;  %v1731_v40 = vrot.slane %v3523_v28, 3 }
 0x527   : > { %v1740_v8 = vrot.slane %v3523_v28, 4 }
 0x528   : > { %v1711_v57 = vrot.slane %v3527_v3, 1  ;;  %v1720_v2 = vrot.slane %v3527_v3, 2  ;;  %v1729_v55 = vrot.slane %v3527_v3, 3  ;;  %v1738_v49 = vrot.slane %v3527_v3, 4 }
 0x52a   : > { %v1714_v16 = vsel %vm376_vm13, %v1711_v57, %v1713_v37  ;;  %v1723_v39 = vsel %vm315_vm10, %v1720_v2, %v1722_v6  ;;  %v1712_v58 = vsel %vm376_vm13, %v1710_v27, %v1711_v57  ;;  %v1721_v33 = vsel %vm315_vm10, %v1719_v48, %v1720_v2 }
 0x52b   : > { %v1718_v54 = vmax.f32 %v3527_v3, %v1714_v16  ;;  %v1717_v15 = vmax.f32 %v1641_v44, %v1712_v58  ;;  %v3541_v42 = vadd.f32 %v1723_v39, %v1721_v33  ;;  %v1732_v35 = vsel %vm504_vm14, %v1729_v55, %v1731_v40 }
 0x52c   : > { %v1730_v19 = vsel %vm504_vm14, %v1728_v61, %v1729_v55  ;;  %v1741_v0 = vsel %vm514_vm15, %v1738_v49, %v1740_v8  ;;  %v1739_v43 = vsel %vm514_vm15, %v1737_v13, %v1738_v49  ;;  %v1482_v57 = vmul.f32 %v3320_v18, %v3395_v9  ;;  %v3822_v61 = vld [vmem:[#allocation12_spill] sm:$0xff] }
 0x52d   : > { %v1727_v52 = vmax.f32 %v1718_v54, %v1723_v39  ;;  %v1726_v50 = vmax.f32 %v1717_v15, %v1721_v33  ;;  %v1483_v2 = vmul.f32 %v3323_v25, %v3379_v22  ;;  %v1509_v40 = vadd.f32 %v3387_v51, %v3406_v24  ;;  %v3824_v24 = vld [vmem:[#allocation14_spill] sm:$0xff] }
 0x52e   : > { %v1498_v51 = vsel %vm315_vm10, %v3340_v20, 0.0  ;;  %vm1881_vm13 = vcmp.eq.s32.totalorder %v3819_v12, 3  ;;  %vm1885_vm14 = vcmp.eq.s32.totalorder %v3819_v12, 4  ;;  %vm1893_vm15 = vcmp.eq.s32.totalorder %v3819_v12, 6 }
 0x52f   : > { %v1736_v10 = vmax.f32 %v1727_v52, %v1732_v35  ;;  %v1735_v41 = vmax.f32 %v1726_v50, %v1730_v19  ;;  %v1497_v52 = vadd.f32 %v3323_v25, %v3320_v18  ;;  %v3823_v50 = vld [vmem:[#allocation13_spill] sm:$0xff] }
 0x531   : > { %v3547_v29 = vmax.f32 %v1736_v10, %v1741_v0  ;;  %v3550_v47 = vmax.f32 %v1735_v41, %v1739_v43  ;;  %v1523_v10 = vmul.f32 %v3340_v20, %v3824_v24  ;;  %v1499_v43 = vadd.f32 %v1498_v51, %v1497_v52 }
 0x532   : > { %v278_v52 = vmul.f32 0.10000001, %v3817_v53 }
 0x533   : > { %1748 = vrot.lane.b32.xlu1 %v3547_v29, %s3820_s14  ;;  %1746 = vrot.lane.b32.xlu0 %v3550_v47, %s3820_s14 }
 0x537   : > { %1754 = vrot.lane.b32.xlu1 %v3547_v29, %s3814_s30  ;;  %1752 = vrot.lane.b32.xlu0 %v3550_v47, %s3814_s30 }
 0x53b   : > { %1760 = vrot.lane.b32.xlu1 %v3547_v29, %s3810_s3  ;;  %1758 = vrot.lane.b32.xlu0 %v3550_v47, %s3810_s3  ;;  %s3572_s3 = spop %2104 }
 0x53c   : > { %s1429_s23 = smul.f32 %s3572_s3, %s3514_s28 }
 0x53f   : > { %v1684_v1 = vpop.permute.xlu0 %1683 }
 0x540   : > { %v1687_v30 = vmax.f32 %v3492_v21, %v1684_v1  ;;  %v1484_v21 = vmul.f32 %v3340_v20, %v3383_v26 }
 0x542   : > { %v1486_v54 = vsel %vm315_vm10, %v1484_v21, 0.0  ;;  %v3828_v21 = vld [vmem:[#allocation17_spill] sm:$0xff] }
 0x543   : > { %v1686_v7 = vpop.permute.xlu1 %1685  ;;  %v1690_v4 = vpop.permute.xlu0 %1689 }
 0x544   : > { %v1693_v14 = vmax.f32 %v1687_v30, %v1690_v4  ;;  %v1688_v32 = vmax.f32 %v3498_v60, %v1686_v7  ;;  %v1485_v60 = vadd.f32 %v1483_v2, %v1482_v57  ;;  %v3827_v57 = vld [vmem:[#allocation18_spill] sm:$0xff] }
 0x545   : > { %v242_v2 = vmul.f32 0.3, %v3827_v57  ;;  %v3834_v57 = vld [vmem:[#allocation29_spill] sm:$0xff] }
 0x546   : > { %v1487_v33 = vadd.f32 %v1486_v54, %v1485_v60  ;;  %v3830_v60 = vld [vmem:[#allocation20_spill] sm:$0xff] }
 0x547   : > { %v1692_v59 = vpop.permute.xlu1 %1691  ;;  %v1696_v45 = vpop.permute.xlu0 %1695 }
 0x548   : > { %v1699_v36 = vmax.f32 %v1693_v14, %v1696_v45  ;;  %v1694_v37 = vmax.f32 %v1688_v32, %v1692_v59  ;;  %v1828_v59 = vadd.f32 %v3488_v23, %v3482_v56 }
 0x54b   : > { %v1698_v17 = vpop.permute.xlu1 %1697  ;;  %v1702_v11 = vpop.permute.xlu0 %1701 }
 0x54c   : > { %v1705_v6 = vmax.f32 %v1699_v36, %v1702_v11  ;;  %v1700_v27 = vmax.f32 %v1694_v37, %v1698_v17  ;;  %v3825_v17 = vld [vmem:[#allocation15_spill] sm:$0xff]  ;;  %v3826_v37 = vld [vmem:[#allocation16_spill] sm:$0xff] }
 0x54d   : > { %v227_v11 = vmul.f32 0.4, %v3825_v17 }
 0x54e   : > { %v1772_v48 = vrot.slane %v1705_v6, 6  ;;  %v228_v6 = vmul.f32 0.4, %v3826_v37 }
 0x54f   : > { %v1704_v16 = vpop.permute.xlu1 %1703  ;;  %v245_v54 = vadd.f32 %v242_v2, %v227_v11 }
 0x550   : > { %v1706_v39 = vmax.f32 %v1700_v27, %v1704_v16  ;;  %v1778_v58 = vmul.f32 %v1772_v48, %v1641_v44  ;;  %v1521_v44 = vmul.f32 %v3320_v18, %v3822_v61  ;;  %v3829_v16 = vld [vmem:[#allocation19_spill] sm:$0xff]  ;;  %v279_v61 = vmul.f32 0.10000001, %v3815_v46 }
 0x552   : > { %v1773_v55 = vrot.slane %v1706_v39, 6  ;;  %v1784_v8 = vrot.slane %v1778_v58, 2  ;;  %v243_v39 = vmul.f32 0.3, %v3829_v16  ;;  %v260_v58 = vmul.f32 0.2, %v3807_v34 }
 0x553   : > { %s3574_s30 = spop %2106 }
 0x554   : > { %s2109_s21 = spop %2108  ;;  %v1774_v9 = vsel %vm613_vm3, %v1772_v48, %v1773_v55  ;;  %v1780_v22 = vmul.f32 %v1773_v55, %v3523_v28  ;;  %v1522_v28 = vmul.f32 %v3323_v25, %v3823_v50  ;;  %v229_v48 = vmul.f32 0.4, %v3828_v21  ;;  %v3835_v21 = vld [vmem:[#allocation8_spill] sm:$0xff] }
 0x555   : > { %s1452_s22 = sadd.f32 1e-07, %s2109_s21  ;;  %v1779_v26 = vmul.f32 %v1774_v9, %v3527_v3  ;;  %v1510_v3 = vsel %vm315_vm10, %v3391_v63, 0.0  ;;  %v1525_v63 = vsel %vm315_vm10, %v1523_v10, 0.0  ;;  %v244_v55 = vmul.f32 0.3, %v3830_v60 }
 0x556   : > { %v1787_v49 = vrot.slane %v1780_v22, 2  ;;  %v1511_v41 = vadd.f32 %v1510_v3, %v1509_v40  ;;  %v1524_v1 = vadd.f32 %v1522_v28, %v1521_v44  ;;  %v3831_v9 = vld [vmem:[#allocation22_spill] sm:$0xff]  ;;  %v3832_v40 = vld [vmem:[#allocation23_spill] sm:$0xff]  ;;  %v280_v28 = vmul.f32 0.10000001, %v3816_v5 }
 0x557   : > { %v1453_v15 = vstv %s1452_s22  ;;  %v1785_v35 = vrot.slane %v1779_v26, 2  ;;  %s1457_s22 = smul.f32 2.0, %s1429_s23  ;;  %v261_v22 = vmul.f32 0.2, %v3831_v9  ;;  %v246_v26 = vadd.f32 %v243_v39, %v228_v6  ;;  %v3833_v6 = vld [vmem:[#allocation7_spill] sm:$0xff] }
 0x558   : > { %2226 = vrcp.f32 %v1453_v15  ;;  %v1526_v7 = vadd.f32 %v1525_v63, %v1524_v1  ;;  %v263_v15 = vadd.f32 %v260_v58, %v245_v54  ;;  %v765_v2 = vadd.f32 %v3834_v57, %v3833_v6  ;;  %v3838_v54 = vld [vmem:[#allocation31_spill] sm:$0xff] }
 0x559   : > { %v1786_v19 = vsel %vm315_vm10, %v1784_v8, %v1785_v35  ;;  %v1788_v13 = vsel %vm315_vm10, %v1785_v35, %v1787_v49  ;;  %v262_v49 = vmul.f32 0.2, %v3832_v40  ;;  %v264_v35 = vadd.f32 %v261_v22, %v246_v26 }
 0x55a   : > { %v1791_v0 = vadd.f32 %v1788_v13, %v1786_v19  ;;  %1488 = vadd.xlane.f32.xlu0 %v1487_v33  ;;  %v247_v33 = vadd.f32 %v244_v55, %v229_v48  ;;  %v281_v51 = vadd.f32 %v278_v52, %v263_v15  ;;  %v3836_v48 = vld [vmem:[#allocation30_spill] sm:$0xff]  ;;  %v1151_v9 = vadd.f32 %v3043_v38, %v765_v2 }
 0x55b   : > { %v282_v24 = vadd.f32 %v279_v61, %v264_v35  ;;  %v766_v16 = vadd.f32 %v3836_v48, %v3835_v21  ;;  %v3837_v55 = vld [vmem:[#allocation6_spill] sm:$0xff]  ;;  %vm1905_vm3 = vcmp.eq.s32.totalorder %v3819_v12, 9 }
 0x55c   : > { %v265_v50 = vadd.f32 %v262_v49, %v247_v33  ;;  %v767_v58 = vadd.f32 %v3838_v54, %v3837_v55 }
 0x55d   : > { %v1152_v22 = vadd.f32 %v3046_v31, %v766_v16 }
 0x55e   : > { %1512 = vadd.xlane.f32.xlu0 %v1511_v41  ;;  %v283_v10 = vadd.f32 %v280_v28, %v265_v50 }
 0x55f   : > { %1500 = vadd.xlane.f32.xlu1 %v1499_v43  ;;  %v1538_v35 = vadd.f32 %v3323_v25, %v1152_v22 }
 0x562   : > { %v2227_v4 = vpop.eup %2226  ;;  %1527 = vadd.xlane.f32.xlu0 %v1526_v7 }
 0x563   : > { %2110 = vpush %v2227_v4 }
 0x570   : > { %1764 = vrot.lane.b32.xlu1 %v3550_v47, %s3821_s29 }
 0x578   : > { %1766 = vrot.lane.b32.xlu0 %v3547_v29, %s3821_s29 }
 0x594   : > { %s2111_s14 = spop %2110  ;;  %1792 = vadd.xlane.f32.xlu1 %v1791_v0 }
 0x595   : > { %s1456_s17 = smul.f32 %s2111_s14, %s3574_s30 }
 0x597   : > { %s1459_s26 = sadd.f32 %s1456_s17, %s1429_s23  ;;  %1802 = vadd.xlane.f32.xlu0 %v3541_v42  ;;  %s1458_s29 = smul.f32 %s1457_s22, %s1456_s17 }
 0x599   : > { %s1460_s21 = sadd.f32 1e-07, %s1459_s26 }
 0x59b   : > { %v1461_v30 = vstv %s1460_s21  ;;  %1829 = vadd.xlane.f32.xlu0 %v1828_v59 }
 0x59c   : > { %2228 = vrcp.f32 %v1461_v30 }
 0x59d   : > { %2230 = vlog2.f32 %v281_v51 }
 0x59e   : > { %2232 = vlog2.f32 %v282_v24 }
 0x59f   : > { %2234 = vlog2.f32 %v283_v10 }
 0x5a5   : > { %v1747_v14 = vpop.permute.xlu0 %1746  ;;  %v1749_v32 = vpop.permute.xlu1 %1748 }
 0x5a6   : > { %v2229_v45 = vpop.eup %2228  ;;  %v1750_v34 = vmax.f32 %v3550_v47, %v1747_v14  ;;  %v1751_v1 = vmax.f32 %v3547_v29, %v1749_v32 }
 0x5a7   : > { %2112 = vpush %v2229_v45  ;;  %v2231_v26 = vpop.eup %2230 }
 0x5a8   : > { %v2233_v52 = vpop.eup %2232  ;;  %v291_v61 = vmul.f32 0.6931472, %v2231_v26 }
 0x5a9   : > { %v1753_v36 = vpop.permute.xlu0 %1752  ;;  %v1755_v42 = vpop.permute.xlu1 %1754  ;;  %v293_v51 = vmul.f32 0.6931472, %v2233_v52 }
 0x5aa   : > { %v1756_v13 = vmax.f32 %v1750_v34, %v1753_v36  ;;  %v1757_v30 = vmax.f32 %v1751_v1, %v1755_v42  ;;  %v2235_v50 = vpop.eup %2234 }
 0x5ab   : > { %v295_v34 = vmul.f32 0.6931472, %v2235_v50 }
 0x5ad   : > { %v1759_v27 = vpop.permute.xlu0 %1758  ;;  %v1761_v44 = vpop.permute.xlu1 %1760 }
 0x5ae   : > { %v1762_v63 = vmax.f32 %v1756_v13, %v1759_v27  ;;  %v1763_v11 = vmax.f32 %v1757_v30, %v1761_v44 }
 0x5d8   : > { %s2113_s28 = spop %2112 }
 0x5d9   : > { %s1464_s3 = smul.f32 %s2113_s28, %s1458_s29 }
 0x5db   : > { %s1465_s30 = ssub.f32 1.0, %s1464_s3 }
 0x5dd   : > { %s3610_s14 = sadd.f32 %s1465_s30, %s1080_s5 }
 0x5e7   : > { %v1489_v8 = vpop.xlane.xlu0 %1488 }
 0x5e8   : > { %v1490_v3 = vrot.slane %v1489_v8, 4 }
 0x5ea   : > { %v1491_v19 = vadd.f32 %v1490_v3, %v1489_v8  ;;  %v1537_v8 = vadd.f32 %v3320_v18, %v1151_v9 }
 0x5eb   : > { %v1513_v0 = vpop.xlane.xlu0 %1512 }
 0x5ec   : > { %v1501_v41 = vpop.xlane.xlu1 %1500  ;;  %v1492_v53 = vrot.slane %v1491_v19, 2  ;;  %v1514_v46 = vrot.slane %v1513_v0, 4  ;;  %v1853_v10 = vmul.f32 %v1537_v8, %v291_v61 }
 0x5ed   : > { %v1502_v43 = vrot.slane %v1501_v41, 4 }
 0x5ee   : > { %v1515_v5 = vadd.f32 %v1514_v46, %v1513_v0  ;;  %v1493_v4 = vadd.f32 %v1492_v53, %v1491_v19  ;;  %v1854_v0 = vmul.f32 %v1538_v35, %v293_v51 }
 0x5ef   : > { %v1503_v7 = vadd.f32 %v1502_v43, %v1501_v41  ;;  %v1528_v47 = vpop.xlane.xlu0 %1527 }
 0x5f0   : > { %v1765_v59 = vpop.permute.xlu1 %1764  ;;  %v1516_v45 = vrot.slane %v1515_v5, 2  ;;  %v1529_v17 = vrot.slane %v1528_v47, 4  ;;  %v1494_v37 = vrot.slane %v1493_v4, 1  ;;  %v1856_v25 = vadd.f32 %v1854_v0, %v1853_v10 }
 0x5f1   : > { %v1504_v14 = vrot.slane %v1503_v7, 2  ;;  %v1768_v36 = vmax.f32 %v1762_v63, %v1765_v59 }
 0x5f2   : > { %v1530_v29 = vadd.f32 %v1529_v17, %v1528_v47  ;;  %v1517_v39 = vadd.f32 %v1516_v45, %v1515_v5  ;;  %v1495_v60 = vadd.f32 %v1494_v37, %v1493_v4  ;;  %v1890_v45 = vstv %s3239_s25 }
 0x5f3   : > { %v1816_v32 = vmul.f32 %v1768_v36, %v3482_v56  ;;  %v1505_v27 = vadd.f32 %v1504_v14, %v1503_v7  ;;  %v1767_v42 = vpop.permute.xlu0 %1766  ;;  %v3839_v56 = vld [vmem:[#allocation33_spill] sm:$0xff]  ;;  %v1886_v7 = vstv %s2928_s7  ;;  %v1894_v37 = vstv %s3465_s6 }
 0x5f4   : > { %v1531_v33 = vrot.slane %v1530_v29, 2  ;;  %v1769_v40 = vmax.f32 %v1763_v11, %v1767_v42  ;;  %v1518_v15 = vrot.slane %v1517_v39, 1  ;;  %2114 = vpush %v1495_v60  ;;  %v1153_v44 = vadd.f32 %v3839_v56, %v767_v58 }
 0x5f5   : > { %v1506_v49 = vrot.slane %v1505_v27, 1  ;;  %v1887_v11 = vsel %vm1885_vm14, %v1886_v7, 0.0  ;;  %v1906_v60 = vstv %s3241_s27  ;;  %v1910_v58 = vstv %s3469_s24 }
 0x5f6   : > { %v1817_v28 = vmul.f32 %v1769_v40, %v3488_v23  ;;  %v1519_v3 = vadd.f32 %v1518_v15, %v1517_v39  ;;  %v1532_v31 = vadd.f32 %v1531_v33, %v1530_v29  ;;  %v1539_v24 = vadd.f32 %v3340_v20, %v1153_v44 }
 0x5f7   : > { %v1507_v38 = vadd.f32 %v1506_v49, %v1505_v27  ;;  %v1907_v22 = vsel %vm1905_vm3, %v1906_v60, 0.0  ;;  %v1911_v40 = vsel %vm1909_vm4, %v1910_v58, 0.0 }
 0x5f8   : > { %v1818_v19 = vadd.f32 %v1817_v28, %v1816_v32  ;;  %v1533_v13 = vrot.slane %v1532_v31, 1  ;;  %v1855_v41 = vmul.f32 %v1539_v24, %v295_v34  ;;  %v1902_v32 = vstv %s2931_s8 }
 0x5f9   : > { %2116 = vpush %v1507_v38  ;;  %v1903_v54 = vsel %vm1901_vm2, %v1902_v32, 0.0 }
 0x5fa   : > { %2118 = vpush %v1519_v3  ;;  %1819 = vadd.xlane.f32.xlu1 %v1818_v19  ;;  %v1534_v18 = vadd.f32 %v1533_v13, %v1532_v31  ;;  %v1857_v23 = vsel %vm315_vm10, %v1855_v41, 0.0  ;;  %vm1889_vm10 = vcmp.eq.s32.totalorder %v3819_v12, 5 }
 0x5fb   : > { %v1858_v53 = vadd.f32 %v1857_v23, %v1856_v25  ;;  %v1891_v57 = vsel %vm1889_vm10, %v1890_v45, 0.0 }
 0x5fc   : > { %2120 = vpush %v1534_v18 }
 0x5fe   : > { %1859 = vadd.xlane.f32.xlu1 %v1858_v53 }
 0x621   : > { %v1793_v46 = vpop.xlane.xlu1 %1792 }
 0x622   : > { %v1794_v43 = vrot.slane %v1793_v46, 4 }
 0x624   : > { %v1795_v20 = vadd.f32 %v1794_v43, %v1793_v46  ;;  %v1803_v1 = vpop.xlane.xlu0 %1802 }
 0x625   : > { %v1804_v5 = vrot.slane %v1803_v1, 4  ;;  %s2115_s0 = spop %2114 }
 0x626   : > { %v1796_v63 = vrot.slane %v1795_v20, 2  ;;  %v1882_v30 = vstv %s2115_s0 }
 0x627   : > { %v1805_v4 = vadd.f32 %v1804_v5, %v1803_v1  ;;  %v1883_v59 = vsel %vm1881_vm13, %v1882_v30, 0.0 }
 0x628   : > { %v1797_v47 = vadd.f32 %v1796_v63, %v1795_v20  ;;  %v1884_v17 = vadd.f32 %v1883_v59, %v3462_v62  ;;  %v1895_v62 = vsel %vm1893_vm15, %v1894_v37, 0.0  ;;  %v1830_v44 = vpop.xlane.xlu0 %1829 }
 0x629   : > { %v1806_v14 = vrot.slane %v1805_v4, 2  ;;  %v1831_v8 = vrot.slane %v1830_v44, 4 }
 0x62a   : > { %v1798_v36 = vrot.slane %v1797_v47, 1  ;;  %s2117_s4 = spop %2116  ;;  %v1888_v6 = vadd.f32 %v1887_v11, %v1884_v17 }
 0x62b   : > { %s2119_s7 = spop %2118  ;;  %v1807_v21 = vadd.f32 %v1806_v14, %v1805_v4  ;;  %v1898_v16 = vstv %s2117_s4  ;;  %v1832_v35 = vadd.f32 %v1831_v8, %v1830_v44  ;;  %s149_s4 = sand.u32 1, %s2299_s10  }
 0x62c   : > { %v1799_v2 = vadd.f32 %v1798_v36, %v1797_v47  ;;  %v1892_v48 = vadd.f32 %v1891_v57, %v1888_v6  ;;  %v1899_v39 = vsel %vm1897_vm1, %v1898_v16, 0.0  ;;  %v1914_v33 = vstv %s2119_s7 }
 0x62d   : > { %s3650_s25 = spop %2120  ;;  %v1808_v29 = vrot.slane %v1807_v21, 1  ;;  %v1915_v15 = vsel %vm1913_vm5, %v1914_v33, 0.0  ;;  %v1833_v50 = vrot.slane %v1832_v35, 2 }
 0x62e   : > { %s1536_s5 = sadd.f32 %s3650_s25, %s3472_s16  ;;  %2122 = vpush %v1799_v2  ;;  %v1896_v27 = vadd.f32 %v1895_v62, %v1892_v48 }
 0x62f   : > { %v1809_v42 = vadd.f32 %v1808_v29, %v1807_v21  ;;  %v1834_v31 = vadd.f32 %v1833_v50, %v1832_v35 }
 0x630   : > { %v1900_v55 = vadd.f32 %v1899_v39, %v1896_v27 }
 0x631   : > { %2124 = vpush %v1809_v42  ;;  %v1835_v24 = vrot.slane %v1834_v31, 1 }
 0x632   : > { %v1904_v9 = vadd.f32 %v1903_v54, %v1900_v55 }
 0x633   : > { %v1836_v13 = vadd.f32 %v1835_v24, %v1834_v31 }
 0x634   : > { %v1908_v26 = vadd.f32 %v1907_v22, %v1904_v9 }
 0x636   : > { %v1912_v49 = vadd.f32 %v1911_v40, %v1908_v26 }
 0x638   : > { %v3661_v52 = vadd.f32 %v1915_v15, %v1912_v49 }
 0x65f   : > { %s3663_s8 = spop %2122 }
 0x662   : > { %s2125_s27 = spop %2124 }
 0x663   : > { %s1811_s6 = sadd.f32 1e-07, %s2125_s27 }
 0x665   : > { %v1812_v61 = vstv %s1811_s6 }
 0x666   : > { %2236 = vrcp.f32 %v1812_v61 }
 0x670   : > { %v2237_v56 = vpop.eup %2236 }
 0x671   : > { %2126 = vpush %v2237_v56 }
 0x687   : > { %v1820_v28 = vpop.xlane.xlu1 %1819 }
 0x688   : > { %v1821_v38 = vrot.slane %v1820_v28, 4 }
 0x68a   : > { %v1822_v3 = vadd.f32 %v1821_v38, %v1820_v28 }
 0x68b   : > { %v1860_v18 = vpop.xlane.xlu1 %1859 }
 0x68c   : > { %v1823_v51 = vrot.slane %v1822_v3, 2  ;;  %v1861_v25 = vrot.slane %v1860_v18, 4 }
 0x68e   : > { %v1824_v34 = vadd.f32 %v1823_v51, %v1822_v3  ;;  %v1862_v23 = vadd.f32 %v1861_v25, %v1860_v18 }
 0x690   : > { %v1825_v10 = vrot.slane %v1824_v34, 1  ;;  %v1863_v53 = vrot.slane %v1862_v23, 2 }
 0x692   : > { %v1826_v19 = vadd.f32 %v1825_v10, %v1824_v34  ;;  %v1864_v43 = vadd.f32 %v1863_v53, %v1862_v23 }
 0x694   : > { %2128 = vpush %v1826_v19  ;;  %v1865_v20 = vrot.slane %v1864_v43, 1 }
 0x695   : > { %2130 = vpush %v1836_v13 }
 0x696   : > { %v1866_v63 = vadd.f32 %v1865_v20, %v1864_v43 }
 0x6a2   : > { %s2127_s24 = spop %2126 }
 0x6a3   : > { %s1815_s21 = smul.f32 %s2127_s24, %s3663_s8  ;;  %s2015_s8 = sshll.u32 %s149_s4, 3 }
 0x6a5   : > { %s1843_s22 = smul.f32 2.0, %s1815_s21 }
 0x6c5   : > { %s2129_s23 = spop %2128 }
 0x6c6   : > { %s2131_s17 = spop %2130 }
 0x6c7   : > { %s1838_s26 = sadd.f32 1e-07, %s2131_s17 }
 0x6c9   : > { %v1839_v0 = vstv %s1838_s26  ;;  %s2043_s26 = sshll.u32 %s2351_s13, 7  ;;  %s2314_s13 = smov [#allocation2]  }
 0x6ca   : > { %2238 = vrcp.f32 %v1839_v0  ;;  %s3678_s25 = scalar_lea.hbm %s3722_s2, %s2043_s26 }
 0x6d4   : > { %v2239_v41 = vpop.eup %2238 }
 0x6d5   : > { %2132 = vpush %v2239_v41 }
 0x706   : > { %s2133_s29 = spop %2132 }
 0x707   : > { %s1842_s28 = smul.f32 %s2133_s29, %s2129_s23 }
 0x709   : > { %s1845_s3 = sadd.f32 %s1842_s28, %s1815_s21  ;;  %s1844_s30 = smul.f32 %s1843_s22, %s1842_s28 }
 0x70a   : > { %s151_s21 = scalar_lea.vmem [#allocation2], %s2015_s8  ;;  %s2249_s28 = sshll.u32 %s2314_s13, 4  ;;  %s2250_s28 = int_to_ptr.vmem [resolvable:$false] %s2249_s28 }
 0x70b   : > { %s1846_s0 = sadd.f32 1e-07, %s1845_s3  ;;  %s1940_s22 = sshll.u32 %s151_s21, 4  ;;  %s3680_s22 = int_to_ptr.vmem [resolvable:$true] %s1940_s22 }
 0x70c   : > { %s2251_s3 = scalar_lea.vmem %s2250_s28, 256  ;;  %p2252_p0 = scmp.lt.s32.totalorder %s3680_s22, %s2250_s28 }
 0x70d   : > { %v1847_v46 = vstv %s1846_s0 }
 0x70e   : > { %2240 = vrcp.f32 %v1847_v46 }
 0x718   : > { %v2241_v1 = vpop.eup %2240 }
 0x719   : > { %2134 = vpush %v2241_v1 }
 0x71a   : > { %2136 = vpush %v1866_v63 }
 0x74a   : > { %s2135_s7 = spop %2134 }
 0x74b   : > { %s1850_s27 = smul.f32 %s2135_s7, %s1844_s30  ;;  %s2137_s6 = spop %2136 }
 0x74c   : > { %s1868_s24 = ssub.f32 %s2137_s6, %s1536_s5  ;;  %s2245_s5 = scalar_lea.vmem %s3680_s22, 128 }
 0x74d   : > { %s1851_s23 = ssub.f32 1.0, %s1850_s27  ;;  %p2246_p11 = scmp.ne.s32.totalorder %s3680_s22, %s2245_s5 }
 0x74e   : > { %v1918_v5 = vstv %s1868_s24  ;;  %p2253_p1 = scmp.lt.s32.totalorder %s2251_s3, %s2245_s5 }
 0x74f   : > { %s1852_s17 = sadd.f32 %s1851_s23, %s3610_s14  ;;  %v1919_v7 = vsel %vm1917_vm6, %v1918_v5, 0.0  ;;  %s1927_s14 = scalar_lea.sflag [#allocation3], %s149_s4 }
 0x750   : > { %v1920_v4 = vadd.f32 %v1919_v7, %v3661_v52  ;;  %p2247_p12 = pnand %p2246_p11, %p2368_p5  ;;  %p2254_p2 = por %p2253_p1, %p2252_p0 }
 0x751   : > { %v1922_v30 = vstv %s1852_s17 }
 0x752   : > { %v1923_v47 = vsel %vm1921_vm7, %v1922_v30, 0.0  ;;  %p2248_p13 = pneg %p2247_p12 }
 0x753   : > { %v1924_v59 = vadd.f32 %v1923_v47, %v1920_v4 }
 0x754   : > { %p2255_p3 = pnand %p2254_p2, %p2248_p13 }
 0x755   : > { %1925 = vst [vmem:[%s151_s21] sm:$0xff] %v1924_v59 }
 0x756   : > { %2258 = shalt.err (!%p2255_p3)
}
 0x757   : > { %s2259_s30 = scalar_lea.hbm %s3678_s25, 128  ;;  %s2263_s7 = scalar_lea.hbm %s3722_s2, 256 }
 0x758   : > { %p2260_p4 = scmp.ne.s32.totalorder %s3678_s25, %s2259_s30  ;;  %p2264_p9 = scmp.lt.u32.totalorder %s3678_s25, %s3722_s2 }
 0x759   : > { %p2265_p10 = scmp.lt.u32.totalorder %s2263_s7, %s2259_s30  ;;  %p2267_p12 = scmp.lt.u32.totalorder %s2259_s30, %s3678_s25 }
 0x75a   : > { %p2261_p7 = pnand %p2260_p4, %p2368_p5 }
 0x75b   : > { %p2266_p11 = por %p2265_p10, %p2264_p9 }
 0x75c   : > { %p2262_p8 = pneg %p2261_p7 }
 0x75d   : > { %p2268_p13 = por %p2267_p12, %p2266_p11 }
 0x75f   : > { %p2269_p0 = pnand %p2268_p13, %p2262_p8 }
 0x761   : > { %2272 = shalt.err (!%p2269_p0)
}
 0x762   : > { %2138 = dma.vmem_to_hbm [thread:$0]  (%p2368_p5), %s3680_s22, 128, %s3678_s25, %s1927_s14  }
 0x763 PF: > { %p2144_p1 = scmp.ge.s32.totalorder %s2307_s12, 2  ;;  %s1952_s6 = sand.u32 1, %s2295_s9  }
 0x764   : > { %s1953_s24 = scalar_lea.sflag [#allocation3], %s1952_s6 }
 0x765   : > { %p2141_p2 = pnand %p2144_p1, %p2372_p6 }
 0x767   : > { %2290 = dma.done.wait (!%p2141_p2), %s1953_s24, 128  }
 0x768   : > { %2292 = vsyncadd (!%p2141_p2), %s1953_s24, 4294967168  ;;  %p12_p3 = scmp.ge.s32.totalorder %s2355_s15, 4   ;;  %s3840_s9 = smov %s2299_s10 }
 0x769   : > { %s3841_s10 = smov %s2303_s11  ;;  %s3842_s11 = smov %s2366_s18 }
 0x76a   : > { %s3843_s12 = smov %s2355_s15  ;;  %14 = sbr.rel (!%p12_p3) target bundleno = 5 (0x5), region = 69 }
 0x771   :  { %1958 = vsyncpa [#allocation3], 1 }
 0x772   :  { %1960 = vsyncpa [#allocation3 + $0x1], 1 }

</bundles_post_ra>
